<compile_context>
chip_gen: v7x
topology: tpu7x:2x2x1
jax: 0.10.0
libtpu: 0.0.40
codegen_flags: <defaults>
</compile_context>

<pallas_src>
import functools
import math

import numpy as np
import jax
import jax.numpy as jnp
from jax.experimental import pallas as pl
from jax.experimental.pallas import tpu as pltpu


def _vmem_capacity_bytes():
    """Best-effort physical VMEM query; None if unavailable."""
    try:
        info = pltpu.get_tpu_info()
        for name in ("vmem_capacity_bytes", "vmem_bytes", "vmem_size_bytes",
                     "vmem_capacity", "vmem_size"):
            v = getattr(info, name, None)
            if isinstance(v, (int, np.integer)) and int(v) > 0:
                return int(v)
    except Exception:
        pass
    return None


def _pick_tile_rows(H, W, max_tile_elems):
    """Row tile TH (no 'divides H' requirement; wrapper ceil-div pads H).

    M = TH*W is made as large as the budget allows, aligned to a multiple of 256
    (MXU-friendly, esp. v6e) when affordable, else to a multiple of 8 (sublane-
    aligned stores + cheap (th,W,C)->(th*W,C) reshape).  A single full-extent
    tile needs no alignment."""
    th = min(max(1, max_tile_elems // W), H)
    if th >= H:
        return H                                   # one tile: block == full extent
    m256 = 256 // math.gcd(W, 256)
    m8 = 8 // math.gcd(W, 8)
    if th >= m256:
        th = (th // m256) * m256
    elif th >= m8:
        th = (th // m8) * m8
    else:
        th = min(m8, H)
    return max(th, 1)


def _upscale_conv_kernel(x_ref, w_ref, b_ref, o_ref, *, ksize, pad, th, act_slope,
                         per_tap, kdim):
    # x_ref: (Hp_t, Wp, Cin)  bf16 padded image, resident across the row-tile axis
    # w_ref: (kdim, Npad)     bf16 flattened weights (tap-major, channel-minor rows)
    # b_ref: (1, Npad)        f32 bias
    # o_ref: (th*W, Npad)     conv + LeakyReLU output slab for rows [r*th, r*th+th)
    Wp, Cin = x_ref.shape[1], x_ref.shape[2]
    W = Wp - 2 * pad
    M = th * W

    # Dynamic halo window: rows [r*th, r*th + th + 2*pad) of the padded image.
    row0 = pl.multiple_of(pl.program_id(1) * th, th)
    xwin = x_ref[pl.ds(row0, th + 2 * pad), :, :]            # (th+2p, Wp, Cin)

    if per_tap:
        # Cin is already MXU-deep: accumulate k*k per-tap matmuls on static views.
        # No (M, k*k*Cin) intermediate, no concat relayout.
        acc = None
        for kh in range(ksize):
            for kw in range(ksize):
                tap = kh * ksize + kw
                slab = xwin[kh:kh + th, kw:kw + W, :].reshape(M, Cin)
                d = jnp.dot(slab, w_ref[tap * Cin:(tap + 1) * Cin, :],
                            preferred_element_type=jnp.float32)
                acc = d if acc is None else acc + d
    else:
        # Small Cin: one deep im2col dot.  Contraction dim padded to kdim (%128==0)
        # so the MXU K-feed is full-width (weight rows already zero-padded).
        patches = [xwin[kh:kh + th, kw:kw + W, :]
                   for kh in range(ksize) for kw in range(ksize)]
        k9 = ksize * ksize * Cin
        if kdim > k9:
            patches.append(jnp.zeros((th, W, kdim - k9), xwin.dtype))
        cols = jnp.concatenate(patches, axis=-1).reshape(M, kdim)
        acc = jnp.dot(cols, w_ref[...], preferred_element_type=jnp.float32)

    acc = acc + b_ref[...]                                    # f32 bias
    acc = jnp.where(acc >= 0.0, acc, act_slope * acc)         # LeakyReLU in f32
    o_ref[...] = acc.astype(o_ref.dtype)                      # bf16 slab store


def upscale_pallas(x_nchw, weight, bias, *, kernel_size=3, act_slope=0.1,
                   mult_fact=2, compute_dtype=jnp.bfloat16):
    """Forward pass of Upscale. x_nchw: (B, Cin, H, W); weight: (Cout4, Cin, k, k)."""
    assert kernel_size % 2 == 1, "SAME-style padding requires odd kernel_size"
    B, Cin, H, W = x_nchw.shape
    Cout4 = weight.shape[0]
    f = mult_fact
    C = Cout4 // (f * f)
    assert C * f * f == Cout4
    pad = max(kernel_size // 2, 0)
    out_dtype = x_nchw.dtype

    # Lane-dense N only when the padding is cheap; small Cout4 keeps exact width
    # (masked store instead of up to 8x zero-channel HBM writes).
    Npad = ((Cout4 + 127) // 128) * 128 if Cout4 >= 128 else Cout4

    # ---- generation-aware sizing ----
    vmem_cap = _vmem_capacity_bytes()
    if vmem_cap is None:                         # unknown chip: proven-safe defaults
        max_tile_elems, vmem_limit = 2048, 32 * 2**20
    elif vmem_cap >= 96 * 2**20:                 # v5e / v6e: 128 MiB VMEM
        max_tile_elems, vmem_limit = 4096, 96 * 2**20
    else:                                        # v7x: 64 MiB VMEM per TC
        max_tile_elems, vmem_limit = 1024, min(48 * 2**20, vmem_cap * 3 // 4)
    # Keep the per-step output slab (2x bf16 buffers + f32 acc) under ~half the limit.
    max_tile_elems = min(max_tile_elems, max(256, vmem_limit // (16 * max(Npad, 1))))

    TH = _pick_tile_rows(H, W, max_tile_elems)
    n_r = pl.cdiv(H, TH)
    H_t = n_r * TH                               # ceil-div row tiling (ragged H ok)
    Hp_t, Wp = H_t + 2 * pad, W + 2 * pad

    per_tap = Cin >= 128
    K9 = kernel_size * kernel_size * Cin
    Kdim = K9 if per_tap else ((K9 + 127) // 128) * 128

    # NCHW -> NHWC (channels on lanes), pad spatial dims (conv halo + row-tile
    # remainder at the bottom), cast to bf16.
    x_nhwc = jnp.transpose(x_nchw, (0, 2, 3, 1))
    x_pad = jnp.pad(x_nhwc, ((0, 0), (pad, pad + (H_t - H)), (pad, pad), (0, 0))
                    ).astype(compute_dtype)

    # (Cout4, Cin, k, k) -> (k, k, Cin, Cout4) -> (Kdim, Npad), bf16.
    # Row index = (kh*k + kw)*Cin + c matches the in-kernel tap/channel order.
    w_mat = jnp.transpose(weight, (2, 3, 1, 0)).reshape(K9, Cout4)
    w_mat = jnp.pad(w_mat, ((0, Kdim - K9), (0, Npad - Cout4))).astype(compute_dtype)
    b_mat = jnp.pad(bias.reshape(1, Cout4).astype(jnp.float32),
                    ((0, 0), (0, Npad - Cout4)))

    kern = functools.partial(_upscale_conv_kernel, ksize=kernel_size, pad=pad,
                             th=TH, act_slope=act_slope, per_tap=per_tap, kdim=Kdim)

    def run(const_mode):
        extra = {} if const_mode is None else {"pipeline_mode": const_mode}
        call = pl.pallas_call(
            kern,
            out_shape=jax.ShapeDtypeStruct((B, H_t * W, Npad), compute_dtype),
            grid=(B, n_r),
            in_specs=[
                # whole padded image per batch element, resident across the row axis
                pl.BlockSpec((None, Hp_t, Wp, Cin), lambda b, r: (b, 0, 0, 0)),
                # constant operands: fetched once for the whole grid
                pl.BlockSpec((Kdim, Npad), lambda b, r: (0, 0), **extra),
                pl.BlockSpec((1, Npad), lambda b, r: (0, 0), **extra),
            ],
            out_specs=pl.BlockSpec((None, TH * W, Npad), lambda b, r: (b, r, 0)),
            compiler_params=pltpu.CompilerParams(
                dimension_semantics=("parallel", "parallel"),
                vmem_limit_bytes=vmem_limit,
            ),
        )
        return call(x_pad, w_mat, b_mat)

    try:
        # Single-buffer the constant weight/bias operands (halves their VMEM use,
        # zero perf cost since they are never re-DMA'd).
        conv_flat = jax.block_until_ready(run(pl.Buffered(1)))
    except Exception:
        # Fallback if this JAX/Mosaic version rejects buffer_count=1.
        conv_flat = run(None)

    # depth_to_space(mult_fact): conv channel o = (fh*f + fw)*C + c
    #   -> out[n, c, f*h + fh, f*w + fw].  Pure relayout (XLA glue), on bf16.
    y = conv_flat[:, :H * W, :Cout4].reshape(B, H, W, f, f, C)
    y = jnp.transpose(y, (0, 1, 3, 2, 4, 5)).reshape(B, H * f, W * f, C)
    return jnp.transpose(y, (0, 3, 1, 2)).astype(out_dtype)     # back to NCHW


def upscale_reference(x_nchw, weight, bias, *, act_slope=0.1, mult_fact=2):
    """Pure-JAX reference mirroring the PyTorch module (f32 conv)."""
    B, Cin, H, W = x_nchw.shape
    Cout4 = weight.shape[0]
    C = Cout4 // (mult_fact ** 2)
    y = jax.lax.conv_general_dilated(
        x_nchw, weight, window_strides=(1, 1), padding="SAME",
        dimension_numbers=("NCHW", "OIHW", "NCHW"),
        precision=jax.lax.Precision.HIGHEST)
    y = y + bias[None, :, None, None]
    y = jnp.where(y >= 0.0, y, act_slope * y)
    # depth_to_space (channel re-index + pixel_shuffle)
    sub = C
    indices = np.concatenate([np.arange(i, Cout4, sub) for i in range(sub)])
    y = y[:, indices, :, :]
    f = mult_fact
    y = y.reshape(B, C, f, f, H, W)
    y = jnp.transpose(y, (0, 1, 4, 2, 5, 3)).reshape(B, C, H * f, W * f)
    return y


if __name__ == "__main__":
    B, in_ch, out_ch, H, W = 2, 4, 4, 16, 16
    mult_fact, kernel_size, act_slope = 2, 3, 0.1

    key = jax.random.PRNGKey(0)
    kx, kw, kb = jax.random.split(key, 3)
    x = jax.random.normal(kx, (B, in_ch, H, W), jnp.float32)
    weight = jax.random.normal(
        kw, (out_ch * mult_fact ** 2, in_ch, kernel_size, kernel_size), jnp.float32) * 0.1
    bias = jax.random.normal(kb, (out_ch * mult_fact ** 2,), jnp.float32) * 0.1

    out = upscale_pallas(x, weight, bias, kernel_size=kernel_size,
                         act_slope=act_slope, mult_fact=mult_fact)
    out = jax.block_until_ready(out)
    assert out.shape == (B, out_ch, H * mult_fact, W * mult_fact), out.shape
    assert out.dtype == x.dtype, out.dtype

    # Matched-quantization check: kernel uses bf16 operands, exact f32 accumulation,
    # then rounds the conv+act slab to bf16.  depth_to_space is a pure permutation,
    # so round the reference output (on bf16-rounded operands) the same way.
    x_r = x.astype(jnp.bfloat16).astype(jnp.float32)
    w_r = weight.astype(jnp.bfloat16).astype(jnp.float32)
    ref_q = upscale_reference(x_r, w_r, bias, act_slope=act_slope, mult_fact=mult_fact)
    ref_q = ref_q.astype(jnp.bfloat16).astype(jnp.float32)
    np.testing.assert_allclose(np.asarray(out), np.asarray(ref_q), rtol=2e-2, atol=1e-2)

    # Sanity check against the full-f32 reference (bf16 quantization tolerance).
    ref_f32 = upscale_reference(x, weight, bias, act_slope=act_slope, mult_fact=mult_fact)
    np.testing.assert_allclose(np.asarray(out), np.asarray(ref_f32), rtol=5e-2, atol=5e-2)

    print("KERNEL_OK")
</pallas_src>

<mosaic_0001>
module attributes {stable_mosaic.version = 11 : i64} {
  func.func @_upscale_conv_kernel(%arg0: i32, %arg1: i32, %arg2: memref<1x18x18x4xbf16, #tpu.memory_space<vmem>>, %arg3: memref<128x16xbf16, #tpu.memory_space<vmem>>, %arg4: memref<1x16xf32, #tpu.memory_space<vmem>>, %arg5: memref<1x256x16xbf16, #tpu.memory_space<vmem>>) attributes {dimension_semantics = [#tpu.dimension_semantics<parallel>, #tpu.dimension_semantics<parallel>], iteration_bounds = array<i64: 2, 1>, scalar_prefetch = 0 : i64, scratch_operands = 0 : i64, tpu.core_type = #tpu.core_type<tc>, window_params = [{transform_indices = @transform_0, window_bounds = array<i64: 1, 18, 18, 4>}, {pipeline_mode = #tpu.pipeline_mode<synchronous>, transform_indices = @transform_1, window_bounds = array<i64: 128, 16>}, {pipeline_mode = #tpu.pipeline_mode<synchronous>, transform_indices = @transform_2, window_bounds = array<i64: 1, 16>}, {transform_indices = @transform_3, window_bounds = array<i64: 1, 256, 16>}]} {
    %c16_i32 = arith.constant 16 : i32
    %0 = arith.muli %arg1, %c16_i32 : i32
    %1 = tpu.assume_multiple %0, 16 : i32
    %c0 = arith.constant 0 : index
    %2 = arith.index_cast %1 : i32 to index
    %c0_0 = arith.constant 0 : index
    %c0_1 = arith.constant 0 : index
    %3 = vector.load %arg2[%c0, %2, %c0_0, %c0_1] : memref<1x18x18x4xbf16, #tpu.memory_space<vmem>>, vector<1x18x18x4xbf16>
    %4 = vector.shape_cast %3 : vector<1x18x18x4xbf16> to vector<18x18x4xbf16>
    %5 = vector.extract_strided_slice %4 {offsets = [0, 0, 0], sizes = [16, 16, 4], strides = [1, 1, 1]} : vector<18x18x4xbf16> to vector<16x16x4xbf16>
    %6 = vector.extract_strided_slice %4 {offsets = [0, 1, 0], sizes = [16, 16, 4], strides = [1, 1, 1]} : vector<18x18x4xbf16> to vector<16x16x4xbf16>
    %7 = vector.extract_strided_slice %4 {offsets = [0, 2, 0], sizes = [16, 16, 4], strides = [1, 1, 1]} : vector<18x18x4xbf16> to vector<16x16x4xbf16>
    %8 = vector.extract_strided_slice %4 {offsets = [1, 0, 0], sizes = [16, 16, 4], strides = [1, 1, 1]} : vector<18x18x4xbf16> to vector<16x16x4xbf16>
    %9 = vector.extract_strided_slice %4 {offsets = [1, 1, 0], sizes = [16, 16, 4], strides = [1, 1, 1]} : vector<18x18x4xbf16> to vector<16x16x4xbf16>
    %10 = vector.extract_strided_slice %4 {offsets = [1, 2, 0], sizes = [16, 16, 4], strides = [1, 1, 1]} : vector<18x18x4xbf16> to vector<16x16x4xbf16>
    %11 = vector.extract_strided_slice %4 {offsets = [2, 0, 0], sizes = [16, 16, 4], strides = [1, 1, 1]} : vector<18x18x4xbf16> to vector<16x16x4xbf16>
    %12 = vector.extract_strided_slice %4 {offsets = [2, 1, 0], sizes = [16, 16, 4], strides = [1, 1, 1]} : vector<18x18x4xbf16> to vector<16x16x4xbf16>
    %13 = vector.extract_strided_slice %4 {offsets = [2, 2, 0], sizes = [16, 16, 4], strides = [1, 1, 1]} : vector<18x18x4xbf16> to vector<16x16x4xbf16>
    %cst = arith.constant 0.000000e+00 : bf16
    %14 = vector.broadcast %cst : bf16 to vector<16x16x92xbf16>
    %15 = tpu.concatenate %5, %6, %7, %8, %9, %10, %11, %12, %13, %14 in 2 : vector<16x16x4xbf16>, vector<16x16x4xbf16>, vector<16x16x4xbf16>, vector<16x16x4xbf16>, vector<16x16x4xbf16>, vector<16x16x4xbf16>, vector<16x16x4xbf16>, vector<16x16x4xbf16>, vector<16x16x4xbf16>, vector<16x16x92xbf16> -> vector<16x16x128xbf16>
    %16 = vector.shape_cast %15 : vector<16x16x128xbf16> to vector<256x128xbf16>
    %c0_2 = arith.constant 0 : index
    %c0_3 = arith.constant 0 : index
    %17 = vector.load %arg3[%c0_2, %c0_3] : memref<128x16xbf16, #tpu.memory_space<vmem>>, vector<128x16xbf16>
    %cst_4 = arith.constant dense<0.000000e+00> : vector<256x16xf32>
    %18 = tpu.matmul %16, %17, %cst_4 {dimension_numbers = #tpu.dot_dimension_numbers<[1], [0], [0], [1], [0, 0, 1, 1], [], []>} : vector<256x128xbf16>, vector<128x16xbf16>, vector<256x16xf32> -> vector<256x16xf32>
    %c0_5 = arith.constant 0 : index
    %c0_6 = arith.constant 0 : index
    %19 = vector.load %arg4[%c0_5, %c0_6] : memref<1x16xf32, #tpu.memory_space<vmem>>, vector<1x16xf32>
    %20 = vector.broadcast %19 : vector<1x16xf32> to vector<256x16xf32>
    %21 = arith.addf %18, %20 : vector<256x16xf32>
    %cst_7 = arith.constant 0.000000e+00 : f32
    %22 = vector.broadcast %cst_7 : f32 to vector<256x16xf32>
    %23 = arith.cmpf oge, %21, %22 : vector<256x16xf32>
    %cst_8 = arith.constant 1.000000e-01 : f32
    %24 = vector.broadcast %cst_8 : f32 to vector<256x16xf32>
    %25 = arith.mulf %24, %21 : vector<256x16xf32>
    %26 = arith.select %23, %21, %25 : vector<256x16xi1>, vector<256x16xf32>
    %27 = arith.truncf %26 : vector<256x16xf32> to vector<256x16xbf16>
    %c0_9 = arith.constant 0 : index
    %c0_10 = arith.constant 0 : index
    %c0_11 = arith.constant 0 : index
    %28 = vector.load %arg5[%c0_9, %c0_10, %c0_11] : memref<1x256x16xbf16, #tpu.memory_space<vmem>>, vector<1x256x16xbf16>
    %29 = vector.shape_cast %28 : vector<1x256x16xbf16> to vector<256x16xbf16>
    %30 = vector.shape_cast %27 : vector<256x16xbf16> to vector<1x256x16xbf16>
    tpu.vector_store %arg5[%c0_9, %c0_10, %c0_11], %30 {strides = array<i32>} : memref<1x256x16xbf16, #tpu.memory_space<vmem>>, vector<1x256x16xbf16>,
    return
  }
  func.func @transform_0(%arg0: i32, %arg1: i32) -> (i32, i32, i32, i32) {
    %c0_i32 = arith.constant 0 : i32
    %c0_i32_0 = arith.constant 0 : i32
    %c0_i32_1 = arith.constant 0 : i32
    %c0_i32_2 = arith.constant 0 : i32
    return %arg0, %c0_i32, %c0_i32_0, %c0_i32_1 : i32, i32, i32, i32
  }
  func.func @transform_1(%arg0: i32, %arg1: i32) -> (i32, i32) {
    %c0_i32 = arith.constant 0 : i32
    %c0_i32_0 = arith.constant 0 : i32
    %c0_i32_1 = arith.constant 0 : i32
    return %c0_i32, %c0_i32_0 : i32, i32
  }
  func.func @transform_2(%arg0: i32, %arg1: i32) -> (i32, i32) {
    %c0_i32 = arith.constant 0 : i32
    %c0_i32_0 = arith.constant 0 : i32
    %c0_i32_1 = arith.constant 0 : i32
    return %c0_i32, %c0_i32_0 : i32, i32
  }
  func.func @transform_3(%arg0: i32, %arg1: i32) -> (i32, i32, i32) {
    %c0_i32 = arith.constant 0 : i32
    %c0_i32_0 = arith.constant 0 : i32
    return %arg0, %arg1, %c0_i32 : i32, i32, i32
  }
}

module attributes {stable_mosaic.version = 11 : i64} {
  func.func @_upscale_conv_kernel(%arg0: i32, %arg1: i32, %arg2: memref<1x18x18x4xbf16, #tpu.memory_space<vmem>>, %arg3: memref<128x16xbf16, #tpu.memory_space<vmem>>, %arg4: memref<1x16xf32, #tpu.memory_space<vmem>>, %arg5: memref<1x256x16xbf16, #tpu.memory_space<vmem>>) attributes {dimension_semantics = [#tpu.dimension_semantics<parallel>, #tpu.dimension_semantics<parallel>], iteration_bounds = array<i64: 2, 1>, scalar_prefetch = 0 : i64, scratch_operands = 0 : i64, tpu.core_type = #tpu.core_type<tc>, window_params = [{transform_indices = @transform_0, window_bounds = array<i64: 1, 18, 18, 4>}, {pipeline_mode = #tpu.pipeline_mode<synchronous>, transform_indices = @transform_1, window_bounds = array<i64: 128, 16>}, {pipeline_mode = #tpu.pipeline_mode<synchronous>, transform_indices = @transform_2, window_bounds = array<i64: 1, 16>}, {transform_indices = @transform_3, window_bounds = array<i64: 1, 256, 16>}]} {
    %c16_i32 = arith.constant 16 : i32
    %0 = arith.muli %arg1, %c16_i32 : i32
    %1 = tpu.assume_multiple %0, 16 : i32
    %c0 = arith.constant 0 : index
    %2 = arith.index_cast %1 : i32 to index
    %c0_0 = arith.constant 0 : index
    %c0_1 = arith.constant 0 : index
    %3 = vector.load %arg2[%c0, %2, %c0_0, %c0_1] : memref<1x18x18x4xbf16, #tpu.memory_space<vmem>>, vector<1x18x18x4xbf16>
    %4 = vector.shape_cast %3 : vector<1x18x18x4xbf16> to vector<18x18x4xbf16>
    %5 = vector.extract_strided_slice %4 {offsets = [0, 0, 0], sizes = [16, 16, 4], strides = [1, 1, 1]} : vector<18x18x4xbf16> to vector<16x16x4xbf16>
    %6 = vector.extract_strided_slice %4 {offsets = [0, 1, 0], sizes = [16, 16, 4], strides = [1, 1, 1]} : vector<18x18x4xbf16> to vector<16x16x4xbf16>
    %7 = vector.extract_strided_slice %4 {offsets = [0, 2, 0], sizes = [16, 16, 4], strides = [1, 1, 1]} : vector<18x18x4xbf16> to vector<16x16x4xbf16>
    %8 = vector.extract_strided_slice %4 {offsets = [1, 0, 0], sizes = [16, 16, 4], strides = [1, 1, 1]} : vector<18x18x4xbf16> to vector<16x16x4xbf16>
    %9 = vector.extract_strided_slice %4 {offsets = [1, 1, 0], sizes = [16, 16, 4], strides = [1, 1, 1]} : vector<18x18x4xbf16> to vector<16x16x4xbf16>
    %10 = vector.extract_strided_slice %4 {offsets = [1, 2, 0], sizes = [16, 16, 4], strides = [1, 1, 1]} : vector<18x18x4xbf16> to vector<16x16x4xbf16>
    %11 = vector.extract_strided_slice %4 {offsets = [2, 0, 0], sizes = [16, 16, 4], strides = [1, 1, 1]} : vector<18x18x4xbf16> to vector<16x16x4xbf16>
    %12 = vector.extract_strided_slice %4 {offsets = [2, 1, 0], sizes = [16, 16, 4], strides = [1, 1, 1]} : vector<18x18x4xbf16> to vector<16x16x4xbf16>
    %13 = vector.extract_strided_slice %4 {offsets = [2, 2, 0], sizes = [16, 16, 4], strides = [1, 1, 1]} : vector<18x18x4xbf16> to vector<16x16x4xbf16>
    %cst = arith.constant 0.000000e+00 : bf16
    %14 = vector.broadcast %cst : bf16 to vector<16x16x92xbf16>
    %15 = tpu.concatenate %5, %6, %7, %8, %9, %10, %11, %12, %13, %14 in 2 : vector<16x16x4xbf16>, vector<16x16x4xbf16>, vector<16x16x4xbf16>, vector<16x16x4xbf16>, vector<16x16x4xbf16>, vector<16x16x4xbf16>, vector<16x16x4xbf16>, vector<16x16x4xbf16>, vector<16x16x4xbf16>, vector<16x16x92xbf16> -> vector<16x16x128xbf16>
    %16 = vector.shape_cast %15 : vector<16x16x128xbf16> to vector<256x128xbf16>
    %c0_2 = arith.constant 0 : index
    %c0_3 = arith.constant 0 : index
    %17 = vector.load %arg3[%c0_2, %c0_3] : memref<128x16xbf16, #tpu.memory_space<vmem>>, vector<128x16xbf16>
    %cst_4 = arith.constant dense<0.000000e+00> : vector<256x16xf32>
    %18 = tpu.matmul %16, %17, %cst_4 {dimension_numbers = #tpu.dot_dimension_numbers<[1], [0], [0], [1], [0, 0, 1, 1], [], []>} : vector<256x128xbf16>, vector<128x16xbf16>, vector<256x16xf32> -> vector<256x16xf32>
    %c0_5 = arith.constant 0 : index
    %c0_6 = arith.constant 0 : index
    %19 = vector.load %arg4[%c0_5, %c0_6] : memref<1x16xf32, #tpu.memory_space<vmem>>, vector<1x16xf32>
    %20 = vector.broadcast %19 : vector<1x16xf32> to vector<256x16xf32>
    %21 = arith.addf %18, %20 : vector<256x16xf32>
    %cst_7 = arith.constant 0.000000e+00 : f32
    %22 = vector.broadcast %cst_7 : f32 to vector<256x16xf32>
    %23 = arith.cmpf oge, %21, %22 : vector<256x16xf32>
    %cst_8 = arith.constant 1.000000e-01 : f32
    %24 = vector.broadcast %cst_8 : f32 to vector<256x16xf32>
    %25 = arith.mulf %24, %21 : vector<256x16xf32>
    %26 = arith.select %23, %21, %25 : vector<256x16xi1>, vector<256x16xf32>
    %27 = arith.truncf %26 : vector<256x16xf32> to vector<256x16xbf16>
    %c0_9 = arith.constant 0 : index
    %c0_10 = arith.constant 0 : index
    %c0_11 = arith.constant 0 : index
    %28 = vector.load %arg5[%c0_9, %c0_10, %c0_11] : memref<1x256x16xbf16, #tpu.memory_space<vmem>>, vector<1x256x16xbf16>
    %29 = vector.shape_cast %28 : vector<1x256x16xbf16> to vector<256x16xbf16>
    %30 = vector.shape_cast %27 : vector<256x16xbf16> to vector<1x256x16xbf16>
    tpu.vector_store %arg5[%c0_9, %c0_10, %c0_11], %30 {strides = array<i32>} : memref<1x256x16xbf16, #tpu.memory_space<vmem>>, vector<1x256x16xbf16>,
    return
  }
  func.func @transform_0(%arg0: i32, %arg1: i32) -> (i32, i32, i32, i32) {
    %c0_i32 = arith.constant 0 : i32
    %c0_i32_0 = arith.constant 0 : i32
    %c0_i32_1 = arith.constant 0 : i32
    %c0_i32_2 = arith.constant 0 : i32
    return %arg0, %c0_i32, %c0_i32_0, %c0_i32_1 : i32, i32, i32, i32
  }
  func.func @transform_1(%arg0: i32, %arg1: i32) -> (i32, i32) {
    %c0_i32 = arith.constant 0 : i32
    %c0_i32_0 = arith.constant 0 : i32
    %c0_i32_1 = arith.constant 0 : i32
    return %c0_i32, %c0_i32_0 : i32, i32
  }
  func.func @transform_2(%arg0: i32, %arg1: i32) -> (i32, i32) {
    %c0_i32 = arith.constant 0 : i32
    %c0_i32_0 = arith.constant 0 : i32
    %c0_i32_1 = arith.constant 0 : i32
    return %c0_i32, %c0_i32_0 : i32, i32
  }
  func.func @transform_3(%arg0: i32, %arg1: i32) -> (i32, i32, i32) {
    %c0_i32 = arith.constant 0 : i32
    %c0_i32_0 = arith.constant 0 : i32
    return %arg0, %arg1, %c0_i32 : i32, i32, i32
  }
}

</mosaic_0001>

<bundles_post_ra>
// kernel: tpu_custom_call.1
= control target key start
LH: loop header
LB: loop body
LE: loop exit
PB: predicated region body
PF: predicated region fallthrough
CT: control target
= control target key end

     0   :  { %s2150_s12 = smov 0   ;;  %s2152_s13 = smov 0   ;;  %s2983_s0 = inlined_call_operand.vmem [shape: bf16[2,18,18,4], index: 0, kind: input, shape index: {}]   ;;  %s2984_s1 = inlined_call_operand.vmem [shape: bf16[128,16], index: 1, kind: input, shape index: {}]   ;;  %s2985_s2 = inlined_call_operand.vmem [shape: f32[1,16], index: 2, kind: input, shape index: {}]   ;;  %s2986_s3 = inlined_call_operand.vmem [shape: bf16[2,256,16], index: 3, kind: output, shape index: {}]  }
   0x1   :  { %s2154_s14 = smov 0  }
   0x2 LB: > { %s25_s15 = sadd.s32 1, %s2116_s13  ;;  %p1799_p0 = scmp.ge.s32.totalorder %s2120_s14, 1  ;;  %s2120_s14 = sphi %s2154_s14, %s13_s14   ;;  %s2116_s13 = sphi %s2152_s13, %s2988_s13   ;;  %s2112_s12 = sphi %s2150_s12, %s2987_s12  }
   0x3   : > { %p27_p1 = scmp.ge.s32.totalorder %s25_s15, 2  ;;  %p151_p2 = scmp.lt.s32.totalorder %s2120_s14, 3 }
   0x5   : > { %s2990_s15 = smov (%p27_p1, %s25_s15), 0  ;;  %p152_p3 = pnand %p1799_p0, %p151_p2 }
   0x6   : > { %p179_p4 = scmp.lt.s32.totalorder (!%p152_p3), %s2112_s12, 1  ;;  %vm606_vm0 = vcmask (!%p152_p3), 1046528   ;;  %s2122_s20 = smov (!%p152_p3), 12   ;;  %vm381_vm1 = vsmask.f32 (!%p152_p3), 7424  ;;  %v2076_v62 = vld [vmem:[%s2984_s1] sm:$0xff] (!%p152_p3)  }
   0x7   : > { %155 = sbr.rel (%p152_p3) target bundleno = 614 (0x266), region = 32  ;;  %s2123_s21 = smov (!%p152_p3), 8   ;;  %1955 = vmatprep.subr.bf16.mxu0 (!%p152_p3), %v2076_v62  ;;  %2003 = vmatprep.subr.bf16.mxu1 (!%p152_p3), %v2076_v62  ;;  %vm925_vm2 = vcmask (!%p152_p3), 31744   ;;  %vm958_vm3 = vcmask (!%p152_p3), 64512   ;;  %vm1024_vm4 = vcmask (!%p152_p3), 130048   ;;  %vm991_vm5 = vcmask (!%p152_p3), 97280  }
   0x8   : > { %s2124_s22 = smov (!%p152_p3), 4   ;;  %s2125_s25 = smov (!%p152_p3), 16   ;;  %1956 = vmatpush3.bf16.msra.mxu0 (!%p152_p3), %v2076_v62  ;;  %2011 = vmatpush3.bf16.msra.mxu1 (!%p152_p3), %v2076_v62  ;;  %vm1057_vm6 = vcmask (!%p152_p3), 162816   ;;  %vm1090_vm7 = vcmask (!%p152_p3), 195584   ;;  %vm1123_vm8 = vcmask (!%p152_p3), 228352   ;;  %vm1156_vm9 = vcmask (!%p152_p3), 261120  }
   0x9   : > { %s2126_s28 = smov (!%p152_p3), 20   ;;  %s2127_s8 = smov (!%p152_p3), 24   ;;  %vm1189_vm10 = vcmask (!%p152_p3), 293888   ;;  %vm1679_vm11 = vcmask (!%p152_p3), 125952  }
   0xa   : > { %s2128_s17 = smov (!%p152_p3), 28   ;;  %s2129_s24 = smov (!%p152_p3), 32  }
   0xe   : > { %s2992_s12 = smov (!%p179_p4, %s2112_s12), 1 }
   0xf   : > { %s2019_s16 = smul.u32 216, %s2992_s12 }
  0x11   : > { %s2174_s19 = scalar_lea.vmem %s2983_s0, %s2019_s16 }
  0x12   : > { %v2177_v0 = vld [vmem:[%s2174_s19 + $0x6c] sm:$0xff]   ;;  %v2187_v2 = vld [vmem:[%s2174_s19 + $0x60] sm:$0xff]   ;;  %v2055_v3 = vld [vmem:[%s2174_s19 + $0x68] ss:$0 sps:$4 sm:$0x11]  }
  0x13   : > { %v2180_v1 = vld [vmem:[%s2174_s19 + $0xc] sm:$0xff]   ;;  %708 = vrot.lane.b32.xlu1 %v2177_v0, %s2122_s20  ;;  %v2191_v4 = vld [vmem:[%s2174_s19] sm:$0xff]   ;;  %v634_v5 = vrot.slane %v2177_v0, 1  ;;  %v631_v6 = vrot.slane %v2187_v2, 1  ;;  %v632_v7 = vrot.slane %v2055_v3, 1  ;;  %v491_v26 = vshrl.u32 %v2177_v0, 16 }
  0x14   : > { %692 = vrot.lane.b32.xlu0 %v2180_v1, %s2122_s20  ;;  %v2057_v8 = vld [vmem:[%s2174_s19 + $0x8] ss:$0 sps:$4 sm:$0x11]   ;;  %v610_v9 = vrot.slane %v2180_v1, 1  ;;  %v607_v10 = vrot.slane %v2191_v4, 1  ;;  %v395_v16 = vshrl.u32 %v2180_v1, 16 }
  0x15   : > { %v2058_v11 = vld [vmem:[%s2174_s19 + $0x74] ss:$0 sps:$4 sm:$0x11]   ;;  %v2200_v12 = vsel %vm606_vm0, %v631_v6, %v632_v7  ;;  %v608_v13 = vrot.slane %v2057_v8, 1  ;;  %v397_v17 = vshll.u32 %v2180_v1, 16  ;;  %v383_v18 = vshrl.u32 %v2191_v4, 16 }
  0x16   : > { %v2059_v14 = vld [vmem:[%s2174_s19 + $0x14] ss:$0 sps:$4 sm:$0x11]   ;;  %v635_v15 = vrot.slane %v2058_v11, 1  ;;  %v385_v22 = vshll.u32 %v2191_v4, 16  ;;  %v390_v25 = vshll.u32 %v2057_v8, 16 }
  0x17   : > { %671 = vrot.lane.b32.xlu1 %v2200_v12, %s2123_s21  ;;  %v609_v19 = vsel %vm606_vm0, %v607_v10, %v608_v13  ;;  %v611_v20 = vrot.slane %v2059_v14, 1  ;;  %v402_v21 = vshll.u32 %v2059_v14, 16  ;;  %v399_v24 = vrot.slane %v397_v17, 1  ;;  %v2224_v39 = vld [vmem:[%s2174_s19 + $0x78] sm:$0xff]   ;;  %v2277_v13 = vld [vmem:[%s2174_s19 + $0x84] sm:$0xff]  }
  0x18   : > { %655 = vrot.lane.b32.xlu0 %v609_v19, %s2123_s21  ;;  %v2212_v23 = vsel %vm606_vm0, %v634_v5, %v635_v15  ;;  %v387_v29 = vrot.slane %v385_v22, 1  ;;  %v493_v30 = vshll.u32 %v2177_v0, 16  ;;  %v392_v32 = vrot.slane %v390_v25, 1  ;;  %v2231_v46 = vld [vmem:[%s2174_s19 + $0x18] sm:$0xff]   ;;  %v2280_v14 = vld [vmem:[%s2174_s19 + $0x24] sm:$0xff]   ;;  %v2080_v15 = vld [vmem:[%s2984_s1 + $0x10] sm:$0xff]  }
  0x19   : > { %v2216_v27 = vsel %vm606_vm0, %v610_v9, %v611_v20  ;;  %v404_v28 = vrot.slane %v402_v21, 1  ;;  %v400_v31 = vor.u32 %v399_v24, %v395_v16  ;;  %v498_v33 = vshll.u32 %v2058_v11, 16  ;;  %v2062_v47 = vld [vmem:[%s2174_s19 + $0x80] ss:$0 sps:$4 sm:$0x11]   ;;  %v2079_v9 = vld [vmem:[%s2984_s1 + $0x8] sm:$0xff]  }
  0x1a   : > { %v479_v34 = vshrl.u32 %v2187_v2, 16  ;;  %v388_v35 = vor.u32 %v387_v29, %v383_v18  ;;  %v495_v36 = vrot.slane %v493_v30, 1  ;;  %v481_v37 = vshll.u32 %v2187_v2, 16  ;;  %v2063_v52 = vld [vmem:[%s2174_s19 + $0x20] ss:$0 sps:$4 sm:$0x11]   ;;  %1957 = vmatprep.subr.bf16.mxu0 %v2079_v9  ;;  %2004 = vmatprep.subr.bf16.mxu1 %v2079_v9 }
  0x1b   : > { %673 = vrot.lane.b32.xlu1 %v2212_v23, %s2123_s21  ;;  %v486_v38 = vshll.u32 %v2055_v3, 16  ;;  %v405_v40 = vsel %vm381_vm1, %v400_v31, %v404_v28  ;;  %v500_v41 = vrot.slane %v498_v33, 1  ;;  %v505_v50 = vshll.u32 %v2224_v39, 16  ;;  %1958 = vmatpush3.bf16.msra.mxu0 %v2079_v9  ;;  %v2293_v17 = vld [vmem:[%s2174_s19 + $0x8c] ss:$0 sps:$4 sm:$0x11]  }
  0x1c   : > { %657 = vrot.lane.b32.xlu0 %v2216_v27, %s2123_s21  ;;  %v393_v42 = vsel %vm381_vm1, %v388_v35, %v392_v32  ;;  %v496_v43 = vor.u32 %v495_v36, %v491_v26  ;;  %v483_v44 = vrot.slane %v481_v37, 1  ;;  %v409_v53 = vshll.u32 %v2231_v46, 16  ;;  %2012 = vmatpush3.bf16.msra.mxu1 %v2079_v9  ;;  %v2083_v18 = vld [vmem:[%s2984_s1 + $0x18] sm:$0xff]   ;;  %v2067_v22 = vld [vmem:[%s2174_s19 + $0x2c] ss:$0 sps:$4 sm:$0x11]  }
  0x1d   : > { %v488_v45 = vrot.slane %v486_v38, 1  ;;  %v503_v54 = vshrl.u32 %v2224_v39, 16  ;;  %v507_v55 = vrot.slane %v505_v50, 1  ;;  %v510_v56 = vshll.u32 %v2062_v47, 16  ;;  %1959 = vmatprep.subr.bf16.mxu0 %v2080_v15  ;;  %2005 = vmatprep.subr.bf16.mxu1 %v2080_v15  ;;  %v2084_v24 = vld [vmem:[%s2984_s1 + $0x20] sm:$0xff]   ;;  %v2085_v31 = vld [vmem:[%s2984_s1 + $0x28] sm:$0xff]  }
  0x1e   : > { %v2236_v48 = vsel %vm381_vm1, %v496_v43, %v500_v41  ;;  %v484_v49 = vor.u32 %v483_v44, %v479_v34  ;;  %v407_v57 = vshrl.u32 %v2231_v46, 16  ;;  %v411_v58 = vrot.slane %v409_v53, 1  ;;  %v2086_v34 = vld [vmem:[%s2984_s1 + $0x30] sm:$0xff]   ;;  %v2089_v38 = vld [vmem:[%s2984_s1 + $0x38] sm:$0xff]  }
  0x1f   : > { %576 = vrot.lane.b32.xlu1 %v405_v40, %s2124_s22  ;;  %v414_v59 = vshll.u32 %v2063_v52, 16  ;;  %v508_v60 = vor.u32 %v507_v55, %v503_v54  ;;  %v512_v61 = vrot.slane %v510_v56, 1  ;;  %v637_v7 = vrot.slane %v2224_v39, 1  ;;  %1960 = vmatpush3.bf16.msra.mxu0 %v2080_v15  ;;  %v2364_v50 = vld [vmem:[%s2174_s19 + $0x30] sm:$0xff]  }
  0x20   : > { %574 = vrot.lane.b32.xlu0 %v393_v42, %s2124_s22  ;;  %v2241_v51 = vsel %vm381_vm1, %v484_v49, %v488_v45  ;;  %v412_v63 = vor.u32 %v411_v58, %v407_v57  ;;  %v638_v8 = vrot.slane %v2062_v47, 1  ;;  %v613_v10 = vrot.slane %v2231_v46, 1  ;;  %2013 = vmatpush3.bf16.msra.mxu1 %v2080_v15  ;;  %v2359_v49 = vld [vmem:[%s2174_s19 + $0x90] sm:$0xff]   ;;  %v2071_v54 = vld [vmem:[%s2174_s19 + $0x38] ss:$0 sps:$4 sm:$0x11]  }
  0x21   : > { %v416_v3 = vrot.slane %v414_v59, 1  ;;  %v2261_v5 = vsel %vm381_vm1, %v508_v60, %v512_v61  ;;  %v614_v11 = vrot.slane %v2063_v52, 1  ;;  %v517_v20 = vshll.u32 %v2277_v13, 16  ;;  %1961 = vmatprep.subr.bf16.mxu0 %v2083_v18  ;;  %2006 = vmatprep.subr.bf16.mxu1 %v2083_v18  ;;  %v2070_v52 = vld [vmem:[%s2174_s19 + $0x98] ss:$0 sps:$4 sm:$0x11]  }
  0x22   : > { %v2288_v16 = vsel %vm606_vm0, %v637_v7, %v638_v8  ;;  %v421_v21 = vshll.u32 %v2280_v14, 16  ;;  %v515_v25 = vshrl.u32 %v2277_v13, 16  ;;  %v522_v26 = vshll.u32 %v2293_v17, 16 }
  0x23   : > { %592 = vrot.lane.b32.xlu1 %v2236_v48, %s2124_s22  ;;  %v2265_v6 = vsel %vm381_vm1, %v412_v63, %v416_v3  ;;  %v2299_v19 = vsel %vm606_vm0, %v613_v10, %v614_v11  ;;  %v519_v28 = vrot.slane %v517_v20, 1  ;;  %v426_v30 = vshll.u32 %v2067_v22, 16  ;;  %1962 = vmatpush3.bf16.msra.mxu0 %v2083_v18 }
  0x24   : > { %590 = vrot.lane.b32.xlu0 %v2241_v51, %s2124_s22  ;;  %v423_v29 = vrot.slane %v421_v21, 1  ;;  %2014 = vmatpush3.bf16.msra.mxu1 %v2083_v18  ;;  %v524_v33 = vrot.slane %v522_v26, 1  ;;  %v640_v41 = vrot.slane %v2277_v13, 1  ;;  %v641_v42 = vrot.slane %v2293_v17, 1  ;;  %v2398_v18 = vld [vmem:[%s2174_s19 + $0x3c] sm:$0xff]  }
  0x25   : > { %1963 = vmatprep.subr.bf16.mxu0 %v2084_v24  ;;  %2007 = vmatprep.subr.bf16.mxu1 %v2084_v24  ;;  %v520_v32 = vor.u32 %v519_v28, %v515_v25  ;;  %v428_v36 = vrot.slane %v426_v30, 1  ;;  %v616_v43 = vrot.slane %v2280_v14, 1  ;;  %v617_v44 = vrot.slane %v2067_v22, 1  ;;  %v2075_v21 = vld [vmem:[%s2174_s19 + $0x44] ss:$0 sps:$4 sm:$0x11]  }
  0x26   : > { %v642_v45 = vsel %vm606_vm0, %v640_v41, %v641_v42  ;;  %v529_v53 = vshll.u32 %v2359_v49, 16  ;;  %v433_v55 = vshll.u32 %v2364_v50, 16  ;;  %v527_v56 = vshrl.u32 %v2359_v49, 16 }
  0x27   : > { %710 = vrot.lane.b32.xlu1 %v2224_v39, %s2122_s20  ;;  %1964 = vmatpush3.bf16.msra.mxu0 %v2084_v24  ;;  %v525_v37 = vsel %vm381_vm1, %v520_v32, %v524_v33  ;;  %v618_v47 = vsel %vm606_vm0, %v616_v43, %v617_v44  ;;  %v534_v58 = vshll.u32 %v2070_v52, 16  ;;  %v431_v59 = vshrl.u32 %v2364_v50, 16 }
  0x28   : > { %694 = vrot.lane.b32.xlu0 %v2231_v46, %s2122_s20  ;;  %2015 = vmatpush3.bf16.msra.mxu1 %v2084_v24  ;;  %v531_v57 = vrot.slane %v529_v53, 1  ;;  %v435_v60 = vrot.slane %v433_v55, 1  ;;  %v438_v61 = vshll.u32 %v2071_v54, 16  ;;  %v643_v8 = vrot.slane %v2359_v49, 1 }
  0x29   : > { %1965 = vmatprep.subr.bf16.mxu0 %v2085_v31  ;;  %2008 = vmatprep.subr.bf16.mxu1 %v2085_v31  ;;  %v536_v63 = vrot.slane %v534_v58, 1  ;;  %v644_v9 = vrot.slane %v2070_v52, 1  ;;  %v619_v10 = vrot.slane %v2364_v50, 1  ;;  %v620_v11 = vrot.slane %v2071_v54, 1 }
  0x2a   : > { %v532_v62 = vor.u32 %v531_v57, %v527_v56  ;;  %v436_v3 = vor.u32 %v435_v60, %v431_v59  ;;  %v445_v22 = vshll.u32 %v2398_v18, 16  ;;  %v622_v44 = vrot.slane %v2398_v18, 1  ;;  %v2459_v60 = vld [vmem:[%s2174_s19 + $0xa8] sm:$0xff]  }
  0x2b   : > { %755 = vrot.lane.b32.xlu1 %v2236_v48, %s2125_s25  ;;  %1966 = vmatpush3.bf16.msra.mxu0 %v2085_v31  ;;  %v645_v15 = vsel %vm606_vm0, %v643_v8, %v644_v9  ;;  %v621_v17 = vsel %vm606_vm0, %v619_v10, %v620_v11  ;;  %v551_v10 = vshrl.u32 %v2459_v60, 16 }
  0x2c   : > { %739 = vrot.lane.b32.xlu0 %v405_v40, %s2125_s25  ;;  %2016 = vmatpush3.bf16.msra.mxu1 %v2085_v31  ;;  %v447_v28 = vrot.slane %v445_v22, 1 }
  0x2d   : > { %1967 = vmatprep.subr.bf16.mxu0 %v2086_v34  ;;  %2009 = vmatprep.subr.bf16.mxu1 %v2086_v34 }
  0x2f   : > { %757 = vrot.lane.b32.xlu1 %v2261_v5, %s2125_s25  ;;  %1968 = vmatpush3.bf16.msra.mxu0 %v2086_v34 }
  0x30   : > { %741 = vrot.lane.b32.xlu0 %v2265_v6, %s2125_s25  ;;  %2017 = vmatpush3.bf16.msra.mxu1 %v2086_v34 }
  0x31   : > { %1969 = vmatprep.subr.bf16.mxu0 %v2089_v38  ;;  %2010 = vmatprep.subr.bf16.mxu1 %v2089_v38 }
  0x33   : > { %790 = vrot.lane.b32.xlu1 %v2212_v23, %s2126_s28  ;;  %1970 = vmatpush3.bf16.msra.mxu0 %v2089_v38 }
  0x34   : > { %774 = vrot.lane.b32.xlu0 %v2216_v27, %s2126_s28  ;;  %v419_v27 = vshrl.u32 %v2280_v14, 16  ;;  %2018 = vmatpush3.bf16.msra.mxu1 %v2089_v38 }
  0x36   : > { %v424_v35 = vor.u32 %v423_v29, %v419_v27  ;;  %v443_v27 = vshrl.u32 %v2398_v18, 16  ;;  %v450_v29 = vshll.u32 %v2075_v21, 16 }
  0x37   : > { %792 = vrot.lane.b32.xlu1 %v2288_v16, %s2126_s28 }
  0x38   : > { %776 = vrot.lane.b32.xlu0 %v2299_v19, %s2126_s28  ;;  %v429_v40 = vsel %vm381_vm1, %v424_v35, %v428_v36  ;;  %v448_v32 = vor.u32 %v447_v28, %v443_v27  ;;  %v452_v33 = vrot.slane %v450_v29, 1 }
  0x3b   : > { %827 = vrot.lane.b32.xlu1 %v2224_v39, %s2127_s8 }
  0x3c   : > { %811 = vrot.lane.b32.xlu0 %v2231_v46, %s2127_s8 }
  0x3f   : > { %829 = vrot.lane.b32.xlu1 %v2277_v13, %s2127_s8 }
  0x40   : > { %813 = vrot.lane.b32.xlu0 %v2280_v14, %s2127_s8 }
  0x43   : > { %874 = vrot.lane.b32.xlu1 %v2261_v5, %s2128_s17 }
  0x44   : > { %858 = vrot.lane.b32.xlu0 %v2265_v6, %s2128_s17 }
  0x47   : > { %876 = vrot.lane.b32.xlu1 %v525_v37, %s2128_s17 }
  0x48   : > { %860 = vrot.lane.b32.xlu0 %v429_v40, %s2128_s17 }
  0x4b   : > { %909 = vrot.lane.b32.xlu1 %v2288_v16, %s2129_s24 }
  0x4c   : > { %893 = vrot.lane.b32.xlu0 %v2299_v19, %s2129_s24 }
  0x4f   : > { %594 = vrot.lane.b32.xlu1 %v2261_v5, %s2124_s22  ;;  %v440_v5 = vrot.slane %v438_v61, 1 }
  0x50   : > { %578 = vrot.lane.b32.xlu0 %v2265_v6, %s2124_s22  ;;  %v537_v6 = vsel %vm381_vm1, %v532_v62, %v536_v63  ;;  %v2465_v62 = vld [vmem:[%s2174_s19 + $0x48] sm:$0xff]  }
  0x51   : > { %v441_v7 = vsel %vm381_vm1, %v436_v3, %v440_v5  ;;  %v2081_v3 = vld [vmem:[%s2174_s19 + $0xb0] ss:$0 sps:$4 sm:$0x11]   ;;  %v553_v5 = vshll.u32 %v2459_v60, 16  ;;  %v457_v8 = vshll.u32 %v2465_v62, 16 }
  0x53   : > { %911 = vrot.lane.b32.xlu1 %v642_v45, %s2129_s24  ;;  %v555_v11 = vrot.slane %v553_v5, 1 }
  0x54   : > { %895 = vrot.lane.b32.xlu0 %v618_v47, %s2129_s24 }
  0x57   : > { %596 = vrot.lane.b32.xlu1 %v525_v37, %s2124_s22 }
  0x58   : > { %580 = vrot.lane.b32.xlu0 %v429_v40, %s2124_s22 }
  0x5b   : > { %675 = vrot.lane.b32.xlu1 %v2288_v16, %s2123_s21  ;;  %v2393_v16 = vld [vmem:[%s2174_s19 + $0x9c] sm:$0xff]  }
  0x5c   : > { %659 = vrot.lane.b32.xlu0 %v2299_v19, %s2123_s21  ;;  %v2074_v19 = vld [vmem:[%s2174_s19 + $0xa4] ss:$0 sps:$4 sm:$0x11]   ;;  %v541_v20 = vshll.u32 %v2393_v16, 16  ;;  %v539_v24 = vshrl.u32 %v2393_v16, 16  ;;  %v646_v41 = vrot.slane %v2393_v16, 1 }
  0x5d   : > { %v546_v26 = vshll.u32 %v2074_v19, 16  ;;  %v647_v42 = vrot.slane %v2074_v19, 1  ;;  %v455_v19 = vshrl.u32 %v2465_v62, 16 }
  0x5e   : > { %v543_v25 = vrot.slane %v541_v20, 1  ;;  %v459_v20 = vrot.slane %v457_v8, 1  ;;  %v2521_v8 = vld [vmem:[%s2174_s19 + $0xb4] sm:$0xff]  }
  0x5f   : > { %677 = vrot.lane.b32.xlu1 %v642_v45, %s2123_s21  ;;  %v548_v31 = vrot.slane %v546_v26, 1  ;;  %v648_v52 = vsel %vm606_vm0, %v646_v41, %v647_v42  ;;  %v649_v41 = vrot.slane %v2459_v60, 1  ;;  %v650_v42 = vrot.slane %v2081_v3, 1 }
  0x60   : > { %661 = vrot.lane.b32.xlu0 %v618_v47, %s2123_s21  ;;  %v544_v30 = vor.u32 %v543_v25, %v539_v24  ;;  %v556_v24 = vor.u32 %v555_v11, %v551_v10  ;;  %v460_v27 = vor.u32 %v459_v20, %v455_v19 }
  0x62   : > { %v549_v35 = vsel %vm381_vm1, %v544_v30, %v548_v31 }
  0x63   : > { %712 = vrot.lane.b32.xlu1 %v2277_v13, %s2122_s20 }
  0x64   : > { %696 = vrot.lane.b32.xlu0 %v2280_v14, %s2122_s20 }
  0x67   : > { %714 = vrot.lane.b32.xlu1 %v2359_v49, %s2122_s20 }
  0x68   : > { %698 = vrot.lane.b32.xlu0 %v2364_v50, %s2122_s20 }
  0x6b   : > { %759 = vrot.lane.b32.xlu1 %v525_v37, %s2125_s25  ;;  %v453_v37 = vsel %vm381_vm1, %v448_v32, %v452_v33 }
  0x6c   : > { %743 = vrot.lane.b32.xlu0 %v429_v40, %s2125_s25 }
  0x6f   : > { %761 = vrot.lane.b32.xlu1 %v537_v6, %s2125_s25 }
  0x70   : > { %745 = vrot.lane.b32.xlu0 %v441_v7, %s2125_s25 }
  0x73   : > { %794 = vrot.lane.b32.xlu1 %v642_v45, %s2126_s28  ;;  %v623_v45 = vrot.slane %v2075_v21, 1 }
  0x74   : > { %778 = vrot.lane.b32.xlu0 %v618_v47, %s2126_s28 }
  0x75   : > { %v2444_v54 = vsel %vm606_vm0, %v622_v44, %v623_v45 }
  0x77   : > { %796 = vrot.lane.b32.xlu1 %v645_v15, %s2126_s28 }
  0x78   : > { %780 = vrot.lane.b32.xlu0 %v621_v17, %s2126_s28 }
  0x7b   : > { %831 = vrot.lane.b32.xlu1 %v2359_v49, %s2127_s8 }
  0x7c   : > { %815 = vrot.lane.b32.xlu0 %v2364_v50, %s2127_s8 }
  0x7f   : > { %833 = vrot.lane.b32.xlu1 %v2393_v16, %s2127_s8 }
  0x80   : > { %817 = vrot.lane.b32.xlu0 %v2398_v18, %s2127_s8 }
  0x83   : > { %878 = vrot.lane.b32.xlu1 %v537_v6, %s2128_s17 }
  0x84   : > { %862 = vrot.lane.b32.xlu0 %v441_v7, %s2128_s17 }
  0x85   : > { %v2417_v34 = vpop.permute.xlu1 %708 }
  0x86   : > { %v2421_v36 = vpop.permute.xlu0 %692 }
  0x87   : > { %880 = vrot.lane.b32.xlu1 %v549_v35, %s2128_s17 }
  0x88   : > { %864 = vrot.lane.b32.xlu0 %v453_v37, %s2128_s17 }
  0x89   : > { %v2426_v38 = vpop.permute.xlu1 %671 }
  0x8a   : > { %v2428_v40 = vpop.permute.xlu0 %655 }
  0x8b   : > { %913 = vrot.lane.b32.xlu1 %v645_v15, %s2129_s24 }
  0x8c   : > { %897 = vrot.lane.b32.xlu0 %v621_v17, %s2129_s24 }
  0x8d   : > { %v2433_v43 = vpop.permute.xlu1 %673 }
  0x8e   : > { %v2436_v47 = vpop.permute.xlu0 %657 }
  0x8f   : > { %598 = vrot.lane.b32.xlu1 %v537_v6, %s2124_s22 }
  0x90   : > { %582 = vrot.lane.b32.xlu0 %v441_v7, %s2124_s22  ;;  %v2082_v7 = vld [vmem:[%s2174_s19 + $0x50] ss:$0 sps:$4 sm:$0x11]  }
  0x91   : > { %v2441_v53 = vpop.permute.xlu1 %576  ;;  %v462_v21 = vshll.u32 %v2082_v7, 16  ;;  %v626_v44 = vrot.slane %v2082_v7, 1 }
  0x92   : > { %v575_v55 = vpop.permute.xlu0 %574 }
  0x93   : > { %915 = vrot.lane.b32.xlu1 %v648_v52, %s2129_s24  ;;  %v464_v28 = vrot.slane %v462_v21, 1  ;;  %v927_v10 = vsel %vm925_vm2, %v2191_v4, %v575_v55 }
  0x94   : > { %899 = vrot.lane.b32.xlu0 %v2444_v54, %s2129_s24  ;;  %v960_v4 = vsel %vm958_vm3, %v927_v10, %v2428_v40  ;;  %v2550_v40 = vld [vmem:[%s2174_s19 + $0x5c] ss:$0 sps:$4 sm:$0x11]  }
  0x95   : > { %v2449_v56 = vpop.permute.xlu1 %592  ;;  %v2502_v32 = vsel %vm381_vm1, %v460_v27, %v464_v28  ;;  %v563_v27 = vshrl.u32 %v2521_v8, 16 }
  0x96   : > { %v591_v57 = vpop.permute.xlu0 %590 }
  0x97   : > { %600 = vrot.lane.b32.xlu1 %v549_v35, %s2124_s22  ;;  %v943_v45 = vsel %vm925_vm2, %v2187_v2, %v591_v57 }
  0x98   : > { %584 = vrot.lane.b32.xlu0 %v453_v37, %s2124_s22  ;;  %v976_v57 = vsel %vm958_vm3, %v943_v45, %v2426_v38  ;;  %v565_v38 = vshll.u32 %v2521_v8, 16 }
  0x99   : > { %v2453_v58 = vpop.permute.xlu1 %710  ;;  %v1009_v55 = vsel %vm991_vm5, %v976_v57, %v2417_v34  ;;  %v474_v57 = vshll.u32 %v2550_v40, 16 }
  0x9a   : > { %v2455_v59 = vpop.permute.xlu0 %694 }
  0x9b   : > { %679 = vrot.lane.b32.xlu1 %v645_v15, %s2123_s21  ;;  %v558_v15 = vshll.u32 %v2081_v3, 16  ;;  %v2518_v3 = vsel %vm606_vm0, %v649_v41, %v650_v42  ;;  %v567_v41 = vrot.slane %v565_v38, 1 }
  0x9c   : > { %663 = vrot.lane.b32.xlu0 %v621_v17, %s2123_s21 }
  0x9d   : > { %v2462_v61 = vpop.permute.xlu1 %755  ;;  %v560_v25 = vrot.slane %v558_v15, 1 }
  0x9e   : > { %v2467_v63 = vpop.permute.xlu0 %739  ;;  %v1042_v20 = vsel %vm1024_vm4, %v1009_v55, %v2462_v61 }
  0x9f   : > { %681 = vrot.lane.b32.xlu1 %v648_v52, %s2123_s21  ;;  %v2498_v30 = vsel %vm381_vm1, %v556_v24, %v560_v25  ;;  %v993_v24 = vsel %vm991_vm5, %v960_v4, %v2421_v36  ;;  %v945_v36 = vsel %vm925_vm2, %v2177_v0, %v2449_v56  ;;  %v929_v0 = vsel %vm925_vm2, %v2180_v1, %v2441_v53 }
  0xa0   : > { %665 = vrot.lane.b32.xlu0 %v2444_v54, %s2123_s21  ;;  %v1026_v61 = vsel %vm1024_vm4, %v993_v24, %v2467_v63  ;;  %v568_v4 = vor.u32 %v567_v41, %v563_v27  ;;  %v962_v53 = vsel %vm958_vm3, %v929_v0, %v2436_v47 }
  0xa1   : > { %v2474_v6 = vpop.permute.xlu1 %757 }
  0xa2   : > { %v2478_v9 = vpop.permute.xlu0 %741 }
  0xa3   : > { %716 = vrot.lane.b32.xlu1 %v2393_v16, %s2122_s20 }
  0xa4   : > { %700 = vrot.lane.b32.xlu0 %v2398_v18, %s2122_s20 }
  0xa5   : > { %v791_v17 = vpop.permute.xlu1 %790 }
  0xa6   : > { %v2486_v22 = vpop.permute.xlu0 %774  ;;  %v1075_v25 = vsel %vm1057_vm6, %v1042_v20, %v791_v17  ;;  %v476_v20 = vrot.slane %v474_v57, 1  ;;  %v2092_v57 = vld [vmem:[%s2174_s19 + $0xc0] sm:$0xff]  }
  0xa7   : > { %718 = vrot.lane.b32.xlu1 %v2459_v60, %s2122_s20  ;;  %v1059_v17 = vsel %vm1057_vm6, %v1026_v61, %v2486_v22 }
  0xa8   : > { %702 = vrot.lane.b32.xlu0 %v2465_v62, %s2122_s20 }
  0xa9   : > { %v2492_v26 = vpop.permute.xlu1 %792 }
  0xaa   : > { %v2494_v29 = vpop.permute.xlu0 %776 }
  0xab   : > { %763 = vrot.lane.b32.xlu1 %v549_v35, %s2125_s25 }
  0xac   : > { %747 = vrot.lane.b32.xlu0 %v453_v37, %s2125_s25  ;;  %v625_v37 = vrot.slane %v2465_v62, 1 }
  0xad   : > { %v828_v31 = vpop.permute.xlu1 %827 }
  0xae   : > { %v812_v33 = vpop.permute.xlu0 %811  ;;  %v2530_v11 = vsel %vm606_vm0, %v625_v37, %v626_v44  ;;  %v1108_v28 = vsel %vm1090_vm7, %v1075_v25, %v828_v31 }
  0xaf   : > { %765 = vrot.lane.b32.xlu1 %v2498_v30, %s2125_s25  ;;  %v1092_v31 = vsel %vm1090_vm7, %v1059_v17, %v812_v33  ;;  %v978_v33 = vsel %vm958_vm3, %v945_v36, %v2433_v43 }
  0xb0   : > { %749 = vrot.lane.b32.xlu0 %v2502_v32, %s2125_s25  ;;  %v1011_v55 = vsel %vm991_vm5, %v978_v33, %v2453_v58  ;;  %v730_v33 = vshll.u32 %v2092_v57, 16 }
  0xb1   : > { %v2509_v35 = vpop.permute.xlu1 %829  ;;  %v1044_v43 = vsel %vm1024_vm4, %v1011_v55, %v2474_v6 }
  0xb2   : > { %v2514_v5 = vpop.permute.xlu0 %813  ;;  %v1077_v58 = vsel %vm1057_vm6, %v1044_v43, %v2492_v26 }
  0xb3   : > { %798 = vrot.lane.b32.xlu1 %v648_v52, %s2126_s28  ;;  %v2533_v52 = vld [vmem:[%s2174_s19 + $0x54] sm:$0xff]   ;;  %v1110_v47 = vsel %vm1090_vm7, %v1077_v58, %v2509_v35 }
  0xb4   : > { %782 = vrot.lane.b32.xlu0 %v2444_v54, %s2126_s28  ;;  %v2540_v54 = vld [vmem:[%s2174_s19 + $0xbc] ss:$0 sps:$4 sm:$0x11]   ;;  %v469_v21 = vshll.u32 %v2533_v52, 16  ;;  %v467_v63 = vshrl.u32 %v2533_v52, 16  ;;  %v628_v17 = vrot.slane %v2533_v52, 1 }
  0xb5   : > { %v875_v7 = vpop.permute.xlu1 %874  ;;  %v570_v42 = vshll.u32 %v2540_v54, 16 }
  0xb6   : > { %v859_v15 = vpop.permute.xlu0 %858  ;;  %v1141_v37 = vsel %vm1123_vm8, %v1108_v28, %v875_v7  ;;  %v471_v10 = vrot.slane %v469_v21, 1  ;;  %v995_v21 = vsel %vm991_vm5, %v962_v53, %v2455_v59 }
  0xb7   : > { %800 = vrot.lane.b32.xlu1 %v2518_v3, %s2126_s28  ;;  %v1125_v56 = vsel %vm1123_vm8, %v1092_v31, %v859_v15  ;;  %v572_v38 = vrot.slane %v570_v42, 1  ;;  %v1028_v25 = vsel %vm1024_vm4, %v995_v21, %v2478_v9  ;;  %v653_v42 = vrot.slane %v2540_v54, 1 }
  0xb8   : > { %784 = vrot.lane.b32.xlu0 %v2530_v11, %s2126_s28  ;;  %v472_v15 = vor.u32 %v471_v10, %v467_v63  ;;  %v1061_v27 = vsel %vm1057_vm6, %v1028_v25, %v2494_v29 }
  0xb9   : > { %v877_v19 = vpop.permute.xlu1 %876  ;;  %v573_v6 = vsel %vm381_vm1, %v568_v4, %v572_v38  ;;  %v1094_v61 = vsel %vm1090_vm7, %v1061_v27, %v2514_v5  ;;  %v732_v38 = vrot.slane %v730_v33, 1  ;;  %v771_v27 = vrot.slane %v2092_v57, 1 }
  0xba   : > { %v861_v34 = vpop.permute.xlu0 %860  ;;  %v1143_v59 = vsel %vm1123_vm8, %v1110_v47, %v877_v19  ;;  %v477_v9 = vsel %vm381_vm1, %v472_v15, %v476_v20 }
  0xbb   : > { %835 = vrot.lane.b32.xlu1 %v2459_v60, %s2127_s8  ;;  %v1127_v35 = vsel %vm1123_vm8, %v1094_v61, %v861_v34  ;;  %v652_v34 = vrot.slane %v2521_v8, 1  ;;  %v2695_v61 = vld [vmem:[%s2174_s19 + $0xcc] sm:$0xff]  }
  0xbc   : > { %819 = vrot.lane.b32.xlu0 %v2465_v62, %s2127_s8 }
  0xbd   : > { %v910_v44 = vpop.permute.xlu1 %909  ;;  %v654_v63 = vsel %vm606_vm0, %v652_v34, %v653_v42  ;;  %v849_v34 = vshll.u32 %v2695_v61, 16 }
  0xbe   : > { %v1174_v45 = vsel %vm1156_vm9, %v1141_v37, %v910_v44  ;;  %v894_v22 = vpop.permute.xlu0 %893  ;;  %v629_v37 = vrot.slane %v2550_v40, 1 }
  0xbf   : > { %837 = vrot.lane.b32.xlu1 %v2521_v8, %s2127_s8  ;;  %1987 = vmatprep.mubr.msk.bf16.mxu1 %vm1189_vm10, %v1174_v45  ;;  %v1158_v7 = vsel %vm1156_vm9, %v1125_v56, %v894_v22  ;;  %v2093_v22 = vld [vmem:[%s2174_s19 + $0xc8] ss:$0 sps:$4 sm:$0x11]  }
  0xc0   : > { %821 = vrot.lane.b32.xlu0 %v2533_v52, %s2127_s8  ;;  %1971 = vmatprep.mubr.msk.bf16.mxu0 %vm1189_vm10, %v1158_v7  ;;  %v630_v31 = vsel %vm606_vm0, %v628_v17, %v629_v37  ;;  %v735_v55 = vshll.u32 %v2093_v22, 16 }
  0xc1   : > { %v2590_v1 = vpop.permute.xlu1 %594 }
  0xc2   : > { %v2600_v24 = vpop.permute.xlu0 %578  ;;  %v737_v15 = vrot.slane %v735_v55, 1 }
  0xc3   : > { %882 = vrot.lane.b32.xlu1 %v2498_v30, %s2128_s17  ;;  %v931_v42 = vsel %vm925_vm2, %v2231_v46, %v2600_v24  ;;  %v847_v46 = vshrl.u32 %v2695_v61, 16 }
  0xc4   : > { %866 = vrot.lane.b32.xlu0 %v2502_v32, %s2128_s17 }
  0xc5   : > { %v912_v26 = vpop.permute.xlu1 %911 }
  0xc6   : > { %v1176_v28 = vsel %vm1156_vm9, %v1143_v59, %v912_v26  ;;  %v896_v41 = vpop.permute.xlu0 %895 }
  0xc7   : > { %884 = vrot.lane.b32.xlu1 %v573_v6, %s2128_s17  ;;  %1988 = vmatmul.mubr.msk.bf16.vlgmr.msra.gmra.mrb[0].mxu1 %vm1189_vm10, %v1176_v28  ;;  %v1160_v29 = vsel %vm1156_vm9, %v1127_v35, %v896_v41 }
  0xc8   : > { %868 = vrot.lane.b32.xlu0 %v477_v9, %s2128_s17  ;;  %1972 = vmatmul.mubr.msk.bf16.vlgmr.msra.gmra.mrb[0].mxu0 %vm1189_vm10, %v1160_v29  ;;  %v2705_v29 = vld [vmem:[%s2174_s19 + $0xd4] ss:$0 sps:$4 sm:$0x11]  }
  0xc9   : > { %v2624_v19 = vpop.permute.xlu1 %596  ;;  %v854_v33 = vshll.u32 %v2705_v29, 16 }
  0xca   : > { %v2626_v5 = vpop.permute.xlu0 %580 }
  0xcb   : > { %917 = vrot.lane.b32.xlu1 %v2518_v3, %s2129_s24 }
  0xcc   : > { %901 = vrot.lane.b32.xlu0 %v2530_v11, %s2129_s24 }
  0xcd   : > { %v676_v36 = vpop.permute.xlu1 %675 }
  0xce   : > { %v2636_v44 = vpop.permute.xlu0 %659 }
  0xcf   : > { %602 = vrot.lane.b32.xlu1 %v2498_v30, %s2124_s22 }
  0xd0   : > { %586 = vrot.lane.b32.xlu0 %v2502_v32, %s2124_s22 }
  0xd1   : > { %v2643_v54 = vpop.permute.xlu1 %677 }
  0xd2   : > { %v2646_v45 = vpop.permute.xlu0 %661 }
  0xd3   : > { %919 = vrot.lane.b32.xlu1 %v654_v63, %s2129_s24 }
  0xd4   : > { %903 = vrot.lane.b32.xlu0 %v630_v31, %s2129_s24 }
  0xd5   : > { %v713_v40 = vpop.permute.xlu1 %712 }
  0xd6   : > { %v697_v10 = vpop.permute.xlu0 %696 }
  0xd7   : > { %604 = vrot.lane.b32.xlu1 %v573_v6, %s2124_s22 }
  0xd8   : > { %588 = vrot.lane.b32.xlu0 %v477_v9, %s2124_s22 }
  0xd9   : > { %v2652_v30 = vpop.permute.xlu1 %714 }
  0xda   : > { %v2654_v32 = vpop.permute.xlu0 %698 }
  0xdb   : > { %683 = vrot.lane.b32.xlu1 %v2518_v3, %s2123_s21  ;;  %v728_v3 = vshrl.u32 %v2092_v57, 16 }
  0xdc   : > { %667 = vrot.lane.b32.xlu0 %v2530_v11, %s2123_s21 }
  0xdd   : > { %v760_v0 = vpop.permute.xlu1 %759  ;;  %v733_v43 = vor.u32 %v732_v38, %v728_v3  ;;  %v2096_v3 = vld [vmem:[%s2174_s19 + $0x60] sm:$0xff]  }
  0xde   : > { %v744_v56 = vpop.permute.xlu0 %743 }
  0xdf   : > { %685 = vrot.lane.b32.xlu1 %v654_v63, %s2123_s21  ;;  %v2681_v58 = vsel %vm381_vm1, %v733_v43, %v737_v15 }
  0xe0   : > { %669 = vrot.lane.b32.xlu0 %v630_v31, %s2123_s21  ;;  %s1898_s21 = sshll.u32 %s2992_s12, 7 }
  0xe1   : > { %v2664_v7 = vpop.permute.xlu1 %761 }
  0xe2   : > { %v2666_v4 = vpop.permute.xlu0 %745 }
  0xe3   : > { %720 = vrot.lane.b32.xlu1 %v2521_v8, %s2122_s20 }
  0xe4   : > { %704 = vrot.lane.b32.xlu0 %v2533_v52, %s2122_s20 }
  0xe5   : > { %v795_v11 = vpop.permute.xlu1 %794 }
  0xe6   : > { %v779_v53 = vpop.permute.xlu0 %778 }
  0xe7   : > { %722 = vrot.lane.b32.xlu1 %v2092_v57, %s2122_s20 }
  0xe8   : > { %706 = vrot.lane.b32.xlu0 %v2187_v2, %s2122_s20  ;;  %v772_v2 = vrot.slane %v2093_v22, 1  ;;  %v851_v22 = vrot.slane %v849_v34, 1  ;;  %v891_v34 = vrot.slane %v2705_v29, 1 }
  0xe9   : > { %v2675_v20 = vpop.permute.xlu1 %796 }
  0xea   : > { %v2677_v21 = vpop.permute.xlu0 %780  ;;  %v852_v15 = vor.u32 %v851_v22, %v847_v46 }
  0xeb   : > { %767 = vrot.lane.b32.xlu1 %v573_v6, %s2125_s25  ;;  %v2692_v6 = vsel %vm606_vm0, %v771_v27, %v772_v2 }
  0xec   : > { %751 = vrot.lane.b32.xlu0 %v477_v9, %s2125_s25  ;;  %v947_v9 = vsel %vm925_vm2, %v2224_v39, %v2590_v1  ;;  %v964_v1 = vsel %vm958_vm3, %v931_v42, %v2636_v44 }
  0xed   : > { %v832_v25 = vpop.permute.xlu1 %831  ;;  %v980_v41 = vsel %vm958_vm3, %v947_v9, %v676_v36  ;;  %v997_v37 = vsel %vm991_vm5, %v964_v1, %v697_v10 }
  0xee   : > { %v816_v47 = vpop.permute.xlu0 %815  ;;  %v1013_v17 = vsel %vm991_vm5, %v980_v41, %v713_v40  ;;  %v1030_v24 = vsel %vm1024_vm4, %v997_v37, %v744_v56  ;;  %v949_v56 = vsel %vm925_vm2, %v2277_v13, %v2624_v19  ;;  %v2097_v19 = vld [vmem:[%s2174_s19 + $0x6c] sm:$0xff]  }
  0xef   : > { %769 = vrot.lane.b32.xlu1 %v2681_v58, %s2125_s25  ;;  %v1046_v36 = vsel %vm1024_vm4, %v1013_v17, %v760_v0  ;;  %v1063_v44 = vsel %vm1057_vm6, %v1030_v24, %v779_v53  ;;  %v982_v53 = vsel %vm958_vm3, %v949_v56, %v2643_v54 }
  0xf0   : > { %753 = vrot.lane.b32.xlu0 %v2241_v51, %s2125_s25  ;;  %v1015_v13 = vsel %vm991_vm5, %v982_v53, %v2652_v30  ;;  %s2882_s25 = scalar_lea.vmem %s2986_s3, %s1898_s21 }
  0xf1   : > { %v834_v59 = vpop.permute.xlu1 %833  ;;  %v1048_v2 = vsel %vm1024_vm4, %v1015_v13, %v2664_v7 }
  0xf2   : > { %v2688_v26 = vpop.permute.xlu0 %817 }
  0xf3   : > { %802 = vrot.lane.b32.xlu1 %v654_v63, %s2126_s28  ;;  %v1079_v63 = vsel %vm1057_vm6, %v1046_v36, %v795_v11 }
  0xf4   : > { %786 = vrot.lane.b32.xlu0 %v630_v31, %s2126_s28  ;;  %v1112_v40 = vsel %vm1090_vm7, %v1079_v63, %v832_v25  ;;  %v856_v25 = vrot.slane %v854_v33, 1 }
  0xf5   : > { %v879_v28 = vpop.permute.xlu1 %878 }
  0xf6   : > { %v863_v35 = vpop.permute.xlu0 %862  ;;  %v1145_v0 = vsel %vm1123_vm8, %v1112_v40, %v879_v28 }
  0xf7   : > { %804 = vrot.lane.b32.xlu1 %v2692_v6, %s2126_s28 }
  0xf8   : > { %788 = vrot.lane.b32.xlu0 %v2200_v12, %s2126_s28 }
  0xf9   : > { %v881_v39 = vpop.permute.xlu1 %880 }
  0xfa   : > { %v865_v31 = vpop.permute.xlu0 %864 }
  0xfb   : > { %839 = vrot.lane.b32.xlu1 %v2092_v57, %s2127_s8  ;;  %v1096_v57 = vsel %vm1090_vm7, %v1063_v44, %v816_v47  ;;  %v933_v47 = vsel %vm925_vm2, %v2280_v14, %v2626_v5  ;;  %v1081_v14 = vsel %vm1057_vm6, %v1048_v2, %v2675_v20 }
  0xfc   : > { %823 = vrot.lane.b32.xlu0 %v2096_v3, %s2127_s8  ;;  %v1129_v55 = vsel %vm1123_vm8, %v1096_v57, %v863_v35  ;;  %v966_v54 = vsel %vm958_vm3, %v933_v47, %v2646_v45  ;;  %v1114_v9 = vsel %vm1090_vm7, %v1081_v14, %v834_v59  ;;  %v857_v45 = vsel %vm381_vm1, %v852_v15, %v856_v25 }
  0xfd   : > { %v914_v10 = vpop.permute.xlu1 %913  ;;  %v999_v28 = vsel %vm991_vm5, %v966_v54, %v2654_v32  ;;  %v1147_v35 = vsel %vm1123_vm8, %v1114_v9, %v881_v39  ;;  %v890_v59 = vrot.slane %v2695_v61, 1 }
  0xfe   : > { %v1178_v38 = vsel %vm1156_vm9, %v1145_v0, %v914_v10  ;;  %v898_v11 = vpop.permute.xlu0 %897  ;;  %v1032_v30 = vsel %vm1024_vm4, %v999_v28, %v2666_v4 }
  0xff   : > { %841 = vrot.lane.b32.xlu1 %v2695_v61, %s2127_s8  ;;  %1991 = vmatprep.mubr.msk.bf16.mxu1 %vm1189_vm10, %v1178_v38  ;;  %v1162_v43 = vsel %vm1156_vm9, %v1129_v55, %v898_v11  ;;  %v1065_v7 = vsel %vm1057_vm6, %v1032_v30, %v2677_v21  ;;  %v892_v42 = vsel %vm606_vm0, %v890_v59, %v891_v34 }
 0x100   : > { %825 = vrot.lane.b32.xlu0 %v2097_v19, %s2127_s8  ;;  %1975 = vmatprep.mubr.msk.bf16.mxu0 %vm1189_vm10, %v1162_v43  ;;  %v1098_v20 = vsel %vm1090_vm7, %v1065_v7, %v2688_v26 }
 0x101   : > { %v599_v27 = vpop.permute.xlu1 %598  ;;  %v1131_v4 = vsel %vm1123_vm8, %v1098_v20, %v865_v31 }
 0x102   : > { %v583_v5 = vpop.permute.xlu0 %582 }
 0x103   : > { %886 = vrot.lane.b32.xlu1 %v2681_v58, %s2128_s17  ;;  %v935_v56 = vsel %vm925_vm2, %v2364_v50, %v583_v5 }
 0x104   : > { %870 = vrot.lane.b32.xlu0 %v2241_v51, %s2128_s17 }
 0x105   : > { %v916_v32 = vpop.permute.xlu1 %915 }
 0x106   : > { %v1180_v58 = vsel %vm1156_vm9, %v1147_v35, %v916_v32  ;;  %v900_v41 = vpop.permute.xlu0 %899 }
 0x107   : > { %888 = vrot.lane.b32.xlu1 %v857_v45, %s2128_s17  ;;  %1992 = vmatmul.mubr.msk.bf16.gmra.mrb[4].mxu1 %vm1189_vm10, %v1180_v58  ;;  %v1164_v21 = vsel %vm1156_vm9, %v1131_v4, %v900_v41 }
 0x108   : > { %872 = vrot.lane.b32.xlu0 %v2236_v48, %s2128_s17  ;;  %1976 = vmatmul.mubr.msk.bf16.gmra.mrb[4].mxu0 %vm1189_vm10, %v1164_v21 }
 0x109   : > { %v601_v51 = vpop.permute.xlu1 %600 }
 0x10a   : > { %v585_v26 = vpop.permute.xlu0 %584  ;;  %v953_v28 = vsel %vm925_vm2, %v2393_v16, %v601_v51 }
 0x10b   : > { %921 = vrot.lane.b32.xlu1 %v2692_v6, %s2129_s24  ;;  %v937_v45 = vsel %vm925_vm2, %v2398_v18, %v585_v26 }
 0x10c   : > { %905 = vrot.lane.b32.xlu0 %v2200_v12, %s2129_s24 }
 0x10d   : > { %v680_v17 = vpop.permute.xlu1 %679 }
 0x10e   : > { %v664_v39 = vpop.permute.xlu0 %663 }
 0x10f   : > { %923 = vrot.lane.b32.xlu1 %v892_v42, %s2129_s24  ;;  %v968_v53 = vsel %vm958_vm3, %v935_v56, %v664_v39 }
 0x110   : > { %907 = vrot.lane.b32.xlu0 %v2212_v23, %s2129_s24  ;;  %v951_v23 = vsel %vm925_vm2, %v2359_v49, %v599_v27 }
 0x111   : > { %v682_v48 = vpop.permute.xlu1 %681  ;;  %v984_v38 = vsel %vm958_vm3, %v951_v23, %v680_v17 }
 0x112   : > { %v666_v61 = vpop.permute.xlu0 %665  ;;  %v986_v30 = vsel %vm958_vm3, %v953_v28, %v682_v48 }
 0x113   : > { %v970_v32 = vsel %vm958_vm3, %v937_v45, %v666_v61 }
 0x115   : > { %v717_v29 = vpop.permute.xlu1 %716 }
 0x116   : > { %v701_v1 = vpop.permute.xlu0 %700  ;;  %v1017_v55 = vsel %vm991_vm5, %v984_v38, %v717_v29 }
 0x117   : > { %v1001_v15 = vsel %vm991_vm5, %v968_v53, %v701_v1 }
 0x119   : > { %v719_v36 = vpop.permute.xlu1 %718 }
 0x11a   : > { %v703_v37 = vpop.permute.xlu0 %702  ;;  %v1019_v7 = vsel %vm991_vm5, %v986_v30, %v719_v36 }
 0x11b   : > { %v1003_v20 = vsel %vm991_vm5, %v970_v32, %v703_v37 }
 0x11d   : > { %v764_v63 = vpop.permute.xlu1 %763 }
 0x11e   : > { %v748_v6 = vpop.permute.xlu0 %747  ;;  %v1050_v43 = vsel %vm1024_vm4, %v1017_v55, %v764_v63 }
 0x11f   : > { %v1034_v49 = vsel %vm1024_vm4, %v1001_v15, %v748_v6 }
 0x121   : > { %v766_v31 = vpop.permute.xlu1 %765 }
 0x122   : > { %v750_v46 = vpop.permute.xlu0 %749  ;;  %v1052_v16 = vsel %vm1024_vm4, %v1019_v7, %v766_v31 }
 0x123   : > { %v1036_v41 = vsel %vm1024_vm4, %v1003_v20, %v750_v46 }
 0x125   : > { %v799_v24 = vpop.permute.xlu1 %798 }
 0x126   : > { %v783_v40 = vpop.permute.xlu0 %782  ;;  %v1083_v25 = vsel %vm1057_vm6, %v1050_v43, %v799_v24 }
 0x127   : > { %v1067_v19 = vsel %vm1057_vm6, %v1034_v49, %v783_v40 }
 0x129   : > { %v801_v12 = vpop.permute.xlu1 %800 }
 0x12a   : > { %v785_v22 = vpop.permute.xlu0 %784  ;;  %v1085_v58 = vsel %vm1057_vm6, %v1052_v16, %v801_v12 }
 0x12b   : > { %v1069_v18 = vsel %vm1057_vm6, %v1036_v41, %v785_v22 }
 0x12d   : > { %v836_v33 = vpop.permute.xlu1 %835 }
 0x12e   : > { %v820_v44 = vpop.permute.xlu0 %819  ;;  %v1116_v13 = vsel %vm1090_vm7, %v1083_v25, %v836_v33 }
 0x12f   : > { %v1100_v54 = vsel %vm1090_vm7, %v1067_v19, %v820_v44 }
 0x131   : > { %v838_v0 = vpop.permute.xlu1 %837 }
 0x132   : > { %v822_v3 = vpop.permute.xlu0 %821  ;;  %v1118_v21 = vsel %vm1090_vm7, %v1085_v58, %v838_v0 }
 0x133   : > { %v1102_v51 = vsel %vm1090_vm7, %v1069_v18, %v822_v3 }
 0x135   : > { %v883_v10 = vpop.permute.xlu1 %882 }
 0x136   : > { %v867_v57 = vpop.permute.xlu0 %866  ;;  %v1149_v50 = vsel %vm1123_vm8, %v1116_v13, %v883_v10 }
 0x137   : > { %v1133_v14 = vsel %vm1123_vm8, %v1100_v54, %v867_v57 }
 0x139   : > { %v885_v11 = vpop.permute.xlu1 %884 }
 0x13a   : > { %v869_v47 = vpop.permute.xlu0 %868  ;;  %v1151_v59 = vsel %vm1123_vm8, %v1118_v21, %v885_v11 }
 0x13b   : > { %v1135_v42 = vsel %vm1123_vm8, %v1102_v51, %v869_v47 }
 0x13d   : > { %v918_v27 = vpop.permute.xlu1 %917 }
 0x13e   : > { %v1182_v2 = vsel %vm1156_vm9, %v1149_v50, %v918_v27  ;;  %v902_v5 = vpop.permute.xlu0 %901 }
 0x13f   : > { %1995 = vmatprep.mubr.msk.bf16.mxu1 %vm1189_vm10, %v1182_v2  ;;  %v1166_v9 = vsel %vm1156_vm9, %v1133_v14, %v902_v5 }
 0x140   : > { %1979 = vmatprep.mubr.msk.bf16.mxu0 %vm1189_vm10, %v1166_v9 }
 0x141   : > { %v603_v35 = vpop.permute.xlu1 %602 }
 0x142   : > { %v587_v4 = vpop.permute.xlu0 %586  ;;  %v955_v55 = vsel %vm925_vm2, %v2459_v60, %v603_v35 }
 0x143   : > { %v939_v43 = vsel %vm925_vm2, %v2465_v62, %v587_v4 }
 0x145   : > { %v920_v34 = vpop.permute.xlu1 %919 }
 0x146   : > { %v1184_v26 = vsel %vm1156_vm9, %v1151_v59, %v920_v34  ;;  %v904_v17 = vpop.permute.xlu0 %903 }
 0x147   : > { %1996 = vmatmul.mubr.msk.bf16.gmra.mrb[8].mxu1 %vm1189_vm10, %v1184_v26  ;;  %v1168_v39 = vsel %vm1156_vm9, %v1135_v42, %v904_v17  ;;  %v2870_v17 = vld [vmem:[%s2985_s2] ss:$0 sm:$0xff] }
 0x148   : > { %1980 = vmatmul.mubr.msk.bf16.gmra.mrb[8].mxu0 %vm1189_vm10, %v1168_v39 }
 0x149   : > { %v605_v48 = vpop.permute.xlu1 %604 }
 0x14a   : > { %v589_v61 = vpop.permute.xlu0 %588  ;;  %v957_v13 = vsel %vm925_vm2, %v2521_v8, %v605_v48 }
 0x14b   : > { %v941_v2 = vsel %vm925_vm2, %v2533_v52, %v589_v61 }
 0x14d   : > { %v684_v29 = vpop.permute.xlu1 %683 }
 0x14e   : > { %v668_v1 = vpop.permute.xlu0 %667  ;;  %v988_v53 = vsel %vm958_vm3, %v955_v55, %v684_v29 }
 0x14f   : > { %v972_v47 = vsel %vm958_vm3, %v939_v43, %v668_v1 }
 0x151   : > { %v686_v36 = vpop.permute.xlu1 %685 }
 0x152   : > { %v670_v37 = vpop.permute.xlu0 %669  ;;  %v990_v27 = vsel %vm958_vm3, %v957_v13, %v686_v36 }
 0x153   : > { %v974_v30 = vsel %vm958_vm3, %v941_v2, %v670_v37 }
 0x155   : > { %v721_v63 = vpop.permute.xlu1 %720 }
 0x156   : > { %v705_v6 = vpop.permute.xlu0 %704  ;;  %v1021_v15 = vsel %vm991_vm5, %v988_v53, %v721_v63 }
 0x157   : > { %v1005_v19 = vsel %vm991_vm5, %v972_v47, %v705_v6 }
 0x159   : > { %v723_v31 = vpop.permute.xlu1 %722 }
 0x15a   : > { %v707_v46 = vpop.permute.xlu0 %706  ;;  %v1023_v28 = vsel %vm991_vm5, %v990_v27, %v723_v31 }
 0x15b   : > { %v1007_v35 = vsel %vm991_vm5, %v974_v30, %v707_v46 }
 0x15d   : > { %v768_v24 = vpop.permute.xlu1 %767 }
 0x15e   : > { %v752_v40 = vpop.permute.xlu0 %751  ;;  %v1054_v49 = vsel %vm1024_vm4, %v1021_v15, %v768_v24 }
 0x15f   : > { %v1038_v54 = vsel %vm1024_vm4, %v1005_v19, %v752_v40 }
 0x161   : > { %v770_v12 = vpop.permute.xlu1 %769 }
 0x162   : > { %v754_v22 = vpop.permute.xlu0 %753  ;;  %v1056_v9 = vsel %vm1024_vm4, %v1023_v28, %v770_v12 }
 0x163   : > { %v1040_v20 = vsel %vm1024_vm4, %v1007_v35, %v754_v22 }
 0x165   : > { %v803_v33 = vpop.permute.xlu1 %802 }
 0x166   : > { %v787_v44 = vpop.permute.xlu0 %786  ;;  %v1087_v60 = vsel %vm1057_vm6, %v1054_v49, %v803_v33 }
 0x167   : > { %v1071_v14 = vsel %vm1057_vm6, %v1038_v54, %v787_v44 }
 0x169   : > { %v805_v0 = vpop.permute.xlu1 %804 }
 0x16a   : > { %v789_v3 = vpop.permute.xlu0 %788  ;;  %v1089_v32 = vsel %vm1057_vm6, %v1056_v9, %v805_v0 }
 0x16b   : > { %v1073_v41 = vsel %vm1057_vm6, %v1040_v20, %v789_v3 }
 0x16d   : > { %v840_v10 = vpop.permute.xlu1 %839 }
 0x16e   : > { %v824_v23 = vpop.permute.xlu0 %823  ;;  %v1120_v62 = vsel %vm1090_vm7, %v1087_v60, %v840_v10 }
 0x16f   : > { %v1104_v45 = vsel %vm1090_vm7, %v1071_v14, %v824_v23 }
 0x171   : > { %v842_v57 = vpop.permute.xlu1 %841 }
 0x172   : > { %v826_v38 = vpop.permute.xlu0 %825  ;;  %v1122_v58 = vsel %vm1090_vm7, %v1089_v32, %v842_v57 }
 0x173   : > { %v1106_v59 = vsel %vm1090_vm7, %v1073_v41, %v826_v38 }
 0x175   : > { %v887_v56 = vpop.permute.xlu1 %886 }
 0x176   : > { %v871_v11 = vpop.permute.xlu0 %870  ;;  %v1153_v8 = vsel %vm1123_vm8, %v1120_v62, %v887_v56 }
 0x177   : > { %v1137_v52 = vsel %vm1123_vm8, %v1104_v45, %v871_v11 }
 0x179   : > { %v889_v25 = vpop.permute.xlu1 %888 }
 0x17a   : > { %v873_v50 = vpop.permute.xlu0 %872  ;;  %v1155_v21 = vsel %vm1123_vm8, %v1122_v58, %v889_v25 }
 0x17b   : > { %v1139_v51 = vsel %vm1123_vm8, %v1106_v59, %v873_v50 }
 0x17d   : > { %v922_v5 = vpop.permute.xlu1 %921 }
 0x17e   : > { %v1186_v7 = vsel %vm1156_vm9, %v1153_v8, %v922_v5  ;;  %v906_v16 = vpop.permute.xlu0 %905 }
 0x17f   : > { %1999 = vmatprep.mubr.msk.bf16.mxu1 %vm1189_vm10, %v1186_v7  ;;  %v1170_v4 = vsel %vm1156_vm9, %v1137_v52, %v906_v16 }
 0x180   : > { %1983 = vmatprep.mubr.msk.bf16.mxu0 %vm1189_vm10, %v1170_v4 }
 0x181   : > { %v924_v18 = vpop.permute.xlu1 %923 }
 0x182   : > { %v1188_v34 = vsel %vm1156_vm9, %v1155_v21, %v924_v18  ;;  %v908_v26 = vpop.permute.xlu0 %907 }
 0x183   : > { %2000 = vmatmul.mubr.msk.bf16.gmra.mrb[12].mxu1 %vm1189_vm10, %v1188_v34  ;;  %v1172_v42 = vsel %vm1156_vm9, %v1139_v51, %v908_v26 }
 0x184   : > { %1984 = vmatmul.mubr.msk.bf16.gmra.mrb[12].mxu0 %vm1189_vm10, %v1172_v42 }
 0x19a   : > { %v1989_v39 = vpop.f32.mrb[0].mxu1 }
 0x19b   : > { %v1401_v48 = vadd.f32 %v1989_v39, %v2870_v17  ;;  %v1392_v61 = vpop.f32.mrb[1].mxu1  ;;  %v1973_v29 = vpop.f32.mrb[0].mxu0 }
 0x19c   : > { %v1393_v1 = vadd.f32 %v2870_v17, %v1392_v61  ;;  %v1990_v36 = vpop.f32.mrb[2].mxu1  ;;  %v1337_v37 = vadd.f32 %v1973_v29, %v2870_v17  ;;  %v1328_v6 = vpop.f32.mrb[1].mxu0 }
 0x19d   : > { %vm1473_vm12 = vcmp.ge.f32.partialorder %v1401_v48, 0.0  ;;  %v1505_v63 = vmul.f32 0.1, %v1401_v48  ;;  %v1404_v31 = vadd.f32 %v1990_v36, %v2870_v17  ;;  %v1395_v46 = vpop.f32.mrb[3].mxu1  ;;  %v1329_v24 = vadd.f32 %v2870_v17, %v1328_v6  ;;  %v1974_v12 = vpop.f32.mrb[2].mxu0 }
 0x19e   : > { %vm1471_vm13 = vcmp.ge.f32.partialorder %v1393_v1, 0.0  ;;  %v1503_v40 = vmul.f32 0.1, %v1393_v1  ;;  %v1396_v22 = vadd.f32 %v2870_v17, %v1395_v46  ;;  %vm1457_vm14 = vcmp.ge.f32.partialorder %v1337_v37, 0.0  ;;  %v1331_v3 = vpop.f32.mrb[3].mxu0 }
 0x19f   : > { %v1489_v33 = vmul.f32 0.1, %v1337_v37  ;;  %v1537_v44 = vsel %vm1473_vm12, %v1401_v48, %v1505_v63  ;;  %v1340_v0 = vadd.f32 %v1974_v12, %v2870_v17  ;;  %vm1455_vm15 = vcmp.ge.f32.partialorder %v1329_v24, 0.0 }
 0x1a0   : > { %v1917_v10 = vpack.c.bf16 %v1537_v44, %v1537_v44  ;;  %v1487_v23 = vmul.f32 0.1, %v1329_v24  ;;  %v1535_v57 = vsel %vm1471_vm13, %v1393_v1, %v1503_v40  ;;  %vm1474_vm1 = vcmp.ge.f32.partialorder %v1404_v31, 0.0 }
 0x1a1   : > { %v1521_v38 = vsel %vm1457_vm14, %v1337_v37, %v1489_v33  ;;  %v1915_v56 = vpack.c.bf16 %v1535_v57, %v1535_v57  ;;  %vm1458_vm0 = vcmp.ge.f32.partialorder %v1340_v0, 0.0  ;;  %v1490_v55 = vmul.f32 0.1, %v1340_v0 }
 0x1a2   : > { %v1901_v11 = vpack.c.bf16 %v1521_v38, %v1521_v38  ;;  %1698 = vst.msk [vmem:[%s2882_s25 + $0x48] sm:$0xf] %vm1679_vm11, %v1917_v10  ;;  %v1519_v53 = vsel %vm1455_vm15, %v1329_v24, %v1487_v23  ;;  %v1506_v43 = vmul.f32 0.1, %v1404_v31  ;;  %v1332_v47 = vadd.f32 %v2870_v17, %v1331_v3 }
 0x1a3   : > { %v1899_v15 = vpack.c.bf16 %v1519_v53, %v1519_v53  ;;  %1696 = vst.msk [vmem:[%s2882_s25 + $0x40] sm:$0xf] %vm1679_vm11, %v1915_v56  ;;  %v1522_v25 = vsel %vm1458_vm0, %v1340_v0, %v1490_v55  ;;  %vm1472_vm2 = vcmp.ge.f32.partialorder %v1396_v22, 0.0  ;;  %v1504_v19 = vmul.f32 0.1, %v1396_v22 }
 0x1a4   : > { %1682 = vst.msk [vmem:[%s2882_s25 + $0x8] sm:$0xf] %vm1679_vm11, %v1901_v11  ;;  %v1902_v49 = vpack.c.bf16 %v1522_v25, %v1522_v25  ;;  %v1538_v13 = vsel %vm1474_vm1, %v1404_v31, %v1506_v43  ;;  %vm1456_vm3 = vcmp.ge.f32.partialorder %v1332_v47, 0.0  ;;  %v1488_v50 = vmul.f32 0.1, %v1332_v47 }
 0x1a5   : > { %1680 = vst.msk [vmem:[%s2882_s25] sm:$0xf] %vm1679_vm11, %v1899_v15  ;;  %v1918_v60 = vpack.c.bf16 %v1538_v13, %v1538_v13  ;;  %v1536_v27 = vsel %vm1472_vm2, %v1396_v22, %v1504_v19 }
 0x1a6   : > { %1683 = vst.msk [vmem:[%s2882_s25 + $0xc] sm:$0xf] %vm1679_vm11, %v1902_v49  ;;  %v1520_v54 = vsel %vm1456_vm3, %v1332_v47, %v1488_v50  ;;  %v1916_v62 = vpack.c.bf16 %v1536_v27, %v1536_v27 }
 0x1a7   : > { %1699 = vst.msk [vmem:[%s2882_s25 + $0x4c] sm:$0xf] %vm1679_vm11, %v1918_v60  ;;  %v1900_v2 = vpack.c.bf16 %v1520_v54, %v1520_v54 }
 0x1a8   : > { %1697 = vst.msk [vmem:[%s2882_s25 + $0x44] sm:$0xf] %vm1679_vm11, %v1916_v62 }
 0x1a9   : > { %1681 = vst.msk [vmem:[%s2882_s25 + $0x4] sm:$0xf] %vm1679_vm11, %v1900_v2 }
 0x1da   : > { %v1993_v28 = vpop.f32.mrb[4].mxu1 }
 0x1db   : > { %v1417_v14 = vadd.f32 %v1993_v28, %v2870_v17  ;;  %v1408_v8 = vpop.f32.mrb[5].mxu1  ;;  %v1977_v5 = vpop.f32.mrb[4].mxu0 }
 0x1dc   : > { %v1409_v30 = vadd.f32 %v2870_v17, %v1408_v8  ;;  %v1994_v9 = vpop.f32.mrb[6].mxu1  ;;  %v1353_v45 = vadd.f32 %v1977_v5, %v2870_v17  ;;  %v1344_v35 = vpop.f32.mrb[5].mxu0 }
 0x1dd   : > { %vm1477_vm4 = vcmp.ge.f32.partialorder %v1417_v14, 0.0  ;;  %v1509_v7 = vmul.f32 0.1, %v1417_v14  ;;  %v1420_v32 = vadd.f32 %v1994_v9, %v2870_v17  ;;  %v1411_v52 = vpop.f32.mrb[7].mxu1  ;;  %v1345_v16 = vadd.f32 %v2870_v17, %v1344_v35  ;;  %v1978_v58 = vpop.f32.mrb[6].mxu0 }
 0x1de   : > { %vm1475_vm5 = vcmp.ge.f32.partialorder %v1409_v30, 0.0  ;;  %v1507_v20 = vmul.f32 0.1, %v1409_v30  ;;  %v1412_v4 = vadd.f32 %v2870_v17, %v1411_v52  ;;  %vm1461_vm6 = vcmp.ge.f32.partialorder %v1353_v45, 0.0  ;;  %v1347_v59 = vpop.f32.mrb[7].mxu0 }
 0x1df   : > { %v1493_v41 = vmul.f32 0.1, %v1353_v45  ;;  %v1541_v21 = vsel %vm1477_vm4, %v1417_v14, %v1509_v7  ;;  %v1356_v18 = vadd.f32 %v1978_v58, %v2870_v17  ;;  %vm1459_vm7 = vcmp.ge.f32.partialorder %v1345_v16, 0.0 }
 0x1e0   : > { %v1921_v34 = vpack.c.bf16 %v1541_v21, %v1541_v21  ;;  %v1491_v51 = vmul.f32 0.1, %v1345_v16  ;;  %v1539_v26 = vsel %vm1475_vm5, %v1409_v30, %v1507_v20  ;;  %vm1478_vm9 = vcmp.ge.f32.partialorder %v1420_v32, 0.0 }
 0x1e1   : > { %v1525_v42 = vsel %vm1461_vm6, %v1353_v45, %v1493_v41  ;;  %v1919_v39 = vpack.c.bf16 %v1539_v26, %v1539_v26  ;;  %vm1462_vm8 = vcmp.ge.f32.partialorder %v1356_v18, 0.0  ;;  %v1494_v48 = vmul.f32 0.1, %v1356_v18 }
 0x1e2   : > { %v1905_v61 = vpack.c.bf16 %v1525_v42, %v1525_v42  ;;  %1702 = vst.msk [vmem:[%s2882_s25 + $0x58] sm:$0xf] %vm1679_vm11, %v1921_v34  ;;  %v1523_v29 = vsel %vm1459_vm7, %v1345_v16, %v1491_v51  ;;  %v1510_v1 = vmul.f32 0.1, %v1420_v32  ;;  %v1348_v63 = vadd.f32 %v2870_v17, %v1347_v59 }
 0x1e3   : > { %v1903_v36 = vpack.c.bf16 %v1523_v29, %v1523_v29  ;;  %1700 = vst.msk [vmem:[%s2882_s25 + $0x50] sm:$0xf] %vm1679_vm11, %v1919_v39  ;;  %v1526_v37 = vsel %vm1462_vm8, %v1356_v18, %v1494_v48  ;;  %vm1476_vm10 = vcmp.ge.f32.partialorder %v1412_v4, 0.0  ;;  %v1508_v46 = vmul.f32 0.1, %v1412_v4 }
 0x1e4   : > { %1686 = vst.msk [vmem:[%s2882_s25 + $0x18] sm:$0xf] %vm1679_vm11, %v1905_v61  ;;  %v1906_v6 = vpack.c.bf16 %v1526_v37, %v1526_v37  ;;  %v1542_v31 = vsel %vm1478_vm9, %v1420_v32, %v1510_v1  ;;  %vm1460_vm12 = vcmp.ge.f32.partialorder %v1348_v63, 0.0  ;;  %v1492_v40 = vmul.f32 0.1, %v1348_v63 }
 0x1e5   : > { %1684 = vst.msk [vmem:[%s2882_s25 + $0x10] sm:$0xf] %vm1679_vm11, %v1903_v36  ;;  %v1922_v24 = vpack.c.bf16 %v1542_v31, %v1542_v31  ;;  %v1540_v12 = vsel %vm1476_vm10, %v1412_v4, %v1508_v46 }
 0x1e6   : > { %1687 = vst.msk [vmem:[%s2882_s25 + $0x1c] sm:$0xf] %vm1679_vm11, %v1906_v6  ;;  %v1524_v22 = vsel %vm1460_vm12, %v1348_v63, %v1492_v40  ;;  %v1920_v33 = vpack.c.bf16 %v1540_v12, %v1540_v12 }
 0x1e7   : > { %1703 = vst.msk [vmem:[%s2882_s25 + $0x5c] sm:$0xf] %vm1679_vm11, %v1922_v24  ;;  %v1904_v44 = vpack.c.bf16 %v1524_v22, %v1524_v22 }
 0x1e8   : > { %1701 = vst.msk [vmem:[%s2882_s25 + $0x54] sm:$0xf] %vm1679_vm11, %v1920_v33 }
 0x1e9   : > { %1685 = vst.msk [vmem:[%s2882_s25 + $0x14] sm:$0xf] %vm1679_vm11, %v1904_v44 }
 0x21a   : > { %v1997_v0 = vpop.f32.mrb[8].mxu1 }
 0x21b   : > { %v1433_v3 = vadd.f32 %v1997_v0, %v2870_v17  ;;  %v1424_v10 = vpop.f32.mrb[9].mxu1  ;;  %v1981_v23 = vpop.f32.mrb[8].mxu0 }
 0x21c   : > { %v1425_v57 = vadd.f32 %v2870_v17, %v1424_v10  ;;  %v1998_v38 = vpop.f32.mrb[10].mxu1  ;;  %v1369_v56 = vadd.f32 %v1981_v23, %v2870_v17  ;;  %v1360_v11 = vpop.f32.mrb[9].mxu0 }
 0x21d   : > { %vm1481_vm13 = vcmp.ge.f32.partialorder %v1433_v3, 0.0  ;;  %v1513_v55 = vmul.f32 0.1, %v1433_v3  ;;  %v1436_v53 = vadd.f32 %v1998_v38, %v2870_v17  ;;  %v1427_v43 = vpop.f32.mrb[11].mxu1  ;;  %v1361_v15 = vadd.f32 %v2870_v17, %v1360_v11  ;;  %v1982_v47 = vpop.f32.mrb[10].mxu0 }
 0x21e   : > { %vm1479_vm14 = vcmp.ge.f32.partialorder %v1425_v57, 0.0  ;;  %v1511_v25 = vmul.f32 0.1, %v1425_v57  ;;  %v1428_v49 = vadd.f32 %v2870_v17, %v1427_v43  ;;  %vm1465_vm15 = vcmp.ge.f32.partialorder %v1369_v56, 0.0  ;;  %v1363_v50 = vpop.f32.mrb[11].mxu0 }
 0x21f   : > { %v1497_v13 = vmul.f32 0.1, %v1369_v56  ;;  %v1545_v19 = vsel %vm1481_vm13, %v1433_v3, %v1513_v55  ;;  %v1372_v60 = vadd.f32 %v1982_v47, %v2870_v17  ;;  %vm1463_vm0 = vcmp.ge.f32.partialorder %v1361_v15, 0.0 }
 0x220   : > { %v1925_v27 = vpack.c.bf16 %v1545_v19, %v1545_v19  ;;  %v1495_v54 = vmul.f32 0.1, %v1361_v15  ;;  %v1543_v62 = vsel %vm1479_vm14, %v1425_v57, %v1511_v25  ;;  %vm1482_vm2 = vcmp.ge.f32.partialorder %v1436_v53, 0.0 }
 0x221   : > { %v1529_v2 = vsel %vm1465_vm15, %v1369_v56, %v1497_v13  ;;  %v1923_v28 = vpack.c.bf16 %v1543_v62, %v1543_v62  ;;  %vm1466_vm1 = vcmp.ge.f32.partialorder %v1372_v60, 0.0  ;;  %v1498_v14 = vmul.f32 0.1, %v1372_v60 }
 0x222   : > { %v1909_v8 = vpack.c.bf16 %v1529_v2, %v1529_v2  ;;  %1706 = vst.msk [vmem:[%s2882_s25 + $0x68] sm:$0xf] %vm1679_vm11, %v1925_v27  ;;  %v1527_v5 = vsel %vm1463_vm0, %v1361_v15, %v1495_v54  ;;  %v1514_v30 = vmul.f32 0.1, %v1436_v53  ;;  %v1364_v7 = vadd.f32 %v2870_v17, %v1363_v50 }
 0x223   : > { %v1907_v9 = vpack.c.bf16 %v1527_v5, %v1527_v5  ;;  %1704 = vst.msk [vmem:[%s2882_s25 + $0x60] sm:$0xf] %vm1679_vm11, %v1923_v28  ;;  %v1530_v45 = vsel %vm1466_vm1, %v1372_v60, %v1498_v14  ;;  %vm1480_vm3 = vcmp.ge.f32.partialorder %v1428_v49, 0.0  ;;  %v1512_v52 = vmul.f32 0.1, %v1428_v49 }
 0x224   : > { %1690 = vst.msk [vmem:[%s2882_s25 + $0x28] sm:$0xf] %vm1679_vm11, %v1909_v8  ;;  %v1910_v35 = vpack.c.bf16 %v1530_v45, %v1530_v45  ;;  %v1546_v32 = vsel %vm1482_vm2, %v1436_v53, %v1514_v30  ;;  %vm1464_vm4 = vcmp.ge.f32.partialorder %v1364_v7, 0.0  ;;  %v1496_v20 = vmul.f32 0.1, %v1364_v7 }
 0x225   : > { %1688 = vst.msk [vmem:[%s2882_s25 + $0x20] sm:$0xf] %vm1679_vm11, %v1907_v9  ;;  %v1926_v16 = vpack.c.bf16 %v1546_v32, %v1546_v32  ;;  %v1544_v58 = vsel %vm1480_vm3, %v1428_v49, %v1512_v52 }
 0x226   : > { %1691 = vst.msk [vmem:[%s2882_s25 + $0x2c] sm:$0xf] %vm1679_vm11, %v1910_v35  ;;  %v1528_v4 = vsel %vm1464_vm4, %v1364_v7, %v1496_v20  ;;  %v1924_v41 = vpack.c.bf16 %v1544_v58, %v1544_v58 }
 0x227   : > { %1707 = vst.msk [vmem:[%s2882_s25 + $0x6c] sm:$0xf] %vm1679_vm11, %v1926_v16  ;;  %v1908_v21 = vpack.c.bf16 %v1528_v4, %v1528_v4 }
 0x228   : > { %1705 = vst.msk [vmem:[%s2882_s25 + $0x64] sm:$0xf] %vm1679_vm11, %v1924_v41 }
 0x229   : > { %1689 = vst.msk [vmem:[%s2882_s25 + $0x24] sm:$0xf] %vm1679_vm11, %v1908_v21 }
 0x256   : > { %v2001_v18 = vpop.f32.mrb[12].mxu1 }
 0x257   : > { %v1449_v59 = vadd.f32 %v2001_v18, %v2870_v17  ;;  %v1440_v34 = vpop.f32.mrb[13].mxu1  ;;  %v1985_v51 = vpop.f32.mrb[12].mxu0 }
 0x258   : > { %v1441_v26 = vadd.f32 %v2870_v17, %v1440_v34  ;;  %v2002_v42 = vpop.f32.mrb[14].mxu1  ;;  %v1385_v39 = vadd.f32 %v1985_v51, %v2870_v17  ;;  %v1376_v61 = vpop.f32.mrb[13].mxu0 }
 0x259   : > { %vm1485_vm5 = vcmp.ge.f32.partialorder %v1449_v59, 0.0  ;;  %v1517_v48 = vmul.f32 0.1, %v1449_v59  ;;  %v1452_v29 = vadd.f32 %v2002_v42, %v2870_v17  ;;  %v1443_v1 = vpop.f32.mrb[15].mxu1  ;;  %v1377_v36 = vadd.f32 %v2870_v17, %v1376_v61  ;;  %v1986_v63 = vpop.f32.mrb[14].mxu0 }
 0x25a   : > { %vm1483_vm6 = vcmp.ge.f32.partialorder %v1441_v26, 0.0  ;;  %v1515_v37 = vmul.f32 0.1, %v1441_v26  ;;  %v1444_v6 = vadd.f32 %v2870_v17, %v1443_v1  ;;  %vm1469_vm7 = vcmp.ge.f32.partialorder %v1385_v39, 0.0  ;;  %v1379_v40 = vpop.f32.mrb[15].mxu0 }
 0x25b   : > { %v1501_v31 = vmul.f32 0.1, %v1385_v39  ;;  %v1549_v46 = vsel %vm1485_vm5, %v1449_v59, %v1517_v48  ;;  %v1388_v24 = vadd.f32 %v1986_v63, %v2870_v17  ;;  %vm1467_vm8 = vcmp.ge.f32.partialorder %v1377_v36, 0.0 }
 0x25c   : > { %v1929_v12 = vpack.c.bf16 %v1549_v46, %v1549_v46  ;;  %v1499_v22 = vmul.f32 0.1, %v1377_v36  ;;  %v1547_v33 = vsel %vm1483_vm6, %v1441_v26, %v1515_v37  ;;  %vm1486_vm10 = vcmp.ge.f32.partialorder %v1452_v29, 0.0 }
 0x25d   : > { %v1533_v44 = vsel %vm1469_vm7, %v1385_v39, %v1501_v31  ;;  %v1927_v0 = vpack.c.bf16 %v1547_v33, %v1547_v33  ;;  %vm1470_vm9 = vcmp.ge.f32.partialorder %v1388_v24, 0.0  ;;  %v1502_v3 = vmul.f32 0.1, %v1388_v24 }
 0x25e   : > { %v1913_v10 = vpack.c.bf16 %v1533_v44, %v1533_v44  ;;  %1710 = vst.msk [vmem:[%s2882_s25 + $0x78] sm:$0xf] %vm1679_vm11, %v1929_v12  ;;  %v1531_v23 = vsel %vm1467_vm8, %v1377_v36, %v1499_v22  ;;  %v1518_v57 = vmul.f32 0.1, %v1452_v29  ;;  %v1380_v55 = vadd.f32 %v2870_v17, %v1379_v40 }
 0x25f   : > { %v1911_v38 = vpack.c.bf16 %v1531_v23, %v1531_v23  ;;  %1708 = vst.msk [vmem:[%s2882_s25 + $0x70] sm:$0xf] %vm1679_vm11, %v1927_v0  ;;  %v1534_v56 = vsel %vm1470_vm9, %v1388_v24, %v1502_v3  ;;  %vm1484_vm12 = vcmp.ge.f32.partialorder %v1444_v6, 0.0  ;;  %v1516_v43 = vmul.f32 0.1, %v1444_v6 }
 0x260   : > { %1694 = vst.msk [vmem:[%s2882_s25 + $0x38] sm:$0xf] %vm1679_vm11, %v1913_v10  ;;  %v1914_v11 = vpack.c.bf16 %v1534_v56, %v1534_v56  ;;  %v1550_v53 = vsel %vm1486_vm10, %v1452_v29, %v1518_v57  ;;  %vm1468_vm13 = vcmp.ge.f32.partialorder %v1380_v55, 0.0  ;;  %v1500_v25 = vmul.f32 0.1, %v1380_v55 }
 0x261   : > { %1692 = vst.msk [vmem:[%s2882_s25 + $0x30] sm:$0xf] %vm1679_vm11, %v1911_v38  ;;  %v1930_v15 = vpack.c.bf16 %v1550_v53, %v1550_v53  ;;  %v1548_v47 = vsel %vm1484_vm12, %v1444_v6, %v1516_v43 }
 0x262   : > { %1695 = vst.msk [vmem:[%s2882_s25 + $0x3c] sm:$0xf] %vm1679_vm11, %v1914_v11  ;;  %v1532_v49 = vsel %vm1468_vm13, %v1380_v55, %v1500_v25  ;;  %v1928_v17 = vpack.c.bf16 %v1548_v47, %v1548_v47 }
 0x263   : > { %1711 = vst.msk [vmem:[%s2882_s25 + $0x7c] sm:$0xf] %vm1679_vm11, %v1930_v15  ;;  %v1912_v13 = vpack.c.bf16 %v1532_v49, %v1532_v49 }
 0x264   : > { %1709 = vst.msk [vmem:[%s2882_s25 + $0x74] sm:$0xf] %vm1679_vm11, %v1928_v17 }
 0x265   : > { %1693 = vst.msk [vmem:[%s2882_s25 + $0x34] sm:$0xf] %vm1679_vm11, %v1912_v13 }
 0x266 PF: > { %s13_s14 = sadd.s32 1, %s2120_s14   ;;  %s2987_s12 = smov %s2116_s13 }
 0x267   : > { %p10_p5 = scmp.ge.s32.totalorder %s13_s14, 4   ;;  %s2988_s13 = smov %s2990_s15 }
 0x269   :  { %12 = sbr.rel (!%p10_p5) target bundleno = 2 (0x2), region = 63 }

// kernel: tpu_custom_call.1
= control target key start
LH: loop header
LB: loop body
LE: loop exit
PB: predicated region body
PF: predicated region fallthrough
CT: control target
= control target key end

     0   :  { %s2150_s12 = smov 0   ;;  %s2152_s13 = smov 0   ;;  %s2983_s0 = inlined_call_operand.vmem [shape: bf16[2,18,18,4], index: 0, kind: input, shape index: {}]   ;;  %s2984_s1 = inlined_call_operand.vmem [shape: bf16[128,16], index: 1, kind: input, shape index: {}]   ;;  %s2985_s2 = inlined_call_operand.vmem [shape: f32[1,16], index: 2, kind: input, shape index: {}]   ;;  %s2986_s3 = inlined_call_operand.vmem [shape: bf16[2,256,16], index: 3, kind: output, shape index: {}]  }
   0x1   :  { %s2154_s14 = smov 0  }
   0x2 LB: > { %s25_s15 = sadd.s32 1, %s2116_s13  ;;  %p1799_p0 = scmp.ge.s32.totalorder %s2120_s14, 1  ;;  %s2120_s14 = sphi %s2154_s14, %s13_s14   ;;  %s2116_s13 = sphi %s2152_s13, %s2988_s13   ;;  %s2112_s12 = sphi %s2150_s12, %s2987_s12  }
   0x3   : > { %p27_p1 = scmp.ge.s32.totalorder %s25_s15, 2  ;;  %p151_p2 = scmp.lt.s32.totalorder %s2120_s14, 3 }
   0x5   : > { %s2990_s15 = smov (%p27_p1, %s25_s15), 0  ;;  %p152_p3 = pnand %p1799_p0, %p151_p2 }
   0x6   : > { %p179_p4 = scmp.lt.s32.totalorder (!%p152_p3), %s2112_s12, 1  ;;  %vm606_vm0 = vcmask (!%p152_p3), 1046528   ;;  %s2122_s20 = smov (!%p152_p3), 12   ;;  %vm381_vm1 = vsmask.f32 (!%p152_p3), 7424  ;;  %v2076_v62 = vld [vmem:[%s2984_s1] sm:$0xff] (!%p152_p3)  }
   0x7   : > { %155 = sbr.rel (%p152_p3) target bundleno = 614 (0x266), region = 32  ;;  %s2123_s21 = smov (!%p152_p3), 8   ;;  %1955 = vmatprep.subr.bf16.mxu0 (!%p152_p3), %v2076_v62  ;;  %2003 = vmatprep.subr.bf16.mxu1 (!%p152_p3), %v2076_v62  ;;  %vm925_vm2 = vcmask (!%p152_p3), 31744   ;;  %vm958_vm3 = vcmask (!%p152_p3), 64512   ;;  %vm1024_vm4 = vcmask (!%p152_p3), 130048   ;;  %vm991_vm5 = vcmask (!%p152_p3), 97280  }
   0x8   : > { %s2124_s22 = smov (!%p152_p3), 4   ;;  %s2125_s25 = smov (!%p152_p3), 16   ;;  %1956 = vmatpush3.bf16.msra.mxu0 (!%p152_p3), %v2076_v62  ;;  %2011 = vmatpush3.bf16.msra.mxu1 (!%p152_p3), %v2076_v62  ;;  %vm1057_vm6 = vcmask (!%p152_p3), 162816   ;;  %vm1090_vm7 = vcmask (!%p152_p3), 195584   ;;  %vm1123_vm8 = vcmask (!%p152_p3), 228352   ;;  %vm1156_vm9 = vcmask (!%p152_p3), 261120  }
   0x9   : > { %s2126_s28 = smov (!%p152_p3), 20   ;;  %s2127_s8 = smov (!%p152_p3), 24   ;;  %vm1189_vm10 = vcmask (!%p152_p3), 293888   ;;  %vm1679_vm11 = vcmask (!%p152_p3), 125952  }
   0xa   : > { %s2128_s17 = smov (!%p152_p3), 28   ;;  %s2129_s24 = smov (!%p152_p3), 32  }
   0xe   : > { %s2992_s12 = smov (!%p179_p4, %s2112_s12), 1 }
   0xf   : > { %s2019_s16 = smul.u32 216, %s2992_s12 }
  0x11   : > { %s2174_s19 = scalar_lea.vmem %s2983_s0, %s2019_s16 }
  0x12   : > { %v2177_v0 = vld [vmem:[%s2174_s19 + $0x6c] sm:$0xff]   ;;  %v2187_v2 = vld [vmem:[%s2174_s19 + $0x60] sm:$0xff]   ;;  %v2055_v3 = vld [vmem:[%s2174_s19 + $0x68] ss:$0 sps:$4 sm:$0x11]  }
  0x13   : > { %v2180_v1 = vld [vmem:[%s2174_s19 + $0xc] sm:$0xff]   ;;  %708 = vrot.lane.b32.xlu1 %v2177_v0, %s2122_s20  ;;  %v2191_v4 = vld [vmem:[%s2174_s19] sm:$0xff]   ;;  %v634_v5 = vrot.slane %v2177_v0, 1  ;;  %v631_v6 = vrot.slane %v2187_v2, 1  ;;  %v632_v7 = vrot.slane %v2055_v3, 1  ;;  %v491_v26 = vshrl.u32 %v2177_v0, 16 }
  0x14   : > { %692 = vrot.lane.b32.xlu0 %v2180_v1, %s2122_s20  ;;  %v2057_v8 = vld [vmem:[%s2174_s19 + $0x8] ss:$0 sps:$4 sm:$0x11]   ;;  %v610_v9 = vrot.slane %v2180_v1, 1  ;;  %v607_v10 = vrot.slane %v2191_v4, 1  ;;  %v395_v16 = vshrl.u32 %v2180_v1, 16 }
  0x15   : > { %v2058_v11 = vld [vmem:[%s2174_s19 + $0x74] ss:$0 sps:$4 sm:$0x11]   ;;  %v2200_v12 = vsel %vm606_vm0, %v631_v6, %v632_v7  ;;  %v608_v13 = vrot.slane %v2057_v8, 1  ;;  %v397_v17 = vshll.u32 %v2180_v1, 16  ;;  %v383_v18 = vshrl.u32 %v2191_v4, 16 }
  0x16   : > { %v2059_v14 = vld [vmem:[%s2174_s19 + $0x14] ss:$0 sps:$4 sm:$0x11]   ;;  %v635_v15 = vrot.slane %v2058_v11, 1  ;;  %v385_v22 = vshll.u32 %v2191_v4, 16  ;;  %v390_v25 = vshll.u32 %v2057_v8, 16 }
  0x17   : > { %671 = vrot.lane.b32.xlu1 %v2200_v12, %s2123_s21  ;;  %v609_v19 = vsel %vm606_vm0, %v607_v10, %v608_v13  ;;  %v611_v20 = vrot.slane %v2059_v14, 1  ;;  %v402_v21 = vshll.u32 %v2059_v14, 16  ;;  %v399_v24 = vrot.slane %v397_v17, 1  ;;  %v2224_v39 = vld [vmem:[%s2174_s19 + $0x78] sm:$0xff]   ;;  %v2277_v13 = vld [vmem:[%s2174_s19 + $0x84] sm:$0xff]  }
  0x18   : > { %655 = vrot.lane.b32.xlu0 %v609_v19, %s2123_s21  ;;  %v2212_v23 = vsel %vm606_vm0, %v634_v5, %v635_v15  ;;  %v387_v29 = vrot.slane %v385_v22, 1  ;;  %v493_v30 = vshll.u32 %v2177_v0, 16  ;;  %v392_v32 = vrot.slane %v390_v25, 1  ;;  %v2231_v46 = vld [vmem:[%s2174_s19 + $0x18] sm:$0xff]   ;;  %v2280_v14 = vld [vmem:[%s2174_s19 + $0x24] sm:$0xff]   ;;  %v2080_v15 = vld [vmem:[%s2984_s1 + $0x10] sm:$0xff]  }
  0x19   : > { %v2216_v27 = vsel %vm606_vm0, %v610_v9, %v611_v20  ;;  %v404_v28 = vrot.slane %v402_v21, 1  ;;  %v400_v31 = vor.u32 %v399_v24, %v395_v16  ;;  %v498_v33 = vshll.u32 %v2058_v11, 16  ;;  %v2062_v47 = vld [vmem:[%s2174_s19 + $0x80] ss:$0 sps:$4 sm:$0x11]   ;;  %v2079_v9 = vld [vmem:[%s2984_s1 + $0x8] sm:$0xff]  }
  0x1a   : > { %v479_v34 = vshrl.u32 %v2187_v2, 16  ;;  %v388_v35 = vor.u32 %v387_v29, %v383_v18  ;;  %v495_v36 = vrot.slane %v493_v30, 1  ;;  %v481_v37 = vshll.u32 %v2187_v2, 16  ;;  %v2063_v52 = vld [vmem:[%s2174_s19 + $0x20] ss:$0 sps:$4 sm:$0x11]   ;;  %1957 = vmatprep.subr.bf16.mxu0 %v2079_v9  ;;  %2004 = vmatprep.subr.bf16.mxu1 %v2079_v9 }
  0x1b   : > { %673 = vrot.lane.b32.xlu1 %v2212_v23, %s2123_s21  ;;  %v486_v38 = vshll.u32 %v2055_v3, 16  ;;  %v405_v40 = vsel %vm381_vm1, %v400_v31, %v404_v28  ;;  %v500_v41 = vrot.slane %v498_v33, 1  ;;  %v505_v50 = vshll.u32 %v2224_v39, 16  ;;  %1958 = vmatpush3.bf16.msra.mxu0 %v2079_v9  ;;  %v2293_v17 = vld [vmem:[%s2174_s19 + $0x8c] ss:$0 sps:$4 sm:$0x11]  }
  0x1c   : > { %657 = vrot.lane.b32.xlu0 %v2216_v27, %s2123_s21  ;;  %v393_v42 = vsel %vm381_vm1, %v388_v35, %v392_v32  ;;  %v496_v43 = vor.u32 %v495_v36, %v491_v26  ;;  %v483_v44 = vrot.slane %v481_v37, 1  ;;  %v409_v53 = vshll.u32 %v2231_v46, 16  ;;  %2012 = vmatpush3.bf16.msra.mxu1 %v2079_v9  ;;  %v2083_v18 = vld [vmem:[%s2984_s1 + $0x18] sm:$0xff]   ;;  %v2067_v22 = vld [vmem:[%s2174_s19 + $0x2c] ss:$0 sps:$4 sm:$0x11]  }
  0x1d   : > { %v488_v45 = vrot.slane %v486_v38, 1  ;;  %v503_v54 = vshrl.u32 %v2224_v39, 16  ;;  %v507_v55 = vrot.slane %v505_v50, 1  ;;  %v510_v56 = vshll.u32 %v2062_v47, 16  ;;  %1959 = vmatprep.subr.bf16.mxu0 %v2080_v15  ;;  %2005 = vmatprep.subr.bf16.mxu1 %v2080_v15  ;;  %v2084_v24 = vld [vmem:[%s2984_s1 + $0x20] sm:$0xff]   ;;  %v2085_v31 = vld [vmem:[%s2984_s1 + $0x28] sm:$0xff]  }
  0x1e   : > { %v2236_v48 = vsel %vm381_vm1, %v496_v43, %v500_v41  ;;  %v484_v49 = vor.u32 %v483_v44, %v479_v34  ;;  %v407_v57 = vshrl.u32 %v2231_v46, 16  ;;  %v411_v58 = vrot.slane %v409_v53, 1  ;;  %v2086_v34 = vld [vmem:[%s2984_s1 + $0x30] sm:$0xff]   ;;  %v2089_v38 = vld [vmem:[%s2984_s1 + $0x38] sm:$0xff]  }
  0x1f   : > { %576 = vrot.lane.b32.xlu1 %v405_v40, %s2124_s22  ;;  %v414_v59 = vshll.u32 %v2063_v52, 16  ;;  %v508_v60 = vor.u32 %v507_v55, %v503_v54  ;;  %v512_v61 = vrot.slane %v510_v56, 1  ;;  %v637_v7 = vrot.slane %v2224_v39, 1  ;;  %1960 = vmatpush3.bf16.msra.mxu0 %v2080_v15  ;;  %v2364_v50 = vld [vmem:[%s2174_s19 + $0x30] sm:$0xff]  }
  0x20   : > { %574 = vrot.lane.b32.xlu0 %v393_v42, %s2124_s22  ;;  %v2241_v51 = vsel %vm381_vm1, %v484_v49, %v488_v45  ;;  %v412_v63 = vor.u32 %v411_v58, %v407_v57  ;;  %v638_v8 = vrot.slane %v2062_v47, 1  ;;  %v613_v10 = vrot.slane %v2231_v46, 1  ;;  %2013 = vmatpush3.bf16.msra.mxu1 %v2080_v15  ;;  %v2359_v49 = vld [vmem:[%s2174_s19 + $0x90] sm:$0xff]   ;;  %v2071_v54 = vld [vmem:[%s2174_s19 + $0x38] ss:$0 sps:$4 sm:$0x11]  }
  0x21   : > { %v416_v3 = vrot.slane %v414_v59, 1  ;;  %v2261_v5 = vsel %vm381_vm1, %v508_v60, %v512_v61  ;;  %v614_v11 = vrot.slane %v2063_v52, 1  ;;  %v517_v20 = vshll.u32 %v2277_v13, 16  ;;  %1961 = vmatprep.subr.bf16.mxu0 %v2083_v18  ;;  %2006 = vmatprep.subr.bf16.mxu1 %v2083_v18  ;;  %v2070_v52 = vld [vmem:[%s2174_s19 + $0x98] ss:$0 sps:$4 sm:$0x11]  }
  0x22   : > { %v2288_v16 = vsel %vm606_vm0, %v637_v7, %v638_v8  ;;  %v421_v21 = vshll.u32 %v2280_v14, 16  ;;  %v515_v25 = vshrl.u32 %v2277_v13, 16  ;;  %v522_v26 = vshll.u32 %v2293_v17, 16 }
  0x23   : > { %592 = vrot.lane.b32.xlu1 %v2236_v48, %s2124_s22  ;;  %v2265_v6 = vsel %vm381_vm1, %v412_v63, %v416_v3  ;;  %v2299_v19 = vsel %vm606_vm0, %v613_v10, %v614_v11  ;;  %v519_v28 = vrot.slane %v517_v20, 1  ;;  %v426_v30 = vshll.u32 %v2067_v22, 16  ;;  %1962 = vmatpush3.bf16.msra.mxu0 %v2083_v18 }
  0x24   : > { %590 = vrot.lane.b32.xlu0 %v2241_v51, %s2124_s22  ;;  %v423_v29 = vrot.slane %v421_v21, 1  ;;  %2014 = vmatpush3.bf16.msra.mxu1 %v2083_v18  ;;  %v524_v33 = vrot.slane %v522_v26, 1  ;;  %v640_v41 = vrot.slane %v2277_v13, 1  ;;  %v641_v42 = vrot.slane %v2293_v17, 1  ;;  %v2398_v18 = vld [vmem:[%s2174_s19 + $0x3c] sm:$0xff]  }
  0x25   : > { %1963 = vmatprep.subr.bf16.mxu0 %v2084_v24  ;;  %2007 = vmatprep.subr.bf16.mxu1 %v2084_v24  ;;  %v520_v32 = vor.u32 %v519_v28, %v515_v25  ;;  %v428_v36 = vrot.slane %v426_v30, 1  ;;  %v616_v43 = vrot.slane %v2280_v14, 1  ;;  %v617_v44 = vrot.slane %v2067_v22, 1  ;;  %v2075_v21 = vld [vmem:[%s2174_s19 + $0x44] ss:$0 sps:$4 sm:$0x11]  }
  0x26   : > { %v642_v45 = vsel %vm606_vm0, %v640_v41, %v641_v42  ;;  %v529_v53 = vshll.u32 %v2359_v49, 16  ;;  %v433_v55 = vshll.u32 %v2364_v50, 16  ;;  %v527_v56 = vshrl.u32 %v2359_v49, 16 }
  0x27   : > { %710 = vrot.lane.b32.xlu1 %v2224_v39, %s2122_s20  ;;  %1964 = vmatpush3.bf16.msra.mxu0 %v2084_v24  ;;  %v525_v37 = vsel %vm381_vm1, %v520_v32, %v524_v33  ;;  %v618_v47 = vsel %vm606_vm0, %v616_v43, %v617_v44  ;;  %v534_v58 = vshll.u32 %v2070_v52, 16  ;;  %v431_v59 = vshrl.u32 %v2364_v50, 16 }
  0x28   : > { %694 = vrot.lane.b32.xlu0 %v2231_v46, %s2122_s20  ;;  %2015 = vmatpush3.bf16.msra.mxu1 %v2084_v24  ;;  %v531_v57 = vrot.slane %v529_v53, 1  ;;  %v435_v60 = vrot.slane %v433_v55, 1  ;;  %v438_v61 = vshll.u32 %v2071_v54, 16  ;;  %v643_v8 = vrot.slane %v2359_v49, 1 }
  0x29   : > { %1965 = vmatprep.subr.bf16.mxu0 %v2085_v31  ;;  %2008 = vmatprep.subr.bf16.mxu1 %v2085_v31  ;;  %v536_v63 = vrot.slane %v534_v58, 1  ;;  %v644_v9 = vrot.slane %v2070_v52, 1  ;;  %v619_v10 = vrot.slane %v2364_v50, 1  ;;  %v620_v11 = vrot.slane %v2071_v54, 1 }
  0x2a   : > { %v532_v62 = vor.u32 %v531_v57, %v527_v56  ;;  %v436_v3 = vor.u32 %v435_v60, %v431_v59  ;;  %v445_v22 = vshll.u32 %v2398_v18, 16  ;;  %v622_v44 = vrot.slane %v2398_v18, 1  ;;  %v2459_v60 = vld [vmem:[%s2174_s19 + $0xa8] sm:$0xff]  }
  0x2b   : > { %755 = vrot.lane.b32.xlu1 %v2236_v48, %s2125_s25  ;;  %1966 = vmatpush3.bf16.msra.mxu0 %v2085_v31  ;;  %v645_v15 = vsel %vm606_vm0, %v643_v8, %v644_v9  ;;  %v621_v17 = vsel %vm606_vm0, %v619_v10, %v620_v11  ;;  %v551_v10 = vshrl.u32 %v2459_v60, 16 }
  0x2c   : > { %739 = vrot.lane.b32.xlu0 %v405_v40, %s2125_s25  ;;  %2016 = vmatpush3.bf16.msra.mxu1 %v2085_v31  ;;  %v447_v28 = vrot.slane %v445_v22, 1 }
  0x2d   : > { %1967 = vmatprep.subr.bf16.mxu0 %v2086_v34  ;;  %2009 = vmatprep.subr.bf16.mxu1 %v2086_v34 }
  0x2f   : > { %757 = vrot.lane.b32.xlu1 %v2261_v5, %s2125_s25  ;;  %1968 = vmatpush3.bf16.msra.mxu0 %v2086_v34 }
  0x30   : > { %741 = vrot.lane.b32.xlu0 %v2265_v6, %s2125_s25  ;;  %2017 = vmatpush3.bf16.msra.mxu1 %v2086_v34 }
  0x31   : > { %1969 = vmatprep.subr.bf16.mxu0 %v2089_v38  ;;  %2010 = vmatprep.subr.bf16.mxu1 %v2089_v38 }
  0x33   : > { %790 = vrot.lane.b32.xlu1 %v2212_v23, %s2126_s28  ;;  %1970 = vmatpush3.bf16.msra.mxu0 %v2089_v38 }
  0x34   : > { %774 = vrot.lane.b32.xlu0 %v2216_v27, %s2126_s28  ;;  %v419_v27 = vshrl.u32 %v2280_v14, 16  ;;  %2018 = vmatpush3.bf16.msra.mxu1 %v2089_v38 }
  0x36   : > { %v424_v35 = vor.u32 %v423_v29, %v419_v27  ;;  %v443_v27 = vshrl.u32 %v2398_v18, 16  ;;  %v450_v29 = vshll.u32 %v2075_v21, 16 }
  0x37   : > { %792 = vrot.lane.b32.xlu1 %v2288_v16, %s2126_s28 }
  0x38   : > { %776 = vrot.lane.b32.xlu0 %v2299_v19, %s2126_s28  ;;  %v429_v40 = vsel %vm381_vm1, %v424_v35, %v428_v36  ;;  %v448_v32 = vor.u32 %v447_v28, %v443_v27  ;;  %v452_v33 = vrot.slane %v450_v29, 1 }
  0x3b   : > { %827 = vrot.lane.b32.xlu1 %v2224_v39, %s2127_s8 }
  0x3c   : > { %811 = vrot.lane.b32.xlu0 %v2231_v46, %s2127_s8 }
  0x3f   : > { %829 = vrot.lane.b32.xlu1 %v2277_v13, %s2127_s8 }
  0x40   : > { %813 = vrot.lane.b32.xlu0 %v2280_v14, %s2127_s8 }
  0x43   : > { %874 = vrot.lane.b32.xlu1 %v2261_v5, %s2128_s17 }
  0x44   : > { %858 = vrot.lane.b32.xlu0 %v2265_v6, %s2128_s17 }
  0x47   : > { %876 = vrot.lane.b32.xlu1 %v525_v37, %s2128_s17 }
  0x48   : > { %860 = vrot.lane.b32.xlu0 %v429_v40, %s2128_s17 }
  0x4b   : > { %909 = vrot.lane.b32.xlu1 %v2288_v16, %s2129_s24 }
  0x4c   : > { %893 = vrot.lane.b32.xlu0 %v2299_v19, %s2129_s24 }
  0x4f   : > { %594 = vrot.lane.b32.xlu1 %v2261_v5, %s2124_s22  ;;  %v440_v5 = vrot.slane %v438_v61, 1 }
  0x50   : > { %578 = vrot.lane.b32.xlu0 %v2265_v6, %s2124_s22  ;;  %v537_v6 = vsel %vm381_vm1, %v532_v62, %v536_v63  ;;  %v2465_v62 = vld [vmem:[%s2174_s19 + $0x48] sm:$0xff]  }
  0x51   : > { %v441_v7 = vsel %vm381_vm1, %v436_v3, %v440_v5  ;;  %v2081_v3 = vld [vmem:[%s2174_s19 + $0xb0] ss:$0 sps:$4 sm:$0x11]   ;;  %v553_v5 = vshll.u32 %v2459_v60, 16  ;;  %v457_v8 = vshll.u32 %v2465_v62, 16 }
  0x53   : > { %911 = vrot.lane.b32.xlu1 %v642_v45, %s2129_s24  ;;  %v555_v11 = vrot.slane %v553_v5, 1 }
  0x54   : > { %895 = vrot.lane.b32.xlu0 %v618_v47, %s2129_s24 }
  0x57   : > { %596 = vrot.lane.b32.xlu1 %v525_v37, %s2124_s22 }
  0x58   : > { %580 = vrot.lane.b32.xlu0 %v429_v40, %s2124_s22 }
  0x5b   : > { %675 = vrot.lane.b32.xlu1 %v2288_v16, %s2123_s21  ;;  %v2393_v16 = vld [vmem:[%s2174_s19 + $0x9c] sm:$0xff]  }
  0x5c   : > { %659 = vrot.lane.b32.xlu0 %v2299_v19, %s2123_s21  ;;  %v2074_v19 = vld [vmem:[%s2174_s19 + $0xa4] ss:$0 sps:$4 sm:$0x11]   ;;  %v541_v20 = vshll.u32 %v2393_v16, 16  ;;  %v539_v24 = vshrl.u32 %v2393_v16, 16  ;;  %v646_v41 = vrot.slane %v2393_v16, 1 }
  0x5d   : > { %v546_v26 = vshll.u32 %v2074_v19, 16  ;;  %v647_v42 = vrot.slane %v2074_v19, 1  ;;  %v455_v19 = vshrl.u32 %v2465_v62, 16 }
  0x5e   : > { %v543_v25 = vrot.slane %v541_v20, 1  ;;  %v459_v20 = vrot.slane %v457_v8, 1  ;;  %v2521_v8 = vld [vmem:[%s2174_s19 + $0xb4] sm:$0xff]  }
  0x5f   : > { %677 = vrot.lane.b32.xlu1 %v642_v45, %s2123_s21  ;;  %v548_v31 = vrot.slane %v546_v26, 1  ;;  %v648_v52 = vsel %vm606_vm0, %v646_v41, %v647_v42  ;;  %v649_v41 = vrot.slane %v2459_v60, 1  ;;  %v650_v42 = vrot.slane %v2081_v3, 1 }
  0x60   : > { %661 = vrot.lane.b32.xlu0 %v618_v47, %s2123_s21  ;;  %v544_v30 = vor.u32 %v543_v25, %v539_v24  ;;  %v556_v24 = vor.u32 %v555_v11, %v551_v10  ;;  %v460_v27 = vor.u32 %v459_v20, %v455_v19 }
  0x62   : > { %v549_v35 = vsel %vm381_vm1, %v544_v30, %v548_v31 }
  0x63   : > { %712 = vrot.lane.b32.xlu1 %v2277_v13, %s2122_s20 }
  0x64   : > { %696 = vrot.lane.b32.xlu0 %v2280_v14, %s2122_s20 }
  0x67   : > { %714 = vrot.lane.b32.xlu1 %v2359_v49, %s2122_s20 }
  0x68   : > { %698 = vrot.lane.b32.xlu0 %v2364_v50, %s2122_s20 }
  0x6b   : > { %759 = vrot.lane.b32.xlu1 %v525_v37, %s2125_s25  ;;  %v453_v37 = vsel %vm381_vm1, %v448_v32, %v452_v33 }
  0x6c   : > { %743 = vrot.lane.b32.xlu0 %v429_v40, %s2125_s25 }
  0x6f   : > { %761 = vrot.lane.b32.xlu1 %v537_v6, %s2125_s25 }
  0x70   : > { %745 = vrot.lane.b32.xlu0 %v441_v7, %s2125_s25 }
  0x73   : > { %794 = vrot.lane.b32.xlu1 %v642_v45, %s2126_s28  ;;  %v623_v45 = vrot.slane %v2075_v21, 1 }
  0x74   : > { %778 = vrot.lane.b32.xlu0 %v618_v47, %s2126_s28 }
  0x75   : > { %v2444_v54 = vsel %vm606_vm0, %v622_v44, %v623_v45 }
  0x77   : > { %796 = vrot.lane.b32.xlu1 %v645_v15, %s2126_s28 }
  0x78   : > { %780 = vrot.lane.b32.xlu0 %v621_v17, %s2126_s28 }
  0x7b   : > { %831 = vrot.lane.b32.xlu1 %v2359_v49, %s2127_s8 }
  0x7c   : > { %815 = vrot.lane.b32.xlu0 %v2364_v50, %s2127_s8 }
  0x7f   : > { %833 = vrot.lane.b32.xlu1 %v2393_v16, %s2127_s8 }
  0x80   : > { %817 = vrot.lane.b32.xlu0 %v2398_v18, %s2127_s8 }
  0x83   : > { %878 = vrot.lane.b32.xlu1 %v537_v6, %s2128_s17 }
  0x84   : > { %862 = vrot.lane.b32.xlu0 %v441_v7, %s2128_s17 }
  0x85   : > { %v2417_v34 = vpop.permute.xlu1 %708 }
  0x86   : > { %v2421_v36 = vpop.permute.xlu0 %692 }
  0x87   : > { %880 = vrot.lane.b32.xlu1 %v549_v35, %s2128_s17 }
  0x88   : > { %864 = vrot.lane.b32.xlu0 %v453_v37, %s2128_s17 }
  0x89   : > { %v2426_v38 = vpop.permute.xlu1 %671 }
  0x8a   : > { %v2428_v40 = vpop.permute.xlu0 %655 }
  0x8b   : > { %913 = vrot.lane.b32.xlu1 %v645_v15, %s2129_s24 }
  0x8c   : > { %897 = vrot.lane.b32.xlu0 %v621_v17, %s2129_s24 }
  0x8d   : > { %v2433_v43 = vpop.permute.xlu1 %673 }
  0x8e   : > { %v2436_v47 = vpop.permute.xlu0 %657 }
  0x8f   : > { %598 = vrot.lane.b32.xlu1 %v537_v6, %s2124_s22 }
  0x90   : > { %582 = vrot.lane.b32.xlu0 %v441_v7, %s2124_s22  ;;  %v2082_v7 = vld [vmem:[%s2174_s19 + $0x50] ss:$0 sps:$4 sm:$0x11]  }
  0x91   : > { %v2441_v53 = vpop.permute.xlu1 %576  ;;  %v462_v21 = vshll.u32 %v2082_v7, 16  ;;  %v626_v44 = vrot.slane %v2082_v7, 1 }
  0x92   : > { %v575_v55 = vpop.permute.xlu0 %574 }
  0x93   : > { %915 = vrot.lane.b32.xlu1 %v648_v52, %s2129_s24  ;;  %v464_v28 = vrot.slane %v462_v21, 1  ;;  %v927_v10 = vsel %vm925_vm2, %v2191_v4, %v575_v55 }
  0x94   : > { %899 = vrot.lane.b32.xlu0 %v2444_v54, %s2129_s24  ;;  %v960_v4 = vsel %vm958_vm3, %v927_v10, %v2428_v40  ;;  %v2550_v40 = vld [vmem:[%s2174_s19 + $0x5c] ss:$0 sps:$4 sm:$0x11]  }
  0x95   : > { %v2449_v56 = vpop.permute.xlu1 %592  ;;  %v2502_v32 = vsel %vm381_vm1, %v460_v27, %v464_v28  ;;  %v563_v27 = vshrl.u32 %v2521_v8, 16 }
  0x96   : > { %v591_v57 = vpop.permute.xlu0 %590 }
  0x97   : > { %600 = vrot.lane.b32.xlu1 %v549_v35, %s2124_s22  ;;  %v943_v45 = vsel %vm925_vm2, %v2187_v2, %v591_v57 }
  0x98   : > { %584 = vrot.lane.b32.xlu0 %v453_v37, %s2124_s22  ;;  %v976_v57 = vsel %vm958_vm3, %v943_v45, %v2426_v38  ;;  %v565_v38 = vshll.u32 %v2521_v8, 16 }
  0x99   : > { %v2453_v58 = vpop.permute.xlu1 %710  ;;  %v1009_v55 = vsel %vm991_vm5, %v976_v57, %v2417_v34  ;;  %v474_v57 = vshll.u32 %v2550_v40, 16 }
  0x9a   : > { %v2455_v59 = vpop.permute.xlu0 %694 }
  0x9b   : > { %679 = vrot.lane.b32.xlu1 %v645_v15, %s2123_s21  ;;  %v558_v15 = vshll.u32 %v2081_v3, 16  ;;  %v2518_v3 = vsel %vm606_vm0, %v649_v41, %v650_v42  ;;  %v567_v41 = vrot.slane %v565_v38, 1 }
  0x9c   : > { %663 = vrot.lane.b32.xlu0 %v621_v17, %s2123_s21 }
  0x9d   : > { %v2462_v61 = vpop.permute.xlu1 %755  ;;  %v560_v25 = vrot.slane %v558_v15, 1 }
  0x9e   : > { %v2467_v63 = vpop.permute.xlu0 %739  ;;  %v1042_v20 = vsel %vm1024_vm4, %v1009_v55, %v2462_v61 }
  0x9f   : > { %681 = vrot.lane.b32.xlu1 %v648_v52, %s2123_s21  ;;  %v2498_v30 = vsel %vm381_vm1, %v556_v24, %v560_v25  ;;  %v993_v24 = vsel %vm991_vm5, %v960_v4, %v2421_v36  ;;  %v945_v36 = vsel %vm925_vm2, %v2177_v0, %v2449_v56  ;;  %v929_v0 = vsel %vm925_vm2, %v2180_v1, %v2441_v53 }
  0xa0   : > { %665 = vrot.lane.b32.xlu0 %v2444_v54, %s2123_s21  ;;  %v1026_v61 = vsel %vm1024_vm4, %v993_v24, %v2467_v63  ;;  %v568_v4 = vor.u32 %v567_v41, %v563_v27  ;;  %v962_v53 = vsel %vm958_vm3, %v929_v0, %v2436_v47 }
  0xa1   : > { %v2474_v6 = vpop.permute.xlu1 %757 }
  0xa2   : > { %v2478_v9 = vpop.permute.xlu0 %741 }
  0xa3   : > { %716 = vrot.lane.b32.xlu1 %v2393_v16, %s2122_s20 }
  0xa4   : > { %700 = vrot.lane.b32.xlu0 %v2398_v18, %s2122_s20 }
  0xa5   : > { %v791_v17 = vpop.permute.xlu1 %790 }
  0xa6   : > { %v2486_v22 = vpop.permute.xlu0 %774  ;;  %v1075_v25 = vsel %vm1057_vm6, %v1042_v20, %v791_v17  ;;  %v476_v20 = vrot.slane %v474_v57, 1  ;;  %v2092_v57 = vld [vmem:[%s2174_s19 + $0xc0] sm:$0xff]  }
  0xa7   : > { %718 = vrot.lane.b32.xlu1 %v2459_v60, %s2122_s20  ;;  %v1059_v17 = vsel %vm1057_vm6, %v1026_v61, %v2486_v22 }
  0xa8   : > { %702 = vrot.lane.b32.xlu0 %v2465_v62, %s2122_s20 }
  0xa9   : > { %v2492_v26 = vpop.permute.xlu1 %792 }
  0xaa   : > { %v2494_v29 = vpop.permute.xlu0 %776 }
  0xab   : > { %763 = vrot.lane.b32.xlu1 %v549_v35, %s2125_s25 }
  0xac   : > { %747 = vrot.lane.b32.xlu0 %v453_v37, %s2125_s25  ;;  %v625_v37 = vrot.slane %v2465_v62, 1 }
  0xad   : > { %v828_v31 = vpop.permute.xlu1 %827 }
  0xae   : > { %v812_v33 = vpop.permute.xlu0 %811  ;;  %v2530_v11 = vsel %vm606_vm0, %v625_v37, %v626_v44  ;;  %v1108_v28 = vsel %vm1090_vm7, %v1075_v25, %v828_v31 }
  0xaf   : > { %765 = vrot.lane.b32.xlu1 %v2498_v30, %s2125_s25  ;;  %v1092_v31 = vsel %vm1090_vm7, %v1059_v17, %v812_v33  ;;  %v978_v33 = vsel %vm958_vm3, %v945_v36, %v2433_v43 }
  0xb0   : > { %749 = vrot.lane.b32.xlu0 %v2502_v32, %s2125_s25  ;;  %v1011_v55 = vsel %vm991_vm5, %v978_v33, %v2453_v58  ;;  %v730_v33 = vshll.u32 %v2092_v57, 16 }
  0xb1   : > { %v2509_v35 = vpop.permute.xlu1 %829  ;;  %v1044_v43 = vsel %vm1024_vm4, %v1011_v55, %v2474_v6 }
  0xb2   : > { %v2514_v5 = vpop.permute.xlu0 %813  ;;  %v1077_v58 = vsel %vm1057_vm6, %v1044_v43, %v2492_v26 }
  0xb3   : > { %798 = vrot.lane.b32.xlu1 %v648_v52, %s2126_s28  ;;  %v2533_v52 = vld [vmem:[%s2174_s19 + $0x54] sm:$0xff]   ;;  %v1110_v47 = vsel %vm1090_vm7, %v1077_v58, %v2509_v35 }
  0xb4   : > { %782 = vrot.lane.b32.xlu0 %v2444_v54, %s2126_s28  ;;  %v2540_v54 = vld [vmem:[%s2174_s19 + $0xbc] ss:$0 sps:$4 sm:$0x11]   ;;  %v469_v21 = vshll.u32 %v2533_v52, 16  ;;  %v467_v63 = vshrl.u32 %v2533_v52, 16  ;;  %v628_v17 = vrot.slane %v2533_v52, 1 }
  0xb5   : > { %v875_v7 = vpop.permute.xlu1 %874  ;;  %v570_v42 = vshll.u32 %v2540_v54, 16 }
  0xb6   : > { %v859_v15 = vpop.permute.xlu0 %858  ;;  %v1141_v37 = vsel %vm1123_vm8, %v1108_v28, %v875_v7  ;;  %v471_v10 = vrot.slane %v469_v21, 1  ;;  %v995_v21 = vsel %vm991_vm5, %v962_v53, %v2455_v59 }
  0xb7   : > { %800 = vrot.lane.b32.xlu1 %v2518_v3, %s2126_s28  ;;  %v1125_v56 = vsel %vm1123_vm8, %v1092_v31, %v859_v15  ;;  %v572_v38 = vrot.slane %v570_v42, 1  ;;  %v1028_v25 = vsel %vm1024_vm4, %v995_v21, %v2478_v9  ;;  %v653_v42 = vrot.slane %v2540_v54, 1 }
  0xb8   : > { %784 = vrot.lane.b32.xlu0 %v2530_v11, %s2126_s28  ;;  %v472_v15 = vor.u32 %v471_v10, %v467_v63  ;;  %v1061_v27 = vsel %vm1057_vm6, %v1028_v25, %v2494_v29 }
  0xb9   : > { %v877_v19 = vpop.permute.xlu1 %876  ;;  %v573_v6 = vsel %vm381_vm1, %v568_v4, %v572_v38  ;;  %v1094_v61 = vsel %vm1090_vm7, %v1061_v27, %v2514_v5  ;;  %v732_v38 = vrot.slane %v730_v33, 1  ;;  %v771_v27 = vrot.slane %v2092_v57, 1 }
  0xba   : > { %v861_v34 = vpop.permute.xlu0 %860  ;;  %v1143_v59 = vsel %vm1123_vm8, %v1110_v47, %v877_v19  ;;  %v477_v9 = vsel %vm381_vm1, %v472_v15, %v476_v20 }
  0xbb   : > { %835 = vrot.lane.b32.xlu1 %v2459_v60, %s2127_s8  ;;  %v1127_v35 = vsel %vm1123_vm8, %v1094_v61, %v861_v34  ;;  %v652_v34 = vrot.slane %v2521_v8, 1  ;;  %v2695_v61 = vld [vmem:[%s2174_s19 + $0xcc] sm:$0xff]  }
  0xbc   : > { %819 = vrot.lane.b32.xlu0 %v2465_v62, %s2127_s8 }
  0xbd   : > { %v910_v44 = vpop.permute.xlu1 %909  ;;  %v654_v63 = vsel %vm606_vm0, %v652_v34, %v653_v42  ;;  %v849_v34 = vshll.u32 %v2695_v61, 16 }
  0xbe   : > { %v1174_v45 = vsel %vm1156_vm9, %v1141_v37, %v910_v44  ;;  %v894_v22 = vpop.permute.xlu0 %893  ;;  %v629_v37 = vrot.slane %v2550_v40, 1 }
  0xbf   : > { %837 = vrot.lane.b32.xlu1 %v2521_v8, %s2127_s8  ;;  %1987 = vmatprep.mubr.msk.bf16.mxu1 %vm1189_vm10, %v1174_v45  ;;  %v1158_v7 = vsel %vm1156_vm9, %v1125_v56, %v894_v22  ;;  %v2093_v22 = vld [vmem:[%s2174_s19 + $0xc8] ss:$0 sps:$4 sm:$0x11]  }
  0xc0   : > { %821 = vrot.lane.b32.xlu0 %v2533_v52, %s2127_s8  ;;  %1971 = vmatprep.mubr.msk.bf16.mxu0 %vm1189_vm10, %v1158_v7  ;;  %v630_v31 = vsel %vm606_vm0, %v628_v17, %v629_v37  ;;  %v735_v55 = vshll.u32 %v2093_v22, 16 }
  0xc1   : > { %v2590_v1 = vpop.permute.xlu1 %594 }
  0xc2   : > { %v2600_v24 = vpop.permute.xlu0 %578  ;;  %v737_v15 = vrot.slane %v735_v55, 1 }
  0xc3   : > { %882 = vrot.lane.b32.xlu1 %v2498_v30, %s2128_s17  ;;  %v931_v42 = vsel %vm925_vm2, %v2231_v46, %v2600_v24  ;;  %v847_v46 = vshrl.u32 %v2695_v61, 16 }
  0xc4   : > { %866 = vrot.lane.b32.xlu0 %v2502_v32, %s2128_s17 }
  0xc5   : > { %v912_v26 = vpop.permute.xlu1 %911 }
  0xc6   : > { %v1176_v28 = vsel %vm1156_vm9, %v1143_v59, %v912_v26  ;;  %v896_v41 = vpop.permute.xlu0 %895 }
  0xc7   : > { %884 = vrot.lane.b32.xlu1 %v573_v6, %s2128_s17  ;;  %1988 = vmatmul.mubr.msk.bf16.vlgmr.msra.gmra.mrb[0].mxu1 %vm1189_vm10, %v1176_v28  ;;  %v1160_v29 = vsel %vm1156_vm9, %v1127_v35, %v896_v41 }
  0xc8   : > { %868 = vrot.lane.b32.xlu0 %v477_v9, %s2128_s17  ;;  %1972 = vmatmul.mubr.msk.bf16.vlgmr.msra.gmra.mrb[0].mxu0 %vm1189_vm10, %v1160_v29  ;;  %v2705_v29 = vld [vmem:[%s2174_s19 + $0xd4] ss:$0 sps:$4 sm:$0x11]  }
  0xc9   : > { %v2624_v19 = vpop.permute.xlu1 %596  ;;  %v854_v33 = vshll.u32 %v2705_v29, 16 }
  0xca   : > { %v2626_v5 = vpop.permute.xlu0 %580 }
  0xcb   : > { %917 = vrot.lane.b32.xlu1 %v2518_v3, %s2129_s24 }
  0xcc   : > { %901 = vrot.lane.b32.xlu0 %v2530_v11, %s2129_s24 }
  0xcd   : > { %v676_v36 = vpop.permute.xlu1 %675 }
  0xce   : > { %v2636_v44 = vpop.permute.xlu0 %659 }
  0xcf   : > { %602 = vrot.lane.b32.xlu1 %v2498_v30, %s2124_s22 }
  0xd0   : > { %586 = vrot.lane.b32.xlu0 %v2502_v32, %s2124_s22 }
  0xd1   : > { %v2643_v54 = vpop.permute.xlu1 %677 }
  0xd2   : > { %v2646_v45 = vpop.permute.xlu0 %661 }
  0xd3   : > { %919 = vrot.lane.b32.xlu1 %v654_v63, %s2129_s24 }
  0xd4   : > { %903 = vrot.lane.b32.xlu0 %v630_v31, %s2129_s24 }
  0xd5   : > { %v713_v40 = vpop.permute.xlu1 %712 }
  0xd6   : > { %v697_v10 = vpop.permute.xlu0 %696 }
  0xd7   : > { %604 = vrot.lane.b32.xlu1 %v573_v6, %s2124_s22 }
  0xd8   : > { %588 = vrot.lane.b32.xlu0 %v477_v9, %s2124_s22 }
  0xd9   : > { %v2652_v30 = vpop.permute.xlu1 %714 }
  0xda   : > { %v2654_v32 = vpop.permute.xlu0 %698 }
  0xdb   : > { %683 = vrot.lane.b32.xlu1 %v2518_v3, %s2123_s21  ;;  %v728_v3 = vshrl.u32 %v2092_v57, 16 }
  0xdc   : > { %667 = vrot.lane.b32.xlu0 %v2530_v11, %s2123_s21 }
  0xdd   : > { %v760_v0 = vpop.permute.xlu1 %759  ;;  %v733_v43 = vor.u32 %v732_v38, %v728_v3  ;;  %v2096_v3 = vld [vmem:[%s2174_s19 + $0x60] sm:$0xff]  }
  0xde   : > { %v744_v56 = vpop.permute.xlu0 %743 }
  0xdf   : > { %685 = vrot.lane.b32.xlu1 %v654_v63, %s2123_s21  ;;  %v2681_v58 = vsel %vm381_vm1, %v733_v43, %v737_v15 }
  0xe0   : > { %669 = vrot.lane.b32.xlu0 %v630_v31, %s2123_s21  ;;  %s1898_s21 = sshll.u32 %s2992_s12, 7 }
  0xe1   : > { %v2664_v7 = vpop.permute.xlu1 %761 }
  0xe2   : > { %v2666_v4 = vpop.permute.xlu0 %745 }
  0xe3   : > { %720 = vrot.lane.b32.xlu1 %v2521_v8, %s2122_s20 }
  0xe4   : > { %704 = vrot.lane.b32.xlu0 %v2533_v52, %s2122_s20 }
  0xe5   : > { %v795_v11 = vpop.permute.xlu1 %794 }
  0xe6   : > { %v779_v53 = vpop.permute.xlu0 %778 }
  0xe7   : > { %722 = vrot.lane.b32.xlu1 %v2092_v57, %s2122_s20 }
  0xe8   : > { %706 = vrot.lane.b32.xlu0 %v2187_v2, %s2122_s20  ;;  %v772_v2 = vrot.slane %v2093_v22, 1  ;;  %v851_v22 = vrot.slane %v849_v34, 1  ;;  %v891_v34 = vrot.slane %v2705_v29, 1 }
  0xe9   : > { %v2675_v20 = vpop.permute.xlu1 %796 }
  0xea   : > { %v2677_v21 = vpop.permute.xlu0 %780  ;;  %v852_v15 = vor.u32 %v851_v22, %v847_v46 }
  0xeb   : > { %767 = vrot.lane.b32.xlu1 %v573_v6, %s2125_s25  ;;  %v2692_v6 = vsel %vm606_vm0, %v771_v27, %v772_v2 }
  0xec   : > { %751 = vrot.lane.b32.xlu0 %v477_v9, %s2125_s25  ;;  %v947_v9 = vsel %vm925_vm2, %v2224_v39, %v2590_v1  ;;  %v964_v1 = vsel %vm958_vm3, %v931_v42, %v2636_v44 }
  0xed   : > { %v832_v25 = vpop.permute.xlu1 %831  ;;  %v980_v41 = vsel %vm958_vm3, %v947_v9, %v676_v36  ;;  %v997_v37 = vsel %vm991_vm5, %v964_v1, %v697_v10 }
  0xee   : > { %v816_v47 = vpop.permute.xlu0 %815  ;;  %v1013_v17 = vsel %vm991_vm5, %v980_v41, %v713_v40  ;;  %v1030_v24 = vsel %vm1024_vm4, %v997_v37, %v744_v56  ;;  %v949_v56 = vsel %vm925_vm2, %v2277_v13, %v2624_v19  ;;  %v2097_v19 = vld [vmem:[%s2174_s19 + $0x6c] sm:$0xff]  }
  0xef   : > { %769 = vrot.lane.b32.xlu1 %v2681_v58, %s2125_s25  ;;  %v1046_v36 = vsel %vm1024_vm4, %v1013_v17, %v760_v0  ;;  %v1063_v44 = vsel %vm1057_vm6, %v1030_v24, %v779_v53  ;;  %v982_v53 = vsel %vm958_vm3, %v949_v56, %v2643_v54 }
  0xf0   : > { %753 = vrot.lane.b32.xlu0 %v2241_v51, %s2125_s25  ;;  %v1015_v13 = vsel %vm991_vm5, %v982_v53, %v2652_v30  ;;  %s2882_s25 = scalar_lea.vmem %s2986_s3, %s1898_s21 }
  0xf1   : > { %v834_v59 = vpop.permute.xlu1 %833  ;;  %v1048_v2 = vsel %vm1024_vm4, %v1015_v13, %v2664_v7 }
  0xf2   : > { %v2688_v26 = vpop.permute.xlu0 %817 }
  0xf3   : > { %802 = vrot.lane.b32.xlu1 %v654_v63, %s2126_s28  ;;  %v1079_v63 = vsel %vm1057_vm6, %v1046_v36, %v795_v11 }
  0xf4   : > { %786 = vrot.lane.b32.xlu0 %v630_v31, %s2126_s28  ;;  %v1112_v40 = vsel %vm1090_vm7, %v1079_v63, %v832_v25  ;;  %v856_v25 = vrot.slane %v854_v33, 1 }
  0xf5   : > { %v879_v28 = vpop.permute.xlu1 %878 }
  0xf6   : > { %v863_v35 = vpop.permute.xlu0 %862  ;;  %v1145_v0 = vsel %vm1123_vm8, %v1112_v40, %v879_v28 }
  0xf7   : > { %804 = vrot.lane.b32.xlu1 %v2692_v6, %s2126_s28 }
  0xf8   : > { %788 = vrot.lane.b32.xlu0 %v2200_v12, %s2126_s28 }
  0xf9   : > { %v881_v39 = vpop.permute.xlu1 %880 }
  0xfa   : > { %v865_v31 = vpop.permute.xlu0 %864 }
  0xfb   : > { %839 = vrot.lane.b32.xlu1 %v2092_v57, %s2127_s8  ;;  %v1096_v57 = vsel %vm1090_vm7, %v1063_v44, %v816_v47  ;;  %v933_v47 = vsel %vm925_vm2, %v2280_v14, %v2626_v5  ;;  %v1081_v14 = vsel %vm1057_vm6, %v1048_v2, %v2675_v20 }
  0xfc   : > { %823 = vrot.lane.b32.xlu0 %v2096_v3, %s2127_s8  ;;  %v1129_v55 = vsel %vm1123_vm8, %v1096_v57, %v863_v35  ;;  %v966_v54 = vsel %vm958_vm3, %v933_v47, %v2646_v45  ;;  %v1114_v9 = vsel %vm1090_vm7, %v1081_v14, %v834_v59  ;;  %v857_v45 = vsel %vm381_vm1, %v852_v15, %v856_v25 }
  0xfd   : > { %v914_v10 = vpop.permute.xlu1 %913  ;;  %v999_v28 = vsel %vm991_vm5, %v966_v54, %v2654_v32  ;;  %v1147_v35 = vsel %vm1123_vm8, %v1114_v9, %v881_v39  ;;  %v890_v59 = vrot.slane %v2695_v61, 1 }
  0xfe   : > { %v1178_v38 = vsel %vm1156_vm9, %v1145_v0, %v914_v10  ;;  %v898_v11 = vpop.permute.xlu0 %897  ;;  %v1032_v30 = vsel %vm1024_vm4, %v999_v28, %v2666_v4 }
  0xff   : > { %841 = vrot.lane.b32.xlu1 %v2695_v61, %s2127_s8  ;;  %1991 = vmatprep.mubr.msk.bf16.mxu1 %vm1189_vm10, %v1178_v38  ;;  %v1162_v43 = vsel %vm1156_vm9, %v1129_v55, %v898_v11  ;;  %v1065_v7 = vsel %vm1057_vm6, %v1032_v30, %v2677_v21  ;;  %v892_v42 = vsel %vm606_vm0, %v890_v59, %v891_v34 }
 0x100   : > { %825 = vrot.lane.b32.xlu0 %v2097_v19, %s2127_s8  ;;  %1975 = vmatprep.mubr.msk.bf16.mxu0 %vm1189_vm10, %v1162_v43  ;;  %v1098_v20 = vsel %vm1090_vm7, %v1065_v7, %v2688_v26 }
 0x101   : > { %v599_v27 = vpop.permute.xlu1 %598  ;;  %v1131_v4 = vsel %vm1123_vm8, %v1098_v20, %v865_v31 }
 0x102   : > { %v583_v5 = vpop.permute.xlu0 %582 }
 0x103   : > { %886 = vrot.lane.b32.xlu1 %v2681_v58, %s2128_s17  ;;  %v935_v56 = vsel %vm925_vm2, %v2364_v50, %v583_v5 }
 0x104   : > { %870 = vrot.lane.b32.xlu0 %v2241_v51, %s2128_s17 }
 0x105   : > { %v916_v32 = vpop.permute.xlu1 %915 }
 0x106   : > { %v1180_v58 = vsel %vm1156_vm9, %v1147_v35, %v916_v32  ;;  %v900_v41 = vpop.permute.xlu0 %899 }
 0x107   : > { %888 = vrot.lane.b32.xlu1 %v857_v45, %s2128_s17  ;;  %1992 = vmatmul.mubr.msk.bf16.gmra.mrb[4].mxu1 %vm1189_vm10, %v1180_v58  ;;  %v1164_v21 = vsel %vm1156_vm9, %v1131_v4, %v900_v41 }
 0x108   : > { %872 = vrot.lane.b32.xlu0 %v2236_v48, %s2128_s17  ;;  %1976 = vmatmul.mubr.msk.bf16.gmra.mrb[4].mxu0 %vm1189_vm10, %v1164_v21 }
 0x109   : > { %v601_v51 = vpop.permute.xlu1 %600 }
 0x10a   : > { %v585_v26 = vpop.permute.xlu0 %584  ;;  %v953_v28 = vsel %vm925_vm2, %v2393_v16, %v601_v51 }
 0x10b   : > { %921 = vrot.lane.b32.xlu1 %v2692_v6, %s2129_s24  ;;  %v937_v45 = vsel %vm925_vm2, %v2398_v18, %v585_v26 }
 0x10c   : > { %905 = vrot.lane.b32.xlu0 %v2200_v12, %s2129_s24 }
 0x10d   : > { %v680_v17 = vpop.permute.xlu1 %679 }
 0x10e   : > { %v664_v39 = vpop.permute.xlu0 %663 }
 0x10f   : > { %923 = vrot.lane.b32.xlu1 %v892_v42, %s2129_s24  ;;  %v968_v53 = vsel %vm958_vm3, %v935_v56, %v664_v39 }
 0x110   : > { %907 = vrot.lane.b32.xlu0 %v2212_v23, %s2129_s24  ;;  %v951_v23 = vsel %vm925_vm2, %v2359_v49, %v599_v27 }
 0x111   : > { %v682_v48 = vpop.permute.xlu1 %681  ;;  %v984_v38 = vsel %vm958_vm3, %v951_v23, %v680_v17 }
 0x112   : > { %v666_v61 = vpop.permute.xlu0 %665  ;;  %v986_v30 = vsel %vm958_vm3, %v953_v28, %v682_v48 }
 0x113   : > { %v970_v32 = vsel %vm958_vm3, %v937_v45, %v666_v61 }
 0x115   : > { %v717_v29 = vpop.permute.xlu1 %716 }
 0x116   : > { %v701_v1 = vpop.permute.xlu0 %700  ;;  %v1017_v55 = vsel %vm991_vm5, %v984_v38, %v717_v29 }
 0x117   : > { %v1001_v15 = vsel %vm991_vm5, %v968_v53, %v701_v1 }
 0x119   : > { %v719_v36 = vpop.permute.xlu1 %718 }
 0x11a   : > { %v703_v37 = vpop.permute.xlu0 %702  ;;  %v1019_v7 = vsel %vm991_vm5, %v986_v30, %v719_v36 }
 0x11b   : > { %v1003_v20 = vsel %vm991_vm5, %v970_v32, %v703_v37 }
 0x11d   : > { %v764_v63 = vpop.permute.xlu1 %763 }
 0x11e   : > { %v748_v6 = vpop.permute.xlu0 %747  ;;  %v1050_v43 = vsel %vm1024_vm4, %v1017_v55, %v764_v63 }
 0x11f   : > { %v1034_v49 = vsel %vm1024_vm4, %v1001_v15, %v748_v6 }
 0x121   : > { %v766_v31 = vpop.permute.xlu1 %765 }
 0x122   : > { %v750_v46 = vpop.permute.xlu0 %749  ;;  %v1052_v16 = vsel %vm1024_vm4, %v1019_v7, %v766_v31 }
 0x123   : > { %v1036_v41 = vsel %vm1024_vm4, %v1003_v20, %v750_v46 }
 0x125   : > { %v799_v24 = vpop.permute.xlu1 %798 }
 0x126   : > { %v783_v40 = vpop.permute.xlu0 %782  ;;  %v1083_v25 = vsel %vm1057_vm6, %v1050_v43, %v799_v24 }
 0x127   : > { %v1067_v19 = vsel %vm1057_vm6, %v1034_v49, %v783_v40 }
 0x129   : > { %v801_v12 = vpop.permute.xlu1 %800 }
 0x12a   : > { %v785_v22 = vpop.permute.xlu0 %784  ;;  %v1085_v58 = vsel %vm1057_vm6, %v1052_v16, %v801_v12 }
 0x12b   : > { %v1069_v18 = vsel %vm1057_vm6, %v1036_v41, %v785_v22 }
 0x12d   : > { %v836_v33 = vpop.permute.xlu1 %835 }
 0x12e   : > { %v820_v44 = vpop.permute.xlu0 %819  ;;  %v1116_v13 = vsel %vm1090_vm7, %v1083_v25, %v836_v33 }
 0x12f   : > { %v1100_v54 = vsel %vm1090_vm7, %v1067_v19, %v820_v44 }
 0x131   : > { %v838_v0 = vpop.permute.xlu1 %837 }
 0x132   : > { %v822_v3 = vpop.permute.xlu0 %821  ;;  %v1118_v21 = vsel %vm1090_vm7, %v1085_v58, %v838_v0 }
 0x133   : > { %v1102_v51 = vsel %vm1090_vm7, %v1069_v18, %v822_v3 }
 0x135   : > { %v883_v10 = vpop.permute.xlu1 %882 }
 0x136   : > { %v867_v57 = vpop.permute.xlu0 %866  ;;  %v1149_v50 = vsel %vm1123_vm8, %v1116_v13, %v883_v10 }
 0x137   : > { %v1133_v14 = vsel %vm1123_vm8, %v1100_v54, %v867_v57 }
 0x139   : > { %v885_v11 = vpop.permute.xlu1 %884 }
 0x13a   : > { %v869_v47 = vpop.permute.xlu0 %868  ;;  %v1151_v59 = vsel %vm1123_vm8, %v1118_v21, %v885_v11 }
 0x13b   : > { %v1135_v42 = vsel %vm1123_vm8, %v1102_v51, %v869_v47 }
 0x13d   : > { %v918_v27 = vpop.permute.xlu1 %917 }
 0x13e   : > { %v1182_v2 = vsel %vm1156_vm9, %v1149_v50, %v918_v27  ;;  %v902_v5 = vpop.permute.xlu0 %901 }
 0x13f   : > { %1995 = vmatprep.mubr.msk.bf16.mxu1 %vm1189_vm10, %v1182_v2  ;;  %v1166_v9 = vsel %vm1156_vm9, %v1133_v14, %v902_v5 }
 0x140   : > { %1979 = vmatprep.mubr.msk.bf16.mxu0 %vm1189_vm10, %v1166_v9 }
 0x141   : > { %v603_v35 = vpop.permute.xlu1 %602 }
 0x142   : > { %v587_v4 = vpop.permute.xlu0 %586  ;;  %v955_v55 = vsel %vm925_vm2, %v2459_v60, %v603_v35 }
 0x143   : > { %v939_v43 = vsel %vm925_vm2, %v2465_v62, %v587_v4 }
 0x145   : > { %v920_v34 = vpop.permute.xlu1 %919 }
 0x146   : > { %v1184_v26 = vsel %vm1156_vm9, %v1151_v59, %v920_v34  ;;  %v904_v17 = vpop.permute.xlu0 %903 }
 0x147   : > { %1996 = vmatmul.mubr.msk.bf16.gmra.mrb[8].mxu1 %vm1189_vm10, %v1184_v26  ;;  %v1168_v39 = vsel %vm1156_vm9, %v1135_v42, %v904_v17  ;;  %v2870_v17 = vld [vmem:[%s2985_s2] ss:$0 sm:$0xff] }
 0x148   : > { %1980 = vmatmul.mubr.msk.bf16.gmra.mrb[8].mxu0 %vm1189_vm10, %v1168_v39 }
 0x149   : > { %v605_v48 = vpop.permute.xlu1 %604 }
 0x14a   : > { %v589_v61 = vpop.permute.xlu0 %588  ;;  %v957_v13 = vsel %vm925_vm2, %v2521_v8, %v605_v48 }
 0x14b   : > { %v941_v2 = vsel %vm925_vm2, %v2533_v52, %v589_v61 }
 0x14d   : > { %v684_v29 = vpop.permute.xlu1 %683 }
 0x14e   : > { %v668_v1 = vpop.permute.xlu0 %667  ;;  %v988_v53 = vsel %vm958_vm3, %v955_v55, %v684_v29 }
 0x14f   : > { %v972_v47 = vsel %vm958_vm3, %v939_v43, %v668_v1 }
 0x151   : > { %v686_v36 = vpop.permute.xlu1 %685 }
 0x152   : > { %v670_v37 = vpop.permute.xlu0 %669  ;;  %v990_v27 = vsel %vm958_vm3, %v957_v13, %v686_v36 }
 0x153   : > { %v974_v30 = vsel %vm958_vm3, %v941_v2, %v670_v37 }
 0x155   : > { %v721_v63 = vpop.permute.xlu1 %720 }
 0x156   : > { %v705_v6 = vpop.permute.xlu0 %704  ;;  %v1021_v15 = vsel %vm991_vm5, %v988_v53, %v721_v63 }
 0x157   : > { %v1005_v19 = vsel %vm991_vm5, %v972_v47, %v705_v6 }
 0x159   : > { %v723_v31 = vpop.permute.xlu1 %722 }
 0x15a   : > { %v707_v46 = vpop.permute.xlu0 %706  ;;  %v1023_v28 = vsel %vm991_vm5, %v990_v27, %v723_v31 }
 0x15b   : > { %v1007_v35 = vsel %vm991_vm5, %v974_v30, %v707_v46 }
 0x15d   : > { %v768_v24 = vpop.permute.xlu1 %767 }
 0x15e   : > { %v752_v40 = vpop.permute.xlu0 %751  ;;  %v1054_v49 = vsel %vm1024_vm4, %v1021_v15, %v768_v24 }
 0x15f   : > { %v1038_v54 = vsel %vm1024_vm4, %v1005_v19, %v752_v40 }
 0x161   : > { %v770_v12 = vpop.permute.xlu1 %769 }
 0x162   : > { %v754_v22 = vpop.permute.xlu0 %753  ;;  %v1056_v9 = vsel %vm1024_vm4, %v1023_v28, %v770_v12 }
 0x163   : > { %v1040_v20 = vsel %vm1024_vm4, %v1007_v35, %v754_v22 }
 0x165   : > { %v803_v33 = vpop.permute.xlu1 %802 }
 0x166   : > { %v787_v44 = vpop.permute.xlu0 %786  ;;  %v1087_v60 = vsel %vm1057_vm6, %v1054_v49, %v803_v33 }
 0x167   : > { %v1071_v14 = vsel %vm1057_vm6, %v1038_v54, %v787_v44 }
 0x169   : > { %v805_v0 = vpop.permute.xlu1 %804 }
 0x16a   : > { %v789_v3 = vpop.permute.xlu0 %788  ;;  %v1089_v32 = vsel %vm1057_vm6, %v1056_v9, %v805_v0 }
 0x16b   : > { %v1073_v41 = vsel %vm1057_vm6, %v1040_v20, %v789_v3 }
 0x16d   : > { %v840_v10 = vpop.permute.xlu1 %839 }
 0x16e   : > { %v824_v23 = vpop.permute.xlu0 %823  ;;  %v1120_v62 = vsel %vm1090_vm7, %v1087_v60, %v840_v10 }
 0x16f   : > { %v1104_v45 = vsel %vm1090_vm7, %v1071_v14, %v824_v23 }
 0x171   : > { %v842_v57 = vpop.permute.xlu1 %841 }
 0x172   : > { %v826_v38 = vpop.permute.xlu0 %825  ;;  %v1122_v58 = vsel %vm1090_vm7, %v1089_v32, %v842_v57 }
 0x173   : > { %v1106_v59 = vsel %vm1090_vm7, %v1073_v41, %v826_v38 }
 0x175   : > { %v887_v56 = vpop.permute.xlu1 %886 }
 0x176   : > { %v871_v11 = vpop.permute.xlu0 %870  ;;  %v1153_v8 = vsel %vm1123_vm8, %v1120_v62, %v887_v56 }
 0x177   : > { %v1137_v52 = vsel %vm1123_vm8, %v1104_v45, %v871_v11 }
 0x179   : > { %v889_v25 = vpop.permute.xlu1 %888 }
 0x17a   : > { %v873_v50 = vpop.permute.xlu0 %872  ;;  %v1155_v21 = vsel %vm1123_vm8, %v1122_v58, %v889_v25 }
 0x17b   : > { %v1139_v51 = vsel %vm1123_vm8, %v1106_v59, %v873_v50 }
 0x17d   : > { %v922_v5 = vpop.permute.xlu1 %921 }
 0x17e   : > { %v1186_v7 = vsel %vm1156_vm9, %v1153_v8, %v922_v5  ;;  %v906_v16 = vpop.permute.xlu0 %905 }
 0x17f   : > { %1999 = vmatprep.mubr.msk.bf16.mxu1 %vm1189_vm10, %v1186_v7  ;;  %v1170_v4 = vsel %vm1156_vm9, %v1137_v52, %v906_v16 }
 0x180   : > { %1983 = vmatprep.mubr.msk.bf16.mxu0 %vm1189_vm10, %v1170_v4 }
 0x181   : > { %v924_v18 = vpop.permute.xlu1 %923 }
 0x182   : > { %v1188_v34 = vsel %vm1156_vm9, %v1155_v21, %v924_v18  ;;  %v908_v26 = vpop.permute.xlu0 %907 }
 0x183   : > { %2000 = vmatmul.mubr.msk.bf16.gmra.mrb[12].mxu1 %vm1189_vm10, %v1188_v34  ;;  %v1172_v42 = vsel %vm1156_vm9, %v1139_v51, %v908_v26 }
 0x184   : > { %1984 = vmatmul.mubr.msk.bf16.gmra.mrb[12].mxu0 %vm1189_vm10, %v1172_v42 }
 0x19a   : > { %v1989_v39 = vpop.f32.mrb[0].mxu1 }
 0x19b   : > { %v1401_v48 = vadd.f32 %v1989_v39, %v2870_v17  ;;  %v1392_v61 = vpop.f32.mrb[1].mxu1  ;;  %v1973_v29 = vpop.f32.mrb[0].mxu0 }
 0x19c   : > { %v1393_v1 = vadd.f32 %v2870_v17, %v1392_v61  ;;  %v1990_v36 = vpop.f32.mrb[2].mxu1  ;;  %v1337_v37 = vadd.f32 %v1973_v29, %v2870_v17  ;;  %v1328_v6 = vpop.f32.mrb[1].mxu0 }
 0x19d   : > { %vm1473_vm12 = vcmp.ge.f32.partialorder %v1401_v48, 0.0  ;;  %v1505_v63 = vmul.f32 0.1, %v1401_v48  ;;  %v1404_v31 = vadd.f32 %v1990_v36, %v2870_v17  ;;  %v1395_v46 = vpop.f32.mrb[3].mxu1  ;;  %v1329_v24 = vadd.f32 %v2870_v17, %v1328_v6  ;;  %v1974_v12 = vpop.f32.mrb[2].mxu0 }
 0x19e   : > { %vm1471_vm13 = vcmp.ge.f32.partialorder %v1393_v1, 0.0  ;;  %v1503_v40 = vmul.f32 0.1, %v1393_v1  ;;  %v1396_v22 = vadd.f32 %v2870_v17, %v1395_v46  ;;  %vm1457_vm14 = vcmp.ge.f32.partialorder %v1337_v37, 0.0  ;;  %v1331_v3 = vpop.f32.mrb[3].mxu0 }
 0x19f   : > { %v1489_v33 = vmul.f32 0.1, %v1337_v37  ;;  %v1537_v44 = vsel %vm1473_vm12, %v1401_v48, %v1505_v63  ;;  %v1340_v0 = vadd.f32 %v1974_v12, %v2870_v17  ;;  %vm1455_vm15 = vcmp.ge.f32.partialorder %v1329_v24, 0.0 }
 0x1a0   : > { %v1917_v10 = vpack.c.bf16 %v1537_v44, %v1537_v44  ;;  %v1487_v23 = vmul.f32 0.1, %v1329_v24  ;;  %v1535_v57 = vsel %vm1471_vm13, %v1393_v1, %v1503_v40  ;;  %vm1474_vm1 = vcmp.ge.f32.partialorder %v1404_v31, 0.0 }
 0x1a1   : > { %v1521_v38 = vsel %vm1457_vm14, %v1337_v37, %v1489_v33  ;;  %v1915_v56 = vpack.c.bf16 %v1535_v57, %v1535_v57  ;;  %vm1458_vm0 = vcmp.ge.f32.partialorder %v1340_v0, 0.0  ;;  %v1490_v55 = vmul.f32 0.1, %v1340_v0 }
 0x1a2   : > { %v1901_v11 = vpack.c.bf16 %v1521_v38, %v1521_v38  ;;  %1698 = vst.msk [vmem:[%s2882_s25 + $0x48] sm:$0xf] %vm1679_vm11, %v1917_v10  ;;  %v1519_v53 = vsel %vm1455_vm15, %v1329_v24, %v1487_v23  ;;  %v1506_v43 = vmul.f32 0.1, %v1404_v31  ;;  %v1332_v47 = vadd.f32 %v2870_v17, %v1331_v3 }
 0x1a3   : > { %v1899_v15 = vpack.c.bf16 %v1519_v53, %v1519_v53  ;;  %1696 = vst.msk [vmem:[%s2882_s25 + $0x40] sm:$0xf] %vm1679_vm11, %v1915_v56  ;;  %v1522_v25 = vsel %vm1458_vm0, %v1340_v0, %v1490_v55  ;;  %vm1472_vm2 = vcmp.ge.f32.partialorder %v1396_v22, 0.0  ;;  %v1504_v19 = vmul.f32 0.1, %v1396_v22 }
 0x1a4   : > { %1682 = vst.msk [vmem:[%s2882_s25 + $0x8] sm:$0xf] %vm1679_vm11, %v1901_v11  ;;  %v1902_v49 = vpack.c.bf16 %v1522_v25, %v1522_v25  ;;  %v1538_v13 = vsel %vm1474_vm1, %v1404_v31, %v1506_v43  ;;  %vm1456_vm3 = vcmp.ge.f32.partialorder %v1332_v47, 0.0  ;;  %v1488_v50 = vmul.f32 0.1, %v1332_v47 }
 0x1a5   : > { %1680 = vst.msk [vmem:[%s2882_s25] sm:$0xf] %vm1679_vm11, %v1899_v15  ;;  %v1918_v60 = vpack.c.bf16 %v1538_v13, %v1538_v13  ;;  %v1536_v27 = vsel %vm1472_vm2, %v1396_v22, %v1504_v19 }
 0x1a6   : > { %1683 = vst.msk [vmem:[%s2882_s25 + $0xc] sm:$0xf] %vm1679_vm11, %v1902_v49  ;;  %v1520_v54 = vsel %vm1456_vm3, %v1332_v47, %v1488_v50  ;;  %v1916_v62 = vpack.c.bf16 %v1536_v27, %v1536_v27 }
 0x1a7   : > { %1699 = vst.msk [vmem:[%s2882_s25 + $0x4c] sm:$0xf] %vm1679_vm11, %v1918_v60  ;;  %v1900_v2 = vpack.c.bf16 %v1520_v54, %v1520_v54 }
 0x1a8   : > { %1697 = vst.msk [vmem:[%s2882_s25 + $0x44] sm:$0xf] %vm1679_vm11, %v1916_v62 }
 0x1a9   : > { %1681 = vst.msk [vmem:[%s2882_s25 + $0x4] sm:$0xf] %vm1679_vm11, %v1900_v2 }
 0x1da   : > { %v1993_v28 = vpop.f32.mrb[4].mxu1 }
 0x1db   : > { %v1417_v14 = vadd.f32 %v1993_v28, %v2870_v17  ;;  %v1408_v8 = vpop.f32.mrb[5].mxu1  ;;  %v1977_v5 = vpop.f32.mrb[4].mxu0 }
 0x1dc   : > { %v1409_v30 = vadd.f32 %v2870_v17, %v1408_v8  ;;  %v1994_v9 = vpop.f32.mrb[6].mxu1  ;;  %v1353_v45 = vadd.f32 %v1977_v5, %v2870_v17  ;;  %v1344_v35 = vpop.f32.mrb[5].mxu0 }
 0x1dd   : > { %vm1477_vm4 = vcmp.ge.f32.partialorder %v1417_v14, 0.0  ;;  %v1509_v7 = vmul.f32 0.1, %v1417_v14  ;;  %v1420_v32 = vadd.f32 %v1994_v9, %v2870_v17  ;;  %v1411_v52 = vpop.f32.mrb[7].mxu1  ;;  %v1345_v16 = vadd.f32 %v2870_v17, %v1344_v35  ;;  %v1978_v58 = vpop.f32.mrb[6].mxu0 }
 0x1de   : > { %vm1475_vm5 = vcmp.ge.f32.partialorder %v1409_v30, 0.0  ;;  %v1507_v20 = vmul.f32 0.1, %v1409_v30  ;;  %v1412_v4 = vadd.f32 %v2870_v17, %v1411_v52  ;;  %vm1461_vm6 = vcmp.ge.f32.partialorder %v1353_v45, 0.0  ;;  %v1347_v59 = vpop.f32.mrb[7].mxu0 }
 0x1df   : > { %v1493_v41 = vmul.f32 0.1, %v1353_v45  ;;  %v1541_v21 = vsel %vm1477_vm4, %v1417_v14, %v1509_v7  ;;  %v1356_v18 = vadd.f32 %v1978_v58, %v2870_v17  ;;  %vm1459_vm7 = vcmp.ge.f32.partialorder %v1345_v16, 0.0 }
 0x1e0   : > { %v1921_v34 = vpack.c.bf16 %v1541_v21, %v1541_v21  ;;  %v1491_v51 = vmul.f32 0.1, %v1345_v16  ;;  %v1539_v26 = vsel %vm1475_vm5, %v1409_v30, %v1507_v20  ;;  %vm1478_vm9 = vcmp.ge.f32.partialorder %v1420_v32, 0.0 }
 0x1e1   : > { %v1525_v42 = vsel %vm1461_vm6, %v1353_v45, %v1493_v41  ;;  %v1919_v39 = vpack.c.bf16 %v1539_v26, %v1539_v26  ;;  %vm1462_vm8 = vcmp.ge.f32.partialorder %v1356_v18, 0.0  ;;  %v1494_v48 = vmul.f32 0.1, %v1356_v18 }
 0x1e2   : > { %v1905_v61 = vpack.c.bf16 %v1525_v42, %v1525_v42  ;;  %1702 = vst.msk [vmem:[%s2882_s25 + $0x58] sm:$0xf] %vm1679_vm11, %v1921_v34  ;;  %v1523_v29 = vsel %vm1459_vm7, %v1345_v16, %v1491_v51  ;;  %v1510_v1 = vmul.f32 0.1, %v1420_v32  ;;  %v1348_v63 = vadd.f32 %v2870_v17, %v1347_v59 }
 0x1e3   : > { %v1903_v36 = vpack.c.bf16 %v1523_v29, %v1523_v29  ;;  %1700 = vst.msk [vmem:[%s2882_s25 + $0x50] sm:$0xf] %vm1679_vm11, %v1919_v39  ;;  %v1526_v37 = vsel %vm1462_vm8, %v1356_v18, %v1494_v48  ;;  %vm1476_vm10 = vcmp.ge.f32.partialorder %v1412_v4, 0.0  ;;  %v1508_v46 = vmul.f32 0.1, %v1412_v4 }
 0x1e4   : > { %1686 = vst.msk [vmem:[%s2882_s25 + $0x18] sm:$0xf] %vm1679_vm11, %v1905_v61  ;;  %v1906_v6 = vpack.c.bf16 %v1526_v37, %v1526_v37  ;;  %v1542_v31 = vsel %vm1478_vm9, %v1420_v32, %v1510_v1  ;;  %vm1460_vm12 = vcmp.ge.f32.partialorder %v1348_v63, 0.0  ;;  %v1492_v40 = vmul.f32 0.1, %v1348_v63 }
 0x1e5   : > { %1684 = vst.msk [vmem:[%s2882_s25 + $0x10] sm:$0xf] %vm1679_vm11, %v1903_v36  ;;  %v1922_v24 = vpack.c.bf16 %v1542_v31, %v1542_v31  ;;  %v1540_v12 = vsel %vm1476_vm10, %v1412_v4, %v1508_v46 }
 0x1e6   : > { %1687 = vst.msk [vmem:[%s2882_s25 + $0x1c] sm:$0xf] %vm1679_vm11, %v1906_v6  ;;  %v1524_v22 = vsel %vm1460_vm12, %v1348_v63, %v1492_v40  ;;  %v1920_v33 = vpack.c.bf16 %v1540_v12, %v1540_v12 }
 0x1e7   : > { %1703 = vst.msk [vmem:[%s2882_s25 + $0x5c] sm:$0xf] %vm1679_vm11, %v1922_v24  ;;  %v1904_v44 = vpack.c.bf16 %v1524_v22, %v1524_v22 }
 0x1e8   : > { %1701 = vst.msk [vmem:[%s2882_s25 + $0x54] sm:$0xf] %vm1679_vm11, %v1920_v33 }
 0x1e9   : > { %1685 = vst.msk [vmem:[%s2882_s25 + $0x14] sm:$0xf] %vm1679_vm11, %v1904_v44 }
 0x21a   : > { %v1997_v0 = vpop.f32.mrb[8].mxu1 }
 0x21b   : > { %v1433_v3 = vadd.f32 %v1997_v0, %v2870_v17  ;;  %v1424_v10 = vpop.f32.mrb[9].mxu1  ;;  %v1981_v23 = vpop.f32.mrb[8].mxu0 }
 0x21c   : > { %v1425_v57 = vadd.f32 %v2870_v17, %v1424_v10  ;;  %v1998_v38 = vpop.f32.mrb[10].mxu1  ;;  %v1369_v56 = vadd.f32 %v1981_v23, %v2870_v17  ;;  %v1360_v11 = vpop.f32.mrb[9].mxu0 }
 0x21d   : > { %vm1481_vm13 = vcmp.ge.f32.partialorder %v1433_v3, 0.0  ;;  %v1513_v55 = vmul.f32 0.1, %v1433_v3  ;;  %v1436_v53 = vadd.f32 %v1998_v38, %v2870_v17  ;;  %v1427_v43 = vpop.f32.mrb[11].mxu1  ;;  %v1361_v15 = vadd.f32 %v2870_v17, %v1360_v11  ;;  %v1982_v47 = vpop.f32.mrb[10].mxu0 }
 0x21e   : > { %vm1479_vm14 = vcmp.ge.f32.partialorder %v1425_v57, 0.0  ;;  %v1511_v25 = vmul.f32 0.1, %v1425_v57  ;;  %v1428_v49 = vadd.f32 %v2870_v17, %v1427_v43  ;;  %vm1465_vm15 = vcmp.ge.f32.partialorder %v1369_v56, 0.0  ;;  %v1363_v50 = vpop.f32.mrb[11].mxu0 }
 0x21f   : > { %v1497_v13 = vmul.f32 0.1, %v1369_v56  ;;  %v1545_v19 = vsel %vm1481_vm13, %v1433_v3, %v1513_v55  ;;  %v1372_v60 = vadd.f32 %v1982_v47, %v2870_v17  ;;  %vm1463_vm0 = vcmp.ge.f32.partialorder %v1361_v15, 0.0 }
 0x220   : > { %v1925_v27 = vpack.c.bf16 %v1545_v19, %v1545_v19  ;;  %v1495_v54 = vmul.f32 0.1, %v1361_v15  ;;  %v1543_v62 = vsel %vm1479_vm14, %v1425_v57, %v1511_v25  ;;  %vm1482_vm2 = vcmp.ge.f32.partialorder %v1436_v53, 0.0 }
 0x221   : > { %v1529_v2 = vsel %vm1465_vm15, %v1369_v56, %v1497_v13  ;;  %v1923_v28 = vpack.c.bf16 %v1543_v62, %v1543_v62  ;;  %vm1466_vm1 = vcmp.ge.f32.partialorder %v1372_v60, 0.0  ;;  %v1498_v14 = vmul.f32 0.1, %v1372_v60 }
 0x222   : > { %v1909_v8 = vpack.c.bf16 %v1529_v2, %v1529_v2  ;;  %1706 = vst.msk [vmem:[%s2882_s25 + $0x68] sm:$0xf] %vm1679_vm11, %v1925_v27  ;;  %v1527_v5 = vsel %vm1463_vm0, %v1361_v15, %v1495_v54  ;;  %v1514_v30 = vmul.f32 0.1, %v1436_v53  ;;  %v1364_v7 = vadd.f32 %v2870_v17, %v1363_v50 }
 0x223   : > { %v1907_v9 = vpack.c.bf16 %v1527_v5, %v1527_v5  ;;  %1704 = vst.msk [vmem:[%s2882_s25 + $0x60] sm:$0xf] %vm1679_vm11, %v1923_v28  ;;  %v1530_v45 = vsel %vm1466_vm1, %v1372_v60, %v1498_v14  ;;  %vm1480_vm3 = vcmp.ge.f32.partialorder %v1428_v49, 0.0  ;;  %v1512_v52 = vmul.f32 0.1, %v1428_v49 }
 0x224   : > { %1690 = vst.msk [vmem:[%s2882_s25 + $0x28] sm:$0xf] %vm1679_vm11, %v1909_v8  ;;  %v1910_v35 = vpack.c.bf16 %v1530_v45, %v1530_v45  ;;  %v1546_v32 = vsel %vm1482_vm2, %v1436_v53, %v1514_v30  ;;  %vm1464_vm4 = vcmp.ge.f32.partialorder %v1364_v7, 0.0  ;;  %v1496_v20 = vmul.f32 0.1, %v1364_v7 }
 0x225   : > { %1688 = vst.msk [vmem:[%s2882_s25 + $0x20] sm:$0xf] %vm1679_vm11, %v1907_v9  ;;  %v1926_v16 = vpack.c.bf16 %v1546_v32, %v1546_v32  ;;  %v1544_v58 = vsel %vm1480_vm3, %v1428_v49, %v1512_v52 }
 0x226   : > { %1691 = vst.msk [vmem:[%s2882_s25 + $0x2c] sm:$0xf] %vm1679_vm11, %v1910_v35  ;;  %v1528_v4 = vsel %vm1464_vm4, %v1364_v7, %v1496_v20  ;;  %v1924_v41 = vpack.c.bf16 %v1544_v58, %v1544_v58 }
 0x227   : > { %1707 = vst.msk [vmem:[%s2882_s25 + $0x6c] sm:$0xf] %vm1679_vm11, %v1926_v16  ;;  %v1908_v21 = vpack.c.bf16 %v1528_v4, %v1528_v4 }
 0x228   : > { %1705 = vst.msk [vmem:[%s2882_s25 + $0x64] sm:$0xf] %vm1679_vm11, %v1924_v41 }
 0x229   : > { %1689 = vst.msk [vmem:[%s2882_s25 + $0x24] sm:$0xf] %vm1679_vm11, %v1908_v21 }
 0x256   : > { %v2001_v18 = vpop.f32.mrb[12].mxu1 }
 0x257   : > { %v1449_v59 = vadd.f32 %v2001_v18, %v2870_v17  ;;  %v1440_v34 = vpop.f32.mrb[13].mxu1  ;;  %v1985_v51 = vpop.f32.mrb[12].mxu0 }
 0x258   : > { %v1441_v26 = vadd.f32 %v2870_v17, %v1440_v34  ;;  %v2002_v42 = vpop.f32.mrb[14].mxu1  ;;  %v1385_v39 = vadd.f32 %v1985_v51, %v2870_v17  ;;  %v1376_v61 = vpop.f32.mrb[13].mxu0 }
 0x259   : > { %vm1485_vm5 = vcmp.ge.f32.partialorder %v1449_v59, 0.0  ;;  %v1517_v48 = vmul.f32 0.1, %v1449_v59  ;;  %v1452_v29 = vadd.f32 %v2002_v42, %v2870_v17  ;;  %v1443_v1 = vpop.f32.mrb[15].mxu1  ;;  %v1377_v36 = vadd.f32 %v2870_v17, %v1376_v61  ;;  %v1986_v63 = vpop.f32.mrb[14].mxu0 }
 0x25a   : > { %vm1483_vm6 = vcmp.ge.f32.partialorder %v1441_v26, 0.0  ;;  %v1515_v37 = vmul.f32 0.1, %v1441_v26  ;;  %v1444_v6 = vadd.f32 %v2870_v17, %v1443_v1  ;;  %vm1469_vm7 = vcmp.ge.f32.partialorder %v1385_v39, 0.0  ;;  %v1379_v40 = vpop.f32.mrb[15].mxu0 }
 0x25b   : > { %v1501_v31 = vmul.f32 0.1, %v1385_v39  ;;  %v1549_v46 = vsel %vm1485_vm5, %v1449_v59, %v1517_v48  ;;  %v1388_v24 = vadd.f32 %v1986_v63, %v2870_v17  ;;  %vm1467_vm8 = vcmp.ge.f32.partialorder %v1377_v36, 0.0 }
 0x25c   : > { %v1929_v12 = vpack.c.bf16 %v1549_v46, %v1549_v46  ;;  %v1499_v22 = vmul.f32 0.1, %v1377_v36  ;;  %v1547_v33 = vsel %vm1483_vm6, %v1441_v26, %v1515_v37  ;;  %vm1486_vm10 = vcmp.ge.f32.partialorder %v1452_v29, 0.0 }
 0x25d   : > { %v1533_v44 = vsel %vm1469_vm7, %v1385_v39, %v1501_v31  ;;  %v1927_v0 = vpack.c.bf16 %v1547_v33, %v1547_v33  ;;  %vm1470_vm9 = vcmp.ge.f32.partialorder %v1388_v24, 0.0  ;;  %v1502_v3 = vmul.f32 0.1, %v1388_v24 }
 0x25e   : > { %v1913_v10 = vpack.c.bf16 %v1533_v44, %v1533_v44  ;;  %1710 = vst.msk [vmem:[%s2882_s25 + $0x78] sm:$0xf] %vm1679_vm11, %v1929_v12  ;;  %v1531_v23 = vsel %vm1467_vm8, %v1377_v36, %v1499_v22  ;;  %v1518_v57 = vmul.f32 0.1, %v1452_v29  ;;  %v1380_v55 = vadd.f32 %v2870_v17, %v1379_v40 }
 0x25f   : > { %v1911_v38 = vpack.c.bf16 %v1531_v23, %v1531_v23  ;;  %1708 = vst.msk [vmem:[%s2882_s25 + $0x70] sm:$0xf] %vm1679_vm11, %v1927_v0  ;;  %v1534_v56 = vsel %vm1470_vm9, %v1388_v24, %v1502_v3  ;;  %vm1484_vm12 = vcmp.ge.f32.partialorder %v1444_v6, 0.0  ;;  %v1516_v43 = vmul.f32 0.1, %v1444_v6 }
 0x260   : > { %1694 = vst.msk [vmem:[%s2882_s25 + $0x38] sm:$0xf] %vm1679_vm11, %v1913_v10  ;;  %v1914_v11 = vpack.c.bf16 %v1534_v56, %v1534_v56  ;;  %v1550_v53 = vsel %vm1486_vm10, %v1452_v29, %v1518_v57  ;;  %vm1468_vm13 = vcmp.ge.f32.partialorder %v1380_v55, 0.0  ;;  %v1500_v25 = vmul.f32 0.1, %v1380_v55 }
 0x261   : > { %1692 = vst.msk [vmem:[%s2882_s25 + $0x30] sm:$0xf] %vm1679_vm11, %v1911_v38  ;;  %v1930_v15 = vpack.c.bf16 %v1550_v53, %v1550_v53  ;;  %v1548_v47 = vsel %vm1484_vm12, %v1444_v6, %v1516_v43 }
 0x262   : > { %1695 = vst.msk [vmem:[%s2882_s25 + $0x3c] sm:$0xf] %vm1679_vm11, %v1914_v11  ;;  %v1532_v49 = vsel %vm1468_vm13, %v1380_v55, %v1500_v25  ;;  %v1928_v17 = vpack.c.bf16 %v1548_v47, %v1548_v47 }
 0x263   : > { %1711 = vst.msk [vmem:[%s2882_s25 + $0x7c] sm:$0xf] %vm1679_vm11, %v1930_v15  ;;  %v1912_v13 = vpack.c.bf16 %v1532_v49, %v1532_v49 }
 0x264   : > { %1709 = vst.msk [vmem:[%s2882_s25 + $0x74] sm:$0xf] %vm1679_vm11, %v1928_v17 }
 0x265   : > { %1693 = vst.msk [vmem:[%s2882_s25 + $0x34] sm:$0xf] %vm1679_vm11, %v1912_v13 }
 0x266 PF: > { %s13_s14 = sadd.s32 1, %s2120_s14   ;;  %s2987_s12 = smov %s2116_s13 }
 0x267   : > { %p10_p5 = scmp.ge.s32.totalorder %s13_s14, 4   ;;  %s2988_s13 = smov %s2990_s15 }
 0x269   :  { %12 = sbr.rel (!%p10_p5) target bundleno = 2 (0x2), region = 63 }

</bundles_post_ra>
